<compile_context>
chip_gen: v7x
topology: tpu7x:2x2x1
jax: 0.10.0
libtpu: 0.0.40
codegen_flags: <defaults>
</compile_context>

<pallas_src>
import functools

import jax
import jax.numpy as jnp
from jax.experimental import pallas as pl
from jax.experimental.pallas import tpu as pltpu

# Activations kept in f32 (matches the PyTorch reference; safe on v5e's
# f32-only VPU).  Set to jnp.bfloat16 on v6e/v7x for ~2x less HBM traffic.
ACT_DTYPE = jnp.float32
TARGET_ROWS = 512        # target M rows (= TH * Wo) processed per grid step
LRELU_SLOPE = 0.2
BN_EPS = 1e-5


# --------------------------- Pallas kernels ---------------------------------

def _conv_act_kernel(x_ref, w_ref, scale_ref, shift_ref, o_ref, pool_ref, *,
                     taps, th, wo):
    """3x3 conv + per-channel affine + LeakyReLU, fused; plus pool partials."""
    cin = x_ref.shape[-1]
    cout = w_ref.shape[-1]
    h0 = pl.program_id(1) * th
    acc = jnp.zeros((th * wo, cout), jnp.float32)
    for t, (p, dh, dw) in enumerate(taps):
        a = x_ref[0, p, pl.ds(h0 + dh, th), pl.ds(dw, wo), :]
        acc = acc + jnp.dot(a.reshape(th * wo, cin).astype(jnp.float32),
                            w_ref[t], preferred_element_type=jnp.float32)
    y = acc * scale_ref[...] + shift_ref[...]
    y = jnp.where(y >= 0.0, y, LRELU_SLOPE * y)
    o_ref[...] = y.reshape(1, th, wo, cout).astype(o_ref.dtype)
    psum = jnp.sum(y, axis=0).reshape(1, 1, 1, cout)
    pool_ref[...] = jnp.broadcast_to(psum, pool_ref.shape)


def _conv_stats_kernel(x_ref, w_ref, y_ref, sum_ref, ssq_ref, *, taps, th, wo):
    """3x3 conv; stores raw conv output + per-tile sum / sum-of-squares."""
    cin = x_ref.shape[-1]
    cout = w_ref.shape[-1]
    h0 = pl.program_id(1) * th
    acc = jnp.zeros((th * wo, cout), jnp.float32)
    for t, (p, dh, dw) in enumerate(taps):
        a = x_ref[0, p, pl.ds(h0 + dh, th), pl.ds(dw, wo), :]
        acc = acc + jnp.dot(a.reshape(th * wo, cin).astype(jnp.float32),
                            w_ref[t], preferred_element_type=jnp.float32)
    y_ref[...] = acc.reshape(1, th, wo, cout).astype(y_ref.dtype)
    s = jnp.sum(acc, axis=0).reshape(1, 1, 1, cout)
    q = jnp.sum(acc * acc, axis=0).reshape(1, 1, 1, cout)
    sum_ref[...] = jnp.broadcast_to(s, sum_ref.shape)
    ssq_ref[...] = jnp.broadcast_to(q, ssq_ref.shape)


def _affine_pool_kernel(y_ref, scale_ref, shift_ref, o_ref, pool_ref):
    """Fused BatchNorm affine + LeakyReLU + per-tile channel sums (avg-pool)."""
    v = y_ref[...].astype(jnp.float32) * scale_ref[...] + shift_ref[...]
    v = jnp.where(v >= 0.0, v, LRELU_SLOPE * v)
    o_ref[...] = v.astype(o_ref.dtype)
    cout = v.shape[-1]
    psum = jnp.sum(v, axis=(0, 1, 2)).reshape(1, 1, 1, cout)
    pool_ref[...] = jnp.broadcast_to(psum, pool_ref.shape)


def _head_kernel(x_ref, w1_ref, b1_ref, w2_ref, b2_ref, o_ref):
    """pooled (N, C) -> 1x1 conv -> LeakyReLU -> 1x1 conv -> Sigmoid."""
    h = jnp.dot(x_ref[...], w1_ref[...], preferred_element_type=jnp.float32) + b1_ref[...]
    h = jnp.where(h >= 0.0, h, LRELU_SLOPE * h)
    y = jnp.dot(h, w2_ref[...], preferred_element_type=jnp.float32) + b2_ref[...]
    o_ref[...] = jax.nn.sigmoid(y)


# --------------------------- Pallas wrappers ---------------------------------

def _pick_th(ho, wo):
    """Largest power-of-two divisor of Ho keeping TH*Wo near TARGET_ROWS."""
    th = ho
    while th % 2 == 0 and th * wo > TARGET_ROWS:
        th //= 2
    return th


def _build_planes(x_nhwc, stride):
    """Zero-pad (k=3, pad=1) and split into stride-parity planes so that every
    in-kernel tap access is a contiguous slice.

    Returns (planes, taps, ho, wo) with planes (N, P, Hp, Wp, C) and
    taps[t] = (plane, row_off, col_off) in PyTorch (kh, kw) order, t = kh*3+kw.
    """
    n, h, w, c = x_nhwc.shape
    ho = (h - 1) // stride + 1
    wo = (w - 1) // stride + 1
    xp = jnp.pad(x_nhwc, ((0, 0), (1, 1), (1, 1), (0, 0)))
    if stride == 1:
        planes = xp[:, None]                              # (N, 1, H+2, W+2, C)
        taps = tuple((0, kh, kw) for kh in range(3) for kw in range(3))
    elif stride == 2:
        hp, wp = h + 2, w + 2
        xp = jnp.pad(xp, ((0, 0), (0, hp % 2), (0, wp % 2), (0, 0)))
        planes = jnp.stack(
            [xp[:, ph::2, pw::2, :] for ph in (0, 1) for pw in (0, 1)], axis=1)
        taps = tuple(((kh % 2) * 2 + (kw % 2), kh // 2, kw // 2)
                     for kh in range(3) for kw in range(3))
    else:
        raise NotImplementedError(f"stride={stride}")
    return planes, taps, ho, wo


def _conv_specs(planes, ho, wo, cout):
    n, p, hp, wp, cin = planes.shape
    th = _pick_th(ho, wo)
    n_hb = ho // th
    grid = (n, n_hb)
    # TODO(synk): for very large spatial inputs, halo-tile the image block over
    # H instead of keeping the whole padded image per batch element in VMEM.
    x_spec = pl.BlockSpec((1, p, hp, wp, cin), lambda i, j: (i, 0, 0, 0, 0))
    w_spec = pl.BlockSpec((9, cin, cout), lambda i, j: (0, 0, 0))
    vec_spec = pl.BlockSpec((1, cout), lambda i, j: (0, 0))
    y_spec = pl.BlockSpec((1, th, wo, cout), lambda i, j: (i, j, 0, 0))
    part_spec = pl.BlockSpec((1, 1, 8, cout), lambda i, j: (i, j, 0, 0))
    return th, n_hb, grid, x_spec, w_spec, vec_spec, y_spec, part_spec


def pallas_conv_act(planes, w9, scale, shift, ho, wo, taps):
    n = planes.shape[0]
    cout = w9.shape[-1]
    th, n_hb, grid, x_spec, w_spec, vec_spec, y_spec, part_spec = \
        _conv_specs(planes, ho, wo, cout)
    kern = functools.partial(_conv_act_kernel, taps=taps, th=th, wo=wo)
    y, pool = pl.pallas_call(
        kern,
        out_shape=(jax.ShapeDtypeStruct((n, ho, wo, cout), ACT_DTYPE),
                   jax.ShapeDtypeStruct((n, n_hb, 8, cout), jnp.float32)),
        grid=grid,
        in_specs=[x_spec, w_spec, vec_spec, vec_spec],
        out_specs=[y_spec, part_spec],
        compiler_params=pltpu.CompilerParams(
            dimension_semantics=("parallel", "parallel")),
    )(planes, w9, scale, shift)
    return y, pool


def pallas_conv_stats(planes, w9, ho, wo, taps):
    n = planes.shape[0]
    cout = w9.shape[-1]
    th, n_hb, grid, x_spec, w_spec, vec_spec, y_spec, part_spec = \
        _conv_specs(planes, ho, wo, cout)
    kern = functools.partial(_conv_stats_kernel, taps=taps, th=th, wo=wo)
    y, s, q = pl.pallas_call(
        kern,
        out_shape=(jax.ShapeDtypeStruct((n, ho, wo, cout), ACT_DTYPE),
                   jax.ShapeDtypeStruct((n, n_hb, 8, cout), jnp.float32),
                   jax.ShapeDtypeStruct((n, n_hb, 8, cout), jnp.float32)),
        grid=grid,
        in_specs=[x_spec, w_spec],
        out_specs=[y_spec, part_spec, part_spec],
        compiler_params=pltpu.CompilerParams(
            dimension_semantics=("parallel", "parallel")),
    )(planes, w9)
    return y, s, q


def pallas_affine_pool(y, scale, shift):
    n, ho, wo, cout = y.shape
    th = _pick_th(ho, wo)
    n_hb = ho // th
    grid = (n, n_hb)
    y_spec = pl.BlockSpec((1, th, wo, cout), lambda i, j: (i, j, 0, 0))
    vec_spec = pl.BlockSpec((1, cout), lambda i, j: (0, 0))
    part_spec = pl.BlockSpec((1, 1, 8, cout), lambda i, j: (i, j, 0, 0))
    out, pool = pl.pallas_call(
        _affine_pool_kernel,
        out_shape=(jax.ShapeDtypeStruct((n, ho, wo, cout), ACT_DTYPE),
                   jax.ShapeDtypeStruct((n, n_hb, 8, cout), jnp.float32)),
        grid=grid,
        in_specs=[y_spec, vec_spec, vec_spec],
        out_specs=[y_spec, part_spec],
        compiler_params=pltpu.CompilerParams(
            dimension_semantics=("parallel", "parallel")),
    )(y, scale, shift)
    return out, pool


def pallas_head(pooled, w1, b1, w2, b2):
    n = pooled.shape[0]
    return pl.pallas_call(
        _head_kernel,
        out_shape=jax.ShapeDtypeStruct((n, 1), jnp.float32),
    )(pooled, w1, b1, w2, b2)


# --------------------------- layer glue (pure JAX) ---------------------------

def conv_block(x_nhwc, w_oihw, bias, gamma, beta, stride, use_bn):
    """Conv2d(k=3, pad=1, stride) [+ BatchNorm2d] + LeakyReLU(0.2).

    Returns (activation NHWC, fused AdaptiveAvgPool2d(1) result (N, Cout))."""
    n, _, _, cin = x_nhwc.shape
    cout = w_oihw.shape[0]
    # PyTorch weight (Cout, Cin, kh, kw) -> (9, Cin, Cout), tap t = kh*3 + kw.
    w9 = jnp.transpose(w_oihw, (2, 3, 1, 0)).reshape(9, cin, cout).astype(jnp.float32)
    planes, taps, ho, wo = _build_planes(x_nhwc.astype(ACT_DTYPE), stride)

    if not use_bn:
        scale = jnp.ones((1, cout), jnp.float32)
        shift = bias.reshape(1, cout).astype(jnp.float32)
        act, pool_part = pallas_conv_act(planes, w9, scale, shift, ho, wo, taps)
    else:
        y_raw, s_part, q_part = pallas_conv_stats(planes, w9, ho, wo, taps)
        count = float(n * ho * wo)
        mean = s_part[:, :, 0, :].sum(axis=(0, 1)) / count
        var = jnp.maximum(q_part[:, :, 0, :].sum(axis=(0, 1)) / count - mean * mean, 0.0)
        # PyTorch training-mode BN of (conv + bias): the conv bias cancels in
        # (v - E[v]); biased variance, eps = 1e-5.
        inv = gamma / jnp.sqrt(var + BN_EPS)
        scale = inv.reshape(1, cout).astype(jnp.float32)
        shift = (beta - mean * inv).reshape(1, cout).astype(jnp.float32)
        act, pool_part = pallas_affine_pool(y_raw, scale, shift)

    pooled = pool_part[:, :, 0, :].sum(axis=1) / float(ho * wo)   # (N, Cout)
    return act, pooled


def init_params(key, in_channels, channels):
    def conv_init(k, cout, cin, ksize):
        fan_in = cin * ksize * ksize
        bound = float(1.0 / (fan_in ** 0.5))
        kw, kb = jax.random.split(k)
        w = jax.random.uniform(kw, (cout, cin, ksize, ksize), jnp.float32, -bound, bound)
        b = jax.random.uniform(kb, (cout,), jnp.float32, -bound, bound)
        return w, b

    n_convs = 1 + 2 * (len(channels) - 1) + 2
    keys = jax.random.split(key, n_convs)
    ki = 0
    params = {}
    params["conv1"] = conv_init(keys[ki], channels[0], in_channels, 3); ki += 1

    blocks = []
    in_c = channels[0]
    for out_c in channels[1:]:
        for stride in (1, 2):
            cin = in_c if stride == 1 else out_c
            w, b = conv_init(keys[ki], out_c, cin, 3); ki += 1
            gamma = jnp.ones((out_c,), jnp.float32)
            beta = jnp.zeros((out_c,), jnp.float32)
            blocks.append((w, b, gamma, beta, stride))
        in_c = out_c
    params["blocks"] = blocks

    c_last = channels[-1]
    w1, b1 = conv_init(keys[ki], c_last * 2, c_last, 1); ki += 1
    w2, b2 = conv_init(keys[ki], 1, c_last * 2, 1); ki += 1
    params["classifier"] = (w1, b1, w2, b2)
    return params


def discriminator_forward(params, x_nchw):
    x = jnp.transpose(x_nchw, (0, 2, 3, 1)).astype(jnp.float32)   # NCHW -> NHWC

    # conv1 + LeakyReLU (no BN): bias + activation fused into the conv kernel.
    w, b = params["conv1"]
    x, pooled = conv_block(x, w, b, None, None, stride=1, use_bn=False)

    # discriminator blocks: conv + BN + LeakyReLU (stats + affine fused).
    for (w, b, gamma, beta, stride) in params["blocks"]:
        x, pooled = conv_block(x, w, b, gamma, beta, stride=stride, use_bn=True)

    # `pooled` of the last block is AdaptiveAvgPool2d(1), produced in-kernel.
    w1, b1, w2, b2 = params["classifier"]
    w1m = w1.reshape(w1.shape[0], w1.shape[1]).T.astype(jnp.float32)   # (C, 2C)
    w2m = w2.reshape(w2.shape[0], w2.shape[1]).T.astype(jnp.float32)   # (2C, 1)
    out = pallas_head(pooled.astype(jnp.float32), w1m,
                      b1.reshape(1, -1).astype(jnp.float32),
                      w2m, b2.reshape(1, 1).astype(jnp.float32))
    # PyTorch forward returns the classifier output of shape (N, 1, 1, 1).
    return out.reshape(x_nchw.shape[0], 1, 1, 1)


if __name__ == "__main__":
    key = jax.random.PRNGKey(0)
    kx, kp = jax.random.split(key)

    in_channels = 3
    channels = [8, 16]                  # small config; 16x16 -> 16x16 -> 8x8
    x = jax.random.normal(kx, (2, in_channels, 16, 16), jnp.float32)
    params = init_params(kp, in_channels, channels)

    fwd = jax.jit(functools.partial(discriminator_forward, params))
    out = jax.block_until_ready(fwd(x))

    assert out.shape == (2, 1, 1, 1), out.shape
    assert bool(jnp.all(jnp.isfinite(out)))
    assert bool(jnp.all((out >= 0.0) & (out <= 1.0)))  # sigmoid output
    print("KERNEL_OK")
</pallas_src>

<mosaic_0001>
module attributes {stable_mosaic.version = 11 : i64} {
  func.func @_conv_act_kernel(%arg0: i32, %arg1: i32, %arg2: memref<1x1x18x18x3xf32, #tpu.memory_space<vmem>>, %arg3: memref<9x3x8xf32, #tpu.memory_space<vmem>>, %arg4: memref<1x8xf32, #tpu.memory_space<vmem>>, %arg5: memref<1x8xf32, #tpu.memory_space<vmem>>, %arg6: memref<1x16x16x8xf32, #tpu.memory_space<vmem>>, %arg7: memref<1x1x8x8xf32, #tpu.memory_space<vmem>>) attributes {dimension_semantics = [#tpu.dimension_semantics<parallel>, #tpu.dimension_semantics<parallel>], iteration_bounds = array<i64: 2, 1>, scalar_prefetch = 0 : i64, scratch_operands = 0 : i64, tpu.core_type = #tpu.core_type<tc>, window_params = [{transform_indices = @transform_0, window_bounds = array<i64: 1, 1, 18, 18, 3>}, {pipeline_mode = #tpu.pipeline_mode<synchronous>, transform_indices = @transform_1, window_bounds = array<i64: 9, 3, 8>}, {pipeline_mode = #tpu.pipeline_mode<synchronous>, transform_indices = @transform_2, window_bounds = array<i64: 1, 8>}, {pipeline_mode = #tpu.pipeline_mode<synchronous>, transform_indices = @transform_3, window_bounds = array<i64: 1, 8>}, {transform_indices = @transform_4, window_bounds = array<i64: 1, 16, 16, 8>}, {transform_indices = @transform_5, window_bounds = array<i64: 1, 1, 8, 8>}]} {
    %c16_i32 = arith.constant 16 : i32
    %0 = arith.muli %arg1, %c16_i32 : i32
    %cst = arith.constant 0.000000e+00 : f32
    %1 = vector.broadcast %cst : f32 to vector<256x8xf32>
    %c0_i32 = arith.constant 0 : i32
    %2 = arith.addi %0, %c0_i32 : i32
    %c0 = arith.constant 0 : index
    %c0_0 = arith.constant 0 : index
    %3 = arith.index_cast %2 : i32 to index
    %c0_1 = arith.constant 0 : index
    %c0_2 = arith.constant 0 : index
    %4 = vector.load %arg2[%c0, %c0_0, %3, %c0_1, %c0_2] : memref<1x1x18x18x3xf32, #tpu.memory_space<vmem>>, vector<1x1x16x16x3xf32>
    %5 = vector.shape_cast %4 : vector<1x1x16x16x3xf32> to vector<16x16x3xf32>
    %6 = vector.shape_cast %5 : vector<16x16x3xf32> to vector<256x3xf32>
    %c0_3 = arith.constant 0 : index
    %c0_4 = arith.constant 0 : index
    %c0_5 = arith.constant 0 : index
    %7 = vector.load %arg3[%c0_3, %c0_4, %c0_5] : memref<9x3x8xf32, #tpu.memory_space<vmem>>, vector<1x3x8xf32>
    %8 = vector.shape_cast %7 : vector<1x3x8xf32> to vector<3x8xf32>
    %cst_6 = arith.constant dense<0.000000e+00> : vector<256x8xf32>
    %9 = tpu.matmul %6, %8, %cst_6 {dimension_numbers = #tpu.dot_dimension_numbers<[1], [0], [0], [1], [0, 0, 1, 1], [], []>} : vector<256x3xf32>, vector<3x8xf32>, vector<256x8xf32> -> vector<256x8xf32>
    %10 = arith.addf %1, %9 : vector<256x8xf32>
    %c0_i32_7 = arith.constant 0 : i32
    %11 = arith.addi %0, %c0_i32_7 : i32
    %c0_8 = arith.constant 0 : index
    %c0_9 = arith.constant 0 : index
    %12 = arith.index_cast %11 : i32 to index
    %c1 = arith.constant 1 : index
    %c0_10 = arith.constant 0 : index
    %13 = vector.load %arg2[%c0_8, %c0_9, %12, %c1, %c0_10] : memref<1x1x18x18x3xf32, #tpu.memory_space<vmem>>, vector<1x1x16x16x3xf32>
    %14 = vector.shape_cast %13 : vector<1x1x16x16x3xf32> to vector<16x16x3xf32>
    %15 = vector.shape_cast %14 : vector<16x16x3xf32> to vector<256x3xf32>
    %c1_11 = arith.constant 1 : index
    %c0_12 = arith.constant 0 : index
    %c0_13 = arith.constant 0 : index
    %16 = vector.load %arg3[%c1_11, %c0_12, %c0_13] : memref<9x3x8xf32, #tpu.memory_space<vmem>>, vector<1x3x8xf32>
    %17 = vector.shape_cast %16 : vector<1x3x8xf32> to vector<3x8xf32>
    %cst_14 = arith.constant dense<0.000000e+00> : vector<256x8xf32>
    %18 = tpu.matmul %15, %17, %cst_14 {dimension_numbers = #tpu.dot_dimension_numbers<[1], [0], [0], [1], [0, 0, 1, 1], [], []>} : vector<256x3xf32>, vector<3x8xf32>, vector<256x8xf32> -> vector<256x8xf32>
    %19 = arith.addf %10, %18 : vector<256x8xf32>
    %c0_i32_15 = arith.constant 0 : i32
    %20 = arith.addi %0, %c0_i32_15 : i32
    %c0_16 = arith.constant 0 : index
    %c0_17 = arith.constant 0 : index
    %21 = arith.index_cast %20 : i32 to index
    %c2 = arith.constant 2 : index
    %c0_18 = arith.constant 0 : index
    %22 = vector.load %arg2[%c0_16, %c0_17, %21, %c2, %c0_18] : memref<1x1x18x18x3xf32, #tpu.memory_space<vmem>>, vector<1x1x16x16x3xf32>
    %23 = vector.shape_cast %22 : vector<1x1x16x16x3xf32> to vector<16x16x3xf32>
    %24 = vector.shape_cast %23 : vector<16x16x3xf32> to vector<256x3xf32>
    %c2_19 = arith.constant 2 : index
    %c0_20 = arith.constant 0 : index
    %c0_21 = arith.constant 0 : index
    %25 = vector.load %arg3[%c2_19, %c0_20, %c0_21] : memref<9x3x8xf32, #tpu.memory_space<vmem>>, vector<1x3x8xf32>
    %26 = vector.shape_cast %25 : vector<1x3x8xf32> to vector<3x8xf32>
    %cst_22 = arith.constant dense<0.000000e+00> : vector<256x8xf32>
    %27 = tpu.matmul %24, %26, %cst_22 {dimension_numbers = #tpu.dot_dimension_numbers<[1], [0], [0], [1], [0, 0, 1, 1], [], []>} : vector<256x3xf32>, vector<3x8xf32>, vector<256x8xf32> -> vector<256x8xf32>
    %28 = arith.addf %19, %27 : vector<256x8xf32>
    %c1_i32 = arith.constant 1 : i32
    %29 = arith.addi %0, %c1_i32 : i32
    %c0_23 = arith.constant 0 : index
    %c0_24 = arith.constant 0 : index
    %30 = arith.index_cast %29 : i32 to index
    %c0_25 = arith.constant 0 : index
    %c0_26 = arith.constant 0 : index
    %31 = vector.load %arg2[%c0_23, %c0_24, %30, %c0_25, %c0_26] : memref<1x1x18x18x3xf32, #tpu.memory_space<vmem>>, vector<1x1x16x16x3xf32>
    %32 = vector.shape_cast %31 : vector<1x1x16x16x3xf32> to vector<16x16x3xf32>
    %33 = vector.shape_cast %32 : vector<16x16x3xf32> to vector<256x3xf32>
    %c3 = arith.constant 3 : index
    %c0_27 = arith.constant 0 : index
    %c0_28 = arith.constant 0 : index
    %34 = vector.load %arg3[%c3, %c0_27, %c0_28] : memref<9x3x8xf32, #tpu.memory_space<vmem>>, vector<1x3x8xf32>
    %35 = vector.shape_cast %34 : vector<1x3x8xf32> to vector<3x8xf32>
    %cst_29 = arith.constant dense<0.000000e+00> : vector<256x8xf32>
    %36 = tpu.matmul %33, %35, %cst_29 {dimension_numbers = #tpu.dot_dimension_numbers<[1], [0], [0], [1], [0, 0, 1, 1], [], []>} : vector<256x3xf32>, vector<3x8xf32>, vector<256x8xf32> -> vector<256x8xf32>
    %37 = arith.addf %28, %36 : vector<256x8xf32>
    %c1_i32_30 = arith.constant 1 : i32
    %38 = arith.addi %0, %c1_i32_30 : i32
    %c0_31 = arith.constant 0 : index
    %c0_32 = arith.constant 0 : index
    %39 = arith.index_cast %38 : i32 to index
    %c1_33 = arith.constant 1 : index
    %c0_34 = arith.constant 0 : index
    %40 = vector.load %arg2[%c0_31, %c0_32, %39, %c1_33, %c0_34] : memref<1x1x18x18x3xf32, #tpu.memory_space<vmem>>, vector<1x1x16x16x3xf32>
    %41 = vector.shape_cast %40 : vector<1x1x16x16x3xf32> to vector<16x16x3xf32>
    %42 = vector.shape_cast %41 : vector<16x16x3xf32> to vector<256x3xf32>
    %c4 = arith.constant 4 : index
    %c0_35 = arith.constant 0 : index
    %c0_36 = arith.constant 0 : index
    %43 = vector.load %arg3[%c4, %c0_35, %c0_36] : memref<9x3x8xf32, #tpu.memory_space<vmem>>, vector<1x3x8xf32>
    %44 = vector.shape_cast %43 : vector<1x3x8xf32> to vector<3x8xf32>
    %cst_37 = arith.constant dense<0.000000e+00> : vector<256x8xf32>
    %45 = tpu.matmul %42, %44, %cst_37 {dimension_numbers = #tpu.dot_dimension_numbers<[1], [0], [0], [1], [0, 0, 1, 1], [], []>} : vector<256x3xf32>, vector<3x8xf32>, vector<256x8xf32> -> vector<256x8xf32>
    %46 = arith.addf %37, %45 : vector<256x8xf32>
    %c1_i32_38 = arith.constant 1 : i32
    %47 = arith.addi %0, %c1_i32_38 : i32
    %c0_39 = arith.constant 0 : index
    %c0_40 = arith.constant 0 : index
    %48 = arith.index_cast %47 : i32 to index
    %c2_41 = arith.constant 2 : index
    %c0_42 = arith.constant 0 : index
    %49 = vector.load %arg2[%c0_39, %c0_40, %48, %c2_41, %c0_42] : memref<1x1x18x18x3xf32, #tpu.memory_space<vmem>>, vector<1x1x16x16x3xf32>
    %50 = vector.shape_cast %49 : vector<1x1x16x16x3xf32> to vector<16x16x3xf32>
    %51 = vector.shape_cast %50 : vector<16x16x3xf32> to vector<256x3xf32>
    %c5 = arith.constant 5 : index
    %c0_43 = arith.constant 0 : index
    %c0_44 = arith.constant 0 : index
    %52 = vector.load %arg3[%c5, %c0_43, %c0_44] : memref<9x3x8xf32, #tpu.memory_space<vmem>>, vector<1x3x8xf32>
    %53 = vector.shape_cast %52 : vector<1x3x8xf32> to vector<3x8xf32>
    %cst_45 = arith.constant dense<0.000000e+00> : vector<256x8xf32>
    %54 = tpu.matmul %51, %53, %cst_45 {dimension_numbers = #tpu.dot_dimension_numbers<[1], [0], [0], [1], [0, 0, 1, 1], [], []>} : vector<256x3xf32>, vector<3x8xf32>, vector<256x8xf32> -> vector<256x8xf32>
    %55 = arith.addf %46, %54 : vector<256x8xf32>
    %c2_i32 = arith.constant 2 : i32
    %56 = arith.addi %0, %c2_i32 : i32
    %c0_46 = arith.constant 0 : index
    %c0_47 = arith.constant 0 : index
    %57 = arith.index_cast %56 : i32 to index
    %c0_48 = arith.constant 0 : index
    %c0_49 = arith.constant 0 : index
    %58 = vector.load %arg2[%c0_46, %c0_47, %57, %c0_48, %c0_49] : memref<1x1x18x18x3xf32, #tpu.memory_space<vmem>>, vector<1x1x16x16x3xf32>
    %59 = vector.shape_cast %58 : vector<1x1x16x16x3xf32> to vector<16x16x3xf32>
    %60 = vector.shape_cast %59 : vector<16x16x3xf32> to vector<256x3xf32>
    %c6 = arith.constant 6 : index
    %c0_50 = arith.constant 0 : index
    %c0_51 = arith.constant 0 : index
    %61 = vector.load %arg3[%c6, %c0_50, %c0_51] : memref<9x3x8xf32, #tpu.memory_space<vmem>>, vector<1x3x8xf32>
    %62 = vector.shape_cast %61 : vector<1x3x8xf32> to vector<3x8xf32>
    %cst_52 = arith.constant dense<0.000000e+00> : vector<256x8xf32>
    %63 = tpu.matmul %60, %62, %cst_52 {dimension_numbers = #tpu.dot_dimension_numbers<[1], [0], [0], [1], [0, 0, 1, 1], [], []>} : vector<256x3xf32>, vector<3x8xf32>, vector<256x8xf32> -> vector<256x8xf32>
    %64 = arith.addf %55, %63 : vector<256x8xf32>
    %c2_i32_53 = arith.constant 2 : i32
    %65 = arith.addi %0, %c2_i32_53 : i32
    %c0_54 = arith.constant 0 : index
    %c0_55 = arith.constant 0 : index
    %66 = arith.index_cast %65 : i32 to index
    %c1_56 = arith.constant 1 : index
    %c0_57 = arith.constant 0 : index
    %67 = vector.load %arg2[%c0_54, %c0_55, %66, %c1_56, %c0_57] : memref<1x1x18x18x3xf32, #tpu.memory_space<vmem>>, vector<1x1x16x16x3xf32>
    %68 = vector.shape_cast %67 : vector<1x1x16x16x3xf32> to vector<16x16x3xf32>
    %69 = vector.shape_cast %68 : vector<16x16x3xf32> to vector<256x3xf32>
    %c7 = arith.constant 7 : index
    %c0_58 = arith.constant 0 : index
    %c0_59 = arith.constant 0 : index
    %70 = vector.load %arg3[%c7, %c0_58, %c0_59] : memref<9x3x8xf32, #tpu.memory_space<vmem>>, vector<1x3x8xf32>
    %71 = vector.shape_cast %70 : vector<1x3x8xf32> to vector<3x8xf32>
    %cst_60 = arith.constant dense<0.000000e+00> : vector<256x8xf32>
    %72 = tpu.matmul %69, %71, %cst_60 {dimension_numbers = #tpu.dot_dimension_numbers<[1], [0], [0], [1], [0, 0, 1, 1], [], []>} : vector<256x3xf32>, vector<3x8xf32>, vector<256x8xf32> -> vector<256x8xf32>
    %73 = arith.addf %64, %72 : vector<256x8xf32>
    %c2_i32_61 = arith.constant 2 : i32
    %74 = arith.addi %0, %c2_i32_61 : i32
    %c0_62 = arith.constant 0 : index
    %c0_63 = arith.constant 0 : index
    %75 = arith.index_cast %74 : i32 to index
    %c2_64 = arith.constant 2 : index
    %c0_65 = arith.constant 0 : index
    %76 = vector.load %arg2[%c0_62, %c0_63, %75, %c2_64, %c0_65] : memref<1x1x18x18x3xf32, #tpu.memory_space<vmem>>, vector<1x1x16x16x3xf32>
    %77 = vector.shape_cast %76 : vector<1x1x16x16x3xf32> to vector<16x16x3xf32>
    %78 = vector.shape_cast %77 : vector<16x16x3xf32> to vector<256x3xf32>
    %c8 = arith.constant 8 : index
    %c0_66 = arith.constant 0 : index
    %c0_67 = arith.constant 0 : index
    %79 = vector.load %arg3[%c8, %c0_66, %c0_67] : memref<9x3x8xf32, #tpu.memory_space<vmem>>, vector<1x3x8xf32>
    %80 = vector.shape_cast %79 : vector<1x3x8xf32> to vector<3x8xf32>
    %cst_68 = arith.constant dense<0.000000e+00> : vector<256x8xf32>
    %81 = tpu.matmul %78, %80, %cst_68 {dimension_numbers = #tpu.dot_dimension_numbers<[1], [0], [0], [1], [0, 0, 1, 1], [], []>} : vector<256x3xf32>, vector<3x8xf32>, vector<256x8xf32> -> vector<256x8xf32>
    %82 = arith.addf %73, %81 : vector<256x8xf32>
    %c0_69 = arith.constant 0 : index
    %c0_70 = arith.constant 0 : index
    %83 = vector.load %arg4[%c0_69, %c0_70] : memref<1x8xf32, #tpu.memory_space<vmem>>, vector<1x8xf32>
    %84 = vector.broadcast %83 : vector<1x8xf32> to vector<256x8xf32>
    %85 = arith.mulf %82, %84 : vector<256x8xf32>
    %c0_71 = arith.constant 0 : index
    %c0_72 = arith.constant 0 : index
    %86 = vector.load %arg5[%c0_71, %c0_72] : memref<1x8xf32, #tpu.memory_space<vmem>>, vector<1x8xf32>
    %87 = vector.broadcast %86 : vector<1x8xf32> to vector<256x8xf32>
    %88 = arith.addf %85, %87 : vector<256x8xf32>
    %cst_73 = arith.constant 0.000000e+00 : f32
    %89 = vector.broadcast %cst_73 : f32 to vector<256x8xf32>
    %90 = arith.cmpf oge, %88, %89 : vector<256x8xf32>
    %cst_74 = arith.constant 2.000000e-01 : f32
    %91 = vector.broadcast %cst_74 : f32 to vector<256x8xf32>
    %92 = arith.mulf %91, %88 : vector<256x8xf32>
    %93 = arith.select %90, %88, %92 : vector<256x8xi1>, vector<256x8xf32>
    %94 = vector.shape_cast %93 : vector<256x8xf32> to vector<1x16x16x8xf32>
    %c0_75 = arith.constant 0 : index
    %c0_76 = arith.constant 0 : index
    %c0_77 = arith.constant 0 : index
    %c0_78 = arith.constant 0 : index
    %95 = vector.load %arg6[%c0_75, %c0_76, %c0_77, %c0_78] : memref<1x16x16x8xf32, #tpu.memory_space<vmem>>, vector<1x16x16x8xf32>
    tpu.vector_store %arg6[%c0_75, %c0_76, %c0_77, %c0_78], %94 {strides = array<i32>} : memref<1x16x16x8xf32, #tpu.memory_space<vmem>>, vector<1x16x16x8xf32>,
    %cst_79 = arith.constant dense<0.000000e+00> : vector<8xf32>
    %96 = vector.multi_reduction <add>, %93, %cst_79 [0] : vector<256x8xf32> to vector<8xf32>
    %97 = vector.shape_cast %96 : vector<8xf32> to vector<1x1x1x8xf32>
    %98 = vector.shape_cast %97 : vector<1x1x1x8xf32> to vector<1x1x1x8xf32>
    %99 = vector.broadcast %98 : vector<1x1x1x8xf32> to vector<1x1x8x8xf32>
    %c0_80 = arith.constant 0 : index
    %c0_81 = arith.constant 0 : index
    %c0_82 = arith.constant 0 : index
    %c0_83 = arith.constant 0 : index
    %100 = vector.load %arg7[%c0_80, %c0_81, %c0_82, %c0_83] : memref<1x1x8x8xf32, #tpu.memory_space<vmem>>, vector<1x1x8x8xf32>
    tpu.vector_store %arg7[%c0_80, %c0_81, %c0_82, %c0_83], %99 {strides = array<i32>} : memref<1x1x8x8xf32, #tpu.memory_space<vmem>>, vector<1x1x8x8xf32>,
    return
  }
  func.func @transform_0(%arg0: i32, %arg1: i32) -> (i32, i32, i32, i32, i32) {
    %c0_i32 = arith.constant 0 : i32
    %c0_i32_0 = arith.constant 0 : i32
    %c0_i32_1 = arith.constant 0 : i32
    %c0_i32_2 = arith.constant 0 : i32
    %c0_i32_3 = arith.constant 0 : i32
    return %arg0, %c0_i32, %c0_i32_0, %c0_i32_1, %c0_i32_2 : i32, i32, i32, i32, i32
  }
  func.func @transform_1(%arg0: i32, %arg1: i32) -> (i32, i32, i32) {
    %c0_i32 = arith.constant 0 : i32
    %c0_i32_0 = arith.constant 0 : i32
    %c0_i32_1 = arith.constant 0 : i32
    %c0_i32_2 = arith.constant 0 : i32
    return %c0_i32, %c0_i32_0, %c0_i32_1 : i32, i32, i32
  }
  func.func @transform_2(%arg0: i32, %arg1: i32) -> (i32, i32) {
    %c0_i32 = arith.constant 0 : i32
    %c0_i32_0 = arith.constant 0 : i32
    %c0_i32_1 = arith.constant 0 : i32
    return %c0_i32, %c0_i32_0 : i32, i32
  }
  func.func @transform_3(%arg0: i32, %arg1: i32) -> (i32, i32) {
    %c0_i32 = arith.constant 0 : i32
    %c0_i32_0 = arith.constant 0 : i32
    %c0_i32_1 = arith.constant 0 : i32
    return %c0_i32, %c0_i32_0 : i32, i32
  }
  func.func @transform_4(%arg0: i32, %arg1: i32) -> (i32, i32, i32, i32) {
    %c0_i32 = arith.constant 0 : i32
    %c0_i32_0 = arith.constant 0 : i32
    %c0_i32_1 = arith.constant 0 : i32
    return %arg0, %arg1, %c0_i32, %c0_i32_0 : i32, i32, i32, i32
  }
  func.func @transform_5(%arg0: i32, %arg1: i32) -> (i32, i32, i32, i32) {
    %c0_i32 = arith.constant 0 : i32
    %c0_i32_0 = arith.constant 0 : i32
    %c0_i32_1 = arith.constant 0 : i32
    return %arg0, %arg1, %c0_i32, %c0_i32_0 : i32, i32, i32, i32
  }
}

module attributes {stable_mosaic.version = 11 : i64} {
  func.func @_conv_stats_kernel(%arg0: i32, %arg1: i32, %arg2: memref<1x1x18x18x8xf32, #tpu.memory_space<vmem>>, %arg3: memref<9x8x16xf32, #tpu.memory_space<vmem>>, %arg4: memref<1x16x16x16xf32, #tpu.memory_space<vmem>>, %arg5: memref<1x1x8x16xf32, #tpu.memory_space<vmem>>, %arg6: memref<1x1x8x16xf32, #tpu.memory_space<vmem>>) attributes {dimension_semantics = [#tpu.dimension_semantics<parallel>, #tpu.dimension_semantics<parallel>], iteration_bounds = array<i64: 2, 1>, scalar_prefetch = 0 : i64, scratch_operands = 0 : i64, tpu.core_type = #tpu.core_type<tc>, window_params = [{transform_indices = @transform_0, window_bounds = array<i64: 1, 1, 18, 18, 8>}, {pipeline_mode = #tpu.pipeline_mode<synchronous>, transform_indices = @transform_1, window_bounds = array<i64: 9, 8, 16>}, {transform_indices = @transform_2, window_bounds = array<i64: 1, 16, 16, 16>}, {transform_indices = @transform_3, window_bounds = array<i64: 1, 1, 8, 16>}, {transform_indices = @transform_4, window_bounds = array<i64: 1, 1, 8, 16>}]} {
    %c16_i32 = arith.constant 16 : i32
    %0 = arith.muli %arg1, %c16_i32 : i32
    %cst = arith.constant 0.000000e+00 : f32
    %1 = vector.broadcast %cst : f32 to vector<256x16xf32>
    %c0_i32 = arith.constant 0 : i32
    %2 = arith.addi %0, %c0_i32 : i32
    %c0 = arith.constant 0 : index
    %c0_0 = arith.constant 0 : index
    %3 = arith.index_cast %2 : i32 to index
    %c0_1 = arith.constant 0 : index
    %c0_2 = arith.constant 0 : index
    %4 = vector.load %arg2[%c0, %c0_0, %3, %c0_1, %c0_2] : memref<1x1x18x18x8xf32, #tpu.memory_space<vmem>>, vector<1x1x16x16x8xf32>
    %5 = vector.shape_cast %4 : vector<1x1x16x16x8xf32> to vector<16x16x8xf32>
    %6 = vector.shape_cast %5 : vector<16x16x8xf32> to vector<256x8xf32>
    %c0_3 = arith.constant 0 : index
    %c0_4 = arith.constant 0 : index
    %c0_5 = arith.constant 0 : index
    %7 = vector.load %arg3[%c0_3, %c0_4, %c0_5] : memref<9x8x16xf32, #tpu.memory_space<vmem>>, vector<1x8x16xf32>
    %8 = vector.shape_cast %7 : vector<1x8x16xf32> to vector<8x16xf32>
    %cst_6 = arith.constant dense<0.000000e+00> : vector<256x16xf32>
    %9 = tpu.matmul %6, %8, %cst_6 {dimension_numbers = #tpu.dot_dimension_numbers<[1], [0], [0], [1], [0, 0, 1, 1], [], []>} : vector<256x8xf32>, vector<8x16xf32>, vector<256x16xf32> -> vector<256x16xf32>
    %10 = arith.addf %1, %9 : vector<256x16xf32>
    %c0_i32_7 = arith.constant 0 : i32
    %11 = arith.addi %0, %c0_i32_7 : i32
    %c0_8 = arith.constant 0 : index
    %c0_9 = arith.constant 0 : index
    %12 = arith.index_cast %11 : i32 to index
    %c1 = arith.constant 1 : index
    %c0_10 = arith.constant 0 : index
    %13 = vector.load %arg2[%c0_8, %c0_9, %12, %c1, %c0_10] : memref<1x1x18x18x8xf32, #tpu.memory_space<vmem>>, vector<1x1x16x16x8xf32>
    %14 = vector.shape_cast %13 : vector<1x1x16x16x8xf32> to vector<16x16x8xf32>
    %15 = vector.shape_cast %14 : vector<16x16x8xf32> to vector<256x8xf32>
    %c1_11 = arith.constant 1 : index
    %c0_12 = arith.constant 0 : index
    %c0_13 = arith.constant 0 : index
    %16 = vector.load %arg3[%c1_11, %c0_12, %c0_13] : memref<9x8x16xf32, #tpu.memory_space<vmem>>, vector<1x8x16xf32>
    %17 = vector.shape_cast %16 : vector<1x8x16xf32> to vector<8x16xf32>
    %cst_14 = arith.constant dense<0.000000e+00> : vector<256x16xf32>
    %18 = tpu.matmul %15, %17, %cst_14 {dimension_numbers = #tpu.dot_dimension_numbers<[1], [0], [0], [1], [0, 0, 1, 1], [], []>} : vector<256x8xf32>, vector<8x16xf32>, vector<256x16xf32> -> vector<256x16xf32>
    %19 = arith.addf %10, %18 : vector<256x16xf32>
    %c0_i32_15 = arith.constant 0 : i32
    %20 = arith.addi %0, %c0_i32_15 : i32
    %c0_16 = arith.constant 0 : index
    %c0_17 = arith.constant 0 : index
    %21 = arith.index_cast %20 : i32 to index
    %c2 = arith.constant 2 : index
    %c0_18 = arith.constant 0 : index
    %22 = vector.load %arg2[%c0_16, %c0_17, %21, %c2, %c0_18] : memref<1x1x18x18x8xf32, #tpu.memory_space<vmem>>, vector<1x1x16x16x8xf32>
    %23 = vector.shape_cast %22 : vector<1x1x16x16x8xf32> to vector<16x16x8xf32>
    %24 = vector.shape_cast %23 : vector<16x16x8xf32> to vector<256x8xf32>
    %c2_19 = arith.constant 2 : index
    %c0_20 = arith.constant 0 : index
    %c0_21 = arith.constant 0 : index
    %25 = vector.load %arg3[%c2_19, %c0_20, %c0_21] : memref<9x8x16xf32, #tpu.memory_space<vmem>>, vector<1x8x16xf32>
    %26 = vector.shape_cast %25 : vector<1x8x16xf32> to vector<8x16xf32>
    %cst_22 = arith.constant dense<0.000000e+00> : vector<256x16xf32>
    %27 = tpu.matmul %24, %26, %cst_22 {dimension_numbers = #tpu.dot_dimension_numbers<[1], [0], [0], [1], [0, 0, 1, 1], [], []>} : vector<256x8xf32>, vector<8x16xf32>, vector<256x16xf32> -> vector<256x16xf32>
    %28 = arith.addf %19, %27 : vector<256x16xf32>
    %c1_i32 = arith.constant 1 : i32
    %29 = arith.addi %0, %c1_i32 : i32
    %c0_23 = arith.constant 0 : index
    %c0_24 = arith.constant 0 : index
    %30 = arith.index_cast %29 : i32 to index
    %c0_25 = arith.constant 0 : index
    %c0_26 = arith.constant 0 : index
    %31 = vector.load %arg2[%c0_23, %c0_24, %30, %c0_25, %c0_26] : memref<1x1x18x18x8xf32, #tpu.memory_space<vmem>>, vector<1x1x16x16x8xf32>
    %32 = vector.shape_cast %31 : vector<1x1x16x16x8xf32> to vector<16x16x8xf32>
    %33 = vector.shape_cast %32 : vector<16x16x8xf32> to vector<256x8xf32>
    %c3 = arith.constant 3 : index
    %c0_27 = arith.constant 0 : index
    %c0_28 = arith.constant 0 : index
    %34 = vector.load %arg3[%c3, %c0_27, %c0_28] : memref<9x8x16xf32, #tpu.memory_space<vmem>>, vector<1x8x16xf32>
    %35 = vector.shape_cast %34 : vector<1x8x16xf32> to vector<8x16xf32>
    %cst_29 = arith.constant dense<0.000000e+00> : vector<256x16xf32>
    %36 = tpu.matmul %33, %35, %cst_29 {dimension_numbers = #tpu.dot_dimension_numbers<[1], [0], [0], [1], [0, 0, 1, 1], [], []>} : vector<256x8xf32>, vector<8x16xf32>, vector<256x16xf32> -> vector<256x16xf32>
    %37 = arith.addf %28, %36 : vector<256x16xf32>
    %c1_i32_30 = arith.constant 1 : i32
    %38 = arith.addi %0, %c1_i32_30 : i32
    %c0_31 = arith.constant 0 : index
    %c0_32 = arith.constant 0 : index
    %39 = arith.index_cast %38 : i32 to index
    %c1_33 = arith.constant 1 : index
    %c0_34 = arith.constant 0 : index
    %40 = vector.load %arg2[%c0_31, %c0_32, %39, %c1_33, %c0_34] : memref<1x1x18x18x8xf32, #tpu.memory_space<vmem>>, vector<1x1x16x16x8xf32>
    %41 = vector.shape_cast %40 : vector<1x1x16x16x8xf32> to vector<16x16x8xf32>
    %42 = vector.shape_cast %41 : vector<16x16x8xf32> to vector<256x8xf32>
    %c4 = arith.constant 4 : index
    %c0_35 = arith.constant 0 : index
    %c0_36 = arith.constant 0 : index
    %43 = vector.load %arg3[%c4, %c0_35, %c0_36] : memref<9x8x16xf32, #tpu.memory_space<vmem>>, vector<1x8x16xf32>
    %44 = vector.shape_cast %43 : vector<1x8x16xf32> to vector<8x16xf32>
    %cst_37 = arith.constant dense<0.000000e+00> : vector<256x16xf32>
    %45 = tpu.matmul %42, %44, %cst_37 {dimension_numbers = #tpu.dot_dimension_numbers<[1], [0], [0], [1], [0, 0, 1, 1], [], []>} : vector<256x8xf32>, vector<8x16xf32>, vector<256x16xf32> -> vector<256x16xf32>
    %46 = arith.addf %37, %45 : vector<256x16xf32>
    %c1_i32_38 = arith.constant 1 : i32
    %47 = arith.addi %0, %c1_i32_38 : i32
    %c0_39 = arith.constant 0 : index
    %c0_40 = arith.constant 0 : index
    %48 = arith.index_cast %47 : i32 to index
    %c2_41 = arith.constant 2 : index
    %c0_42 = arith.constant 0 : index
    %49 = vector.load %arg2[%c0_39, %c0_40, %48, %c2_41, %c0_42] : memref<1x1x18x18x8xf32, #tpu.memory_space<vmem>>, vector<1x1x16x16x8xf32>
    %50 = vector.shape_cast %49 : vector<1x1x16x16x8xf32> to vector<16x16x8xf32>
    %51 = vector.shape_cast %50 : vector<16x16x8xf32> to vector<256x8xf32>
    %c5 = arith.constant 5 : index
    %c0_43 = arith.constant 0 : index
    %c0_44 = arith.constant 0 : index
    %52 = vector.load %arg3[%c5, %c0_43, %c0_44] : memref<9x8x16xf32, #tpu.memory_space<vmem>>, vector<1x8x16xf32>
    %53 = vector.shape_cast %52 : vector<1x8x16xf32> to vector<8x16xf32>
    %cst_45 = arith.constant dense<0.000000e+00> : vector<256x16xf32>
    %54 = tpu.matmul %51, %53, %cst_45 {dimension_numbers = #tpu.dot_dimension_numbers<[1], [0], [0], [1], [0, 0, 1, 1], [], []>} : vector<256x8xf32>, vector<8x16xf32>, vector<256x16xf32> -> vector<256x16xf32>
    %55 = arith.addf %46, %54 : vector<256x16xf32>
    %c2_i32 = arith.constant 2 : i32
    %56 = arith.addi %0, %c2_i32 : i32
    %c0_46 = arith.constant 0 : index
    %c0_47 = arith.constant 0 : index
    %57 = arith.index_cast %56 : i32 to index
    %c0_48 = arith.constant 0 : index
    %c0_49 = arith.constant 0 : index
    %58 = vector.load %arg2[%c0_46, %c0_47, %57, %c0_48, %c0_49] : memref<1x1x18x18x8xf32, #tpu.memory_space<vmem>>, vector<1x1x16x16x8xf32>
    %59 = vector.shape_cast %58 : vector<1x1x16x16x8xf32> to vector<16x16x8xf32>
    %60 = vector.shape_cast %59 : vector<16x16x8xf32> to vector<256x8xf32>
    %c6 = arith.constant 6 : index
    %c0_50 = arith.constant 0 : index
    %c0_51 = arith.constant 0 : index
    %61 = vector.load %arg3[%c6, %c0_50, %c0_51] : memref<9x8x16xf32, #tpu.memory_space<vmem>>, vector<1x8x16xf32>
    %62 = vector.shape_cast %61 : vector<1x8x16xf32> to vector<8x16xf32>
    %cst_52 = arith.constant dense<0.000000e+00> : vector<256x16xf32>
    %63 = tpu.matmul %60, %62, %cst_52 {dimension_numbers = #tpu.dot_dimension_numbers<[1], [0], [0], [1], [0, 0, 1, 1], [], []>} : vector<256x8xf32>, vector<8x16xf32>, vector<256x16xf32> -> vector<256x16xf32>
    %64 = arith.addf %55, %63 : vector<256x16xf32>
    %c2_i32_53 = arith.constant 2 : i32
    %65 = arith.addi %0, %c2_i32_53 : i32
    %c0_54 = arith.constant 0 : index
    %c0_55 = arith.constant 0 : index
    %66 = arith.index_cast %65 : i32 to index
    %c1_56 = arith.constant 1 : index
    %c0_57 = arith.constant 0 : index
    %67 = vector.load %arg2[%c0_54, %c0_55, %66, %c1_56, %c0_57] : memref<1x1x18x18x8xf32, #tpu.memory_space<vmem>>, vector<1x1x16x16x8xf32>
    %68 = vector.shape_cast %67 : vector<1x1x16x16x8xf32> to vector<16x16x8xf32>
    %69 = vector.shape_cast %68 : vector<16x16x8xf32> to vector<256x8xf32>
    %c7 = arith.constant 7 : index
    %c0_58 = arith.constant 0 : index
    %c0_59 = arith.constant 0 : index
    %70 = vector.load %arg3[%c7, %c0_58, %c0_59] : memref<9x8x16xf32, #tpu.memory_space<vmem>>, vector<1x8x16xf32>
    %71 = vector.shape_cast %70 : vector<1x8x16xf32> to vector<8x16xf32>
    %cst_60 = arith.constant dense<0.000000e+00> : vector<256x16xf32>
    %72 = tpu.matmul %69, %71, %cst_60 {dimension_numbers = #tpu.dot_dimension_numbers<[1], [0], [0], [1], [0, 0, 1, 1], [], []>} : vector<256x8xf32>, vector<8x16xf32>, vector<256x16xf32> -> vector<256x16xf32>
    %73 = arith.addf %64, %72 : vector<256x16xf32>
    %c2_i32_61 = arith.constant 2 : i32
    %74 = arith.addi %0, %c2_i32_61 : i32
    %c0_62 = arith.constant 0 : index
    %c0_63 = arith.constant 0 : index
    %75 = arith.index_cast %74 : i32 to index
    %c2_64 = arith.constant 2 : index
    %c0_65 = arith.constant 0 : index
    %76 = vector.load %arg2[%c0_62, %c0_63, %75, %c2_64, %c0_65] : memref<1x1x18x18x8xf32, #tpu.memory_space<vmem>>, vector<1x1x16x16x8xf32>
    %77 = vector.shape_cast %76 : vector<1x1x16x16x8xf32> to vector<16x16x8xf32>
    %78 = vector.shape_cast %77 : vector<16x16x8xf32> to vector<256x8xf32>
    %c8 = arith.constant 8 : index
    %c0_66 = arith.constant 0 : index
    %c0_67 = arith.constant 0 : index
    %79 = vector.load %arg3[%c8, %c0_66, %c0_67] : memref<9x8x16xf32, #tpu.memory_space<vmem>>, vector<1x8x16xf32>
    %80 = vector.shape_cast %79 : vector<1x8x16xf32> to vector<8x16xf32>
    %cst_68 = arith.constant dense<0.000000e+00> : vector<256x16xf32>
    %81 = tpu.matmul %78, %80, %cst_68 {dimension_numbers = #tpu.dot_dimension_numbers<[1], [0], [0], [1], [0, 0, 1, 1], [], []>} : vector<256x8xf32>, vector<8x16xf32>, vector<256x16xf32> -> vector<256x16xf32>
    %82 = arith.addf %73, %81 : vector<256x16xf32>
    %83 = vector.shape_cast %82 : vector<256x16xf32> to vector<1x16x16x16xf32>
    %c0_69 = arith.constant 0 : index
    %c0_70 = arith.constant 0 : index
    %c0_71 = arith.constant 0 : index
    %c0_72 = arith.constant 0 : index
    %84 = vector.load %arg4[%c0_69, %c0_70, %c0_71, %c0_72] : memref<1x16x16x16xf32, #tpu.memory_space<vmem>>, vector<1x16x16x16xf32>
    tpu.vector_store %arg4[%c0_69, %c0_70, %c0_71, %c0_72], %83 {strides = array<i32>} : memref<1x16x16x16xf32, #tpu.memory_space<vmem>>, vector<1x16x16x16xf32>,
    %cst_73 = arith.constant dense<0.000000e+00> : vector<16xf32>
    %85 = vector.multi_reduction <add>, %82, %cst_73 [0] : vector<256x16xf32> to vector<16xf32>
    %86 = vector.shape_cast %85 : vector<16xf32> to vector<1x1x1x16xf32>
    %87 = arith.mulf %82, %82 : vector<256x16xf32>
    %cst_74 = arith.constant dense<0.000000e+00> : vector<16xf32>
    %88 = vector.multi_reduction <add>, %87, %cst_74 [0] : vector<256x16xf32> to vector<16xf32>
    %89 = vector.shape_cast %88 : vector<16xf32> to vector<1x1x1x16xf32>
    %90 = vector.shape_cast %86 : vector<1x1x1x16xf32> to vector<1x1x1x16xf32>
    %91 = vector.broadcast %90 : vector<1x1x1x16xf32> to vector<1x1x8x16xf32>
    %c0_75 = arith.constant 0 : index
    %c0_76 = arith.constant 0 : index
    %c0_77 = arith.constant 0 : index
    %c0_78 = arith.constant 0 : index
    %92 = vector.load %arg5[%c0_75, %c0_76, %c0_77, %c0_78] : memref<1x1x8x16xf32, #tpu.memory_space<vmem>>, vector<1x1x8x16xf32>
    tpu.vector_store %arg5[%c0_75, %c0_76, %c0_77, %c0_78], %91 {strides = array<i32>} : memref<1x1x8x16xf32, #tpu.memory_space<vmem>>, vector<1x1x8x16xf32>,
    %93 = vector.shape_cast %89 : vector<1x1x1x16xf32> to vector<1x1x1x16xf32>
    %94 = vector.broadcast %93 : vector<1x1x1x16xf32> to vector<1x1x8x16xf32>
    %c0_79 = arith.constant 0 : index
    %c0_80 = arith.constant 0 : index
    %c0_81 = arith.constant 0 : index
    %c0_82 = arith.constant 0 : index
    %95 = vector.load %arg6[%c0_79, %c0_80, %c0_81, %c0_82] : memref<1x1x8x16xf32, #tpu.memory_space<vmem>>, vector<1x1x8x16xf32>
    tpu.vector_store %arg6[%c0_79, %c0_80, %c0_81, %c0_82], %94 {strides = array<i32>} : memref<1x1x8x16xf32, #tpu.memory_space<vmem>>, vector<1x1x8x16xf32>,
    return
  }
  func.func @transform_0(%arg0: i32, %arg1: i32) -> (i32, i32, i32, i32, i32) {
    %c0_i32 = arith.constant 0 : i32
    %c0_i32_0 = arith.constant 0 : i32
    %c0_i32_1 = arith.constant 0 : i32
    %c0_i32_2 = arith.constant 0 : i32
    %c0_i32_3 = arith.constant 0 : i32
    return %arg0, %c0_i32, %c0_i32_0, %c0_i32_1, %c0_i32_2 : i32, i32, i32, i32, i32
  }
  func.func @transform_1(%arg0: i32, %arg1: i32) -> (i32, i32, i32) {
    %c0_i32 = arith.constant 0 : i32
    %c0_i32_0 = arith.constant 0 : i32
    %c0_i32_1 = arith.constant 0 : i32
    %c0_i32_2 = arith.constant 0 : i32
    return %c0_i32, %c0_i32_0, %c0_i32_1 : i32, i32, i32
  }
  func.func @transform_2(%arg0: i32, %arg1: i32) -> (i32, i32, i32, i32) {
    %c0_i32 = arith.constant 0 : i32
    %c0_i32_0 = arith.constant 0 : i32
    %c0_i32_1 = arith.constant 0 : i32
    return %arg0, %arg1, %c0_i32, %c0_i32_0 : i32, i32, i32, i32
  }
  func.func @transform_3(%arg0: i32, %arg1: i32) -> (i32, i32, i32, i32) {
    %c0_i32 = arith.constant 0 : i32
    %c0_i32_0 = arith.constant 0 : i32
    %c0_i32_1 = arith.constant 0 : i32
    return %arg0, %arg1, %c0_i32, %c0_i32_0 : i32, i32, i32, i32
  }
  func.func @transform_4(%arg0: i32, %arg1: i32) -> (i32, i32, i32, i32) {
    %c0_i32 = arith.constant 0 : i32
    %c0_i32_0 = arith.constant 0 : i32
    %c0_i32_1 = arith.constant 0 : i32
    return %arg0, %arg1, %c0_i32, %c0_i32_0 : i32, i32, i32, i32
  }
}

module attributes {stable_mosaic.version = 11 : i64} {
  func.func @_affine_pool_kernel(%arg0: i32, %arg1: i32, %arg2: memref<1x16x16x16xf32, #tpu.memory_space<vmem>>, %arg3: memref<1x16xf32, #tpu.memory_space<vmem>>, %arg4: memref<1x16xf32, #tpu.memory_space<vmem>>, %arg5: memref<1x16x16x16xf32, #tpu.memory_space<vmem>>, %arg6: memref<1x1x8x16xf32, #tpu.memory_space<vmem>>) attributes {dimension_semantics = [#tpu.dimension_semantics<parallel>, #tpu.dimension_semantics<parallel>], iteration_bounds = array<i64: 2, 1>, scalar_prefetch = 0 : i64, scratch_operands = 0 : i64, tpu.core_type = #tpu.core_type<tc>, window_params = [{transform_indices = @transform_0, window_bounds = array<i64: 1, 16, 16, 16>}, {pipeline_mode = #tpu.pipeline_mode<synchronous>, transform_indices = @transform_1, window_bounds = array<i64: 1, 16>}, {pipeline_mode = #tpu.pipeline_mode<synchronous>, transform_indices = @transform_2, window_bounds = array<i64: 1, 16>}, {transform_indices = @transform_3, window_bounds = array<i64: 1, 16, 16, 16>}, {transform_indices = @transform_4, window_bounds = array<i64: 1, 1, 8, 16>}]} {
    %c0 = arith.constant 0 : index
    %c0_0 = arith.constant 0 : index
    %c0_1 = arith.constant 0 : index
    %c0_2 = arith.constant 0 : index
    %0 = vector.load %arg2[%c0, %c0_0, %c0_1, %c0_2] : memref<1x16x16x16xf32, #tpu.memory_space<vmem>>, vector<1x16x16x16xf32>
    %c0_3 = arith.constant 0 : index
    %c0_4 = arith.constant 0 : index
    %1 = vector.load %arg3[%c0_3, %c0_4] : memref<1x16xf32, #tpu.memory_space<vmem>>, vector<1x16xf32>
    %2 = vector.shape_cast %1 : vector<1x16xf32> to vector<1x1x1x16xf32>
    %3 = vector.broadcast %2 : vector<1x1x1x16xf32> to vector<1x16x16x16xf32>
    %4 = arith.mulf %0, %3 : vector<1x16x16x16xf32>
    %c0_5 = arith.constant 0 : index
    %c0_6 = arith.constant 0 : index
    %5 = vector.load %arg4[%c0_5, %c0_6] : memref<1x16xf32, #tpu.memory_space<vmem>>, vector<1x16xf32>
    %6 = vector.shape_cast %5 : vector<1x16xf32> to vector<1x1x1x16xf32>
    %7 = vector.broadcast %6 : vector<1x1x1x16xf32> to vector<1x16x16x16xf32>
    %8 = arith.addf %4, %7 : vector<1x16x16x16xf32>
    %cst = arith.constant 0.000000e+00 : f32
    %9 = vector.broadcast %cst : f32 to vector<1x16x16x16xf32>
    %10 = arith.cmpf oge, %8, %9 : vector<1x16x16x16xf32>
    %cst_7 = arith.constant 2.000000e-01 : f32
    %11 = vector.broadcast %cst_7 : f32 to vector<1x16x16x16xf32>
    %12 = arith.mulf %11, %8 : vector<1x16x16x16xf32>
    %13 = arith.select %10, %8, %12 : vector<1x16x16x16xi1>, vector<1x16x16x16xf32>
    %c0_8 = arith.constant 0 : index
    %c0_9 = arith.constant 0 : index
    %c0_10 = arith.constant 0 : index
    %c0_11 = arith.constant 0 : index
    %14 = vector.load %arg5[%c0_8, %c0_9, %c0_10, %c0_11] : memref<1x16x16x16xf32, #tpu.memory_space<vmem>>, vector<1x16x16x16xf32>
    tpu.vector_store %arg5[%c0_8, %c0_9, %c0_10, %c0_11], %13 {strides = array<i32>} : memref<1x16x16x16xf32, #tpu.memory_space<vmem>>, vector<1x16x16x16xf32>,
    %cst_12 = arith.constant dense<0.000000e+00> : vector<16xf32>
    %15 = vector.multi_reduction <add>, %13, %cst_12 [0, 1, 2] : vector<1x16x16x16xf32> to vector<16xf32>
    %16 = vector.shape_cast %15 : vector<16xf32> to vector<1x1x1x16xf32>
    %17 = vector.shape_cast %16 : vector<1x1x1x16xf32> to vector<1x1x1x16xf32>
    %18 = vector.broadcast %17 : vector<1x1x1x16xf32> to vector<1x1x8x16xf32>
    %c0_13 = arith.constant 0 : index
    %c0_14 = arith.constant 0 : index
    %c0_15 = arith.constant 0 : index
    %c0_16 = arith.constant 0 : index
    %19 = vector.load %arg6[%c0_13, %c0_14, %c0_15, %c0_16] : memref<1x1x8x16xf32, #tpu.memory_space<vmem>>, vector<1x1x8x16xf32>
    tpu.vector_store %arg6[%c0_13, %c0_14, %c0_15, %c0_16], %18 {strides = array<i32>} : memref<1x1x8x16xf32, #tpu.memory_space<vmem>>, vector<1x1x8x16xf32>,
    return
  }
  func.func @transform_0(%arg0: i32, %arg1: i32) -> (i32, i32, i32, i32) {
    %c0_i32 = arith.constant 0 : i32
    %c0_i32_0 = arith.constant 0 : i32
    %c0_i32_1 = arith.constant 0 : i32
    return %arg0, %arg1, %c0_i32, %c0_i32_0 : i32, i32, i32, i32
  }
  func.func @transform_1(%arg0: i32, %arg1: i32) -> (i32, i32) {
    %c0_i32 = arith.constant 0 : i32
    %c0_i32_0 = arith.constant 0 : i32
    %c0_i32_1 = arith.constant 0 : i32
    return %c0_i32, %c0_i32_0 : i32, i32
  }
  func.func @transform_2(%arg0: i32, %arg1: i32) -> (i32, i32) {
    %c0_i32 = arith.constant 0 : i32
    %c0_i32_0 = arith.constant 0 : i32
    %c0_i32_1 = arith.constant 0 : i32
    return %c0_i32, %c0_i32_0 : i32, i32
  }
  func.func @transform_3(%arg0: i32, %arg1: i32) -> (i32, i32, i32, i32) {
    %c0_i32 = arith.constant 0 : i32
    %c0_i32_0 = arith.constant 0 : i32
    %c0_i32_1 = arith.constant 0 : i32
    return %arg0, %arg1, %c0_i32, %c0_i32_0 : i32, i32, i32, i32
  }
  func.func @transform_4(%arg0: i32, %arg1: i32) -> (i32, i32, i32, i32) {
    %c0_i32 = arith.constant 0 : i32
    %c0_i32_0 = arith.constant 0 : i32
    %c0_i32_1 = arith.constant 0 : i32
    return %arg0, %arg1, %c0_i32, %c0_i32_0 : i32, i32, i32, i32
  }
}

module attributes {stable_mosaic.version = 11 : i64} {
  func.func @_affine_pool_kernel(%arg0: i32, %arg1: i32, %arg2: memref<1x8x8x16xf32, #tpu.memory_space<vmem>>, %arg3: memref<1x16xf32, #tpu.memory_space<vmem>>, %arg4: memref<1x16xf32, #tpu.memory_space<vmem>>, %arg5: memref<1x8x8x16xf32, #tpu.memory_space<vmem>>, %arg6: memref<1x1x8x16xf32, #tpu.memory_space<vmem>>) attributes {dimension_semantics = [#tpu.dimension_semantics<parallel>, #tpu.dimension_semantics<parallel>], iteration_bounds = array<i64: 2, 1>, scalar_prefetch = 0 : i64, scratch_operands = 0 : i64, tpu.core_type = #tpu.core_type<tc>, window_params = [{transform_indices = @transform_0, window_bounds = array<i64: 1, 8, 8, 16>}, {pipeline_mode = #tpu.pipeline_mode<synchronous>, transform_indices = @transform_1, window_bounds = array<i64: 1, 16>}, {pipeline_mode = #tpu.pipeline_mode<synchronous>, transform_indices = @transform_2, window_bounds = array<i64: 1, 16>}, {transform_indices = @transform_3, window_bounds = array<i64: 1, 8, 8, 16>}, {transform_indices = @transform_4, window_bounds = array<i64: 1, 1, 8, 16>}]} {
    %c0 = arith.constant 0 : index
    %c0_0 = arith.constant 0 : index
    %c0_1 = arith.constant 0 : index
    %c0_2 = arith.constant 0 : index
    %0 = vector.load %arg2[%c0, %c0_0, %c0_1, %c0_2] : memref<1x8x8x16xf32, #tpu.memory_space<vmem>>, vector<1x8x8x16xf32>
    %c0_3 = arith.constant 0 : index
    %c0_4 = arith.constant 0 : index
    %1 = vector.load %arg3[%c0_3, %c0_4] : memref<1x16xf32, #tpu.memory_space<vmem>>, vector<1x16xf32>
    %2 = vector.shape_cast %1 : vector<1x16xf32> to vector<1x1x1x16xf32>
    %3 = vector.broadcast %2 : vector<1x1x1x16xf32> to vector<1x8x8x16xf32>
    %4 = arith.mulf %0, %3 : vector<1x8x8x16xf32>
    %c0_5 = arith.constant 0 : index
    %c0_6 = arith.constant 0 : index
    %5 = vector.load %arg4[%c0_5, %c0_6] : memref<1x16xf32, #tpu.memory_space<vmem>>, vector<1x16xf32>
    %6 = vector.shape_cast %5 : vector<1x16xf32> to vector<1x1x1x16xf32>
    %7 = vector.broadcast %6 : vector<1x1x1x16xf32> to vector<1x8x8x16xf32>
    %8 = arith.addf %4, %7 : vector<1x8x8x16xf32>
    %cst = arith.constant 0.000000e+00 : f32
    %9 = vector.broadcast %cst : f32 to vector<1x8x8x16xf32>
    %10 = arith.cmpf oge, %8, %9 : vector<1x8x8x16xf32>
    %cst_7 = arith.constant 2.000000e-01 : f32
    %11 = vector.broadcast %cst_7 : f32 to vector<1x8x8x16xf32>
    %12 = arith.mulf %11, %8 : vector<1x8x8x16xf32>
    %13 = arith.select %10, %8, %12 : vector<1x8x8x16xi1>, vector<1x8x8x16xf32>
    %c0_8 = arith.constant 0 : index
    %c0_9 = arith.constant 0 : index
    %c0_10 = arith.constant 0 : index
    %c0_11 = arith.constant 0 : index
    %14 = vector.load %arg5[%c0_8, %c0_9, %c0_10, %c0_11] : memref<1x8x8x16xf32, #tpu.memory_space<vmem>>, vector<1x8x8x16xf32>
    tpu.vector_store %arg5[%c0_8, %c0_9, %c0_10, %c0_11], %13 {strides = array<i32>} : memref<1x8x8x16xf32, #tpu.memory_space<vmem>>, vector<1x8x8x16xf32>,
    %cst_12 = arith.constant dense<0.000000e+00> : vector<16xf32>
    %15 = vector.multi_reduction <add>, %13, %cst_12 [0, 1, 2] : vector<1x8x8x16xf32> to vector<16xf32>
    %16 = vector.shape_cast %15 : vector<16xf32> to vector<1x1x1x16xf32>
    %17 = vector.shape_cast %16 : vector<1x1x1x16xf32> to vector<1x1x1x16xf32>
    %18 = vector.broadcast %17 : vector<1x1x1x16xf32> to vector<1x1x8x16xf32>
    %c0_13 = arith.constant 0 : index
    %c0_14 = arith.constant 0 : index
    %c0_15 = arith.constant 0 : index
    %c0_16 = arith.constant 0 : index
    %19 = vector.load %arg6[%c0_13, %c0_14, %c0_15, %c0_16] : memref<1x1x8x16xf32, #tpu.memory_space<vmem>>, vector<1x1x8x16xf32>
    tpu.vector_store %arg6[%c0_13, %c0_14, %c0_15, %c0_16], %18 {strides = array<i32>} : memref<1x1x8x16xf32, #tpu.memory_space<vmem>>, vector<1x1x8x16xf32>,
    return
  }
  func.func @transform_0(%arg0: i32, %arg1: i32) -> (i32, i32, i32, i32) {
    %c0_i32 = arith.constant 0 : i32
    %c0_i32_0 = arith.constant 0 : i32
    %c0_i32_1 = arith.constant 0 : i32
    return %arg0, %arg1, %c0_i32, %c0_i32_0 : i32, i32, i32, i32
  }
  func.func @transform_1(%arg0: i32, %arg1: i32) -> (i32, i32) {
    %c0_i32 = arith.constant 0 : i32
    %c0_i32_0 = arith.constant 0 : i32
    %c0_i32_1 = arith.constant 0 : i32
    return %c0_i32, %c0_i32_0 : i32, i32
  }
  func.func @transform_2(%arg0: i32, %arg1: i32) -> (i32, i32) {
    %c0_i32 = arith.constant 0 : i32
    %c0_i32_0 = arith.constant 0 : i32
    %c0_i32_1 = arith.constant 0 : i32
    return %c0_i32, %c0_i32_0 : i32, i32
  }
  func.func @transform_3(%arg0: i32, %arg1: i32) -> (i32, i32, i32, i32) {
    %c0_i32 = arith.constant 0 : i32
    %c0_i32_0 = arith.constant 0 : i32
    %c0_i32_1 = arith.constant 0 : i32
    return %arg0, %arg1, %c0_i32, %c0_i32_0 : i32, i32, i32, i32
  }
  func.func @transform_4(%arg0: i32, %arg1: i32) -> (i32, i32, i32, i32) {
    %c0_i32 = arith.constant 0 : i32
    %c0_i32_0 = arith.constant 0 : i32
    %c0_i32_1 = arith.constant 0 : i32
    return %arg0, %arg1, %c0_i32, %c0_i32_0 : i32, i32, i32, i32
  }
}

module attributes {stable_mosaic.version = 11 : i64} {
  func.func @_conv_stats_kernel(%arg0: i32, %arg1: i32, %arg2: memref<1x4x9x9x16xf32, #tpu.memory_space<vmem>>, %arg3: memref<9x16x16xf32, #tpu.memory_space<vmem>>, %arg4: memref<1x8x8x16xf32, #tpu.memory_space<vmem>>, %arg5: memref<1x1x8x16xf32, #tpu.memory_space<vmem>>, %arg6: memref<1x1x8x16xf32, #tpu.memory_space<vmem>>) attributes {dimension_semantics = [#tpu.dimension_semantics<parallel>, #tpu.dimension_semantics<parallel>], iteration_bounds = array<i64: 2, 1>, scalar_prefetch = 0 : i64, scratch_operands = 0 : i64, tpu.core_type = #tpu.core_type<tc>, window_params = [{transform_indices = @transform_0, window_bounds = array<i64: 1, 4, 9, 9, 16>}, {pipeline_mode = #tpu.pipeline_mode<synchronous>, transform_indices = @transform_1, window_bounds = array<i64: 9, 16, 16>}, {transform_indices = @transform_2, window_bounds = array<i64: 1, 8, 8, 16>}, {transform_indices = @transform_3, window_bounds = array<i64: 1, 1, 8, 16>}, {transform_indices = @transform_4, window_bounds = array<i64: 1, 1, 8, 16>}]} {
    %c8_i32 = arith.constant 8 : i32
    %0 = arith.muli %arg1, %c8_i32 : i32
    %cst = arith.constant 0.000000e+00 : f32
    %1 = vector.broadcast %cst : f32 to vector<64x16xf32>
    %c0_i32 = arith.constant 0 : i32
    %2 = arith.addi %0, %c0_i32 : i32
    %c0 = arith.constant 0 : index
    %c0_0 = arith.constant 0 : index
    %3 = arith.index_cast %2 : i32 to index
    %c0_1 = arith.constant 0 : index
    %c0_2 = arith.constant 0 : index
    %4 = vector.load %arg2[%c0, %c0_0, %3, %c0_1, %c0_2] : memref<1x4x9x9x16xf32, #tpu.memory_space<vmem>>, vector<1x1x8x8x16xf32>
    %5 = vector.shape_cast %4 : vector<1x1x8x8x16xf32> to vector<8x8x16xf32>
    %6 = vector.shape_cast %5 : vector<8x8x16xf32> to vector<64x16xf32>
    %c0_3 = arith.constant 0 : index
    %c0_4 = arith.constant 0 : index
    %c0_5 = arith.constant 0 : index
    %7 = vector.load %arg3[%c0_3, %c0_4, %c0_5] : memref<9x16x16xf32, #tpu.memory_space<vmem>>, vector<1x16x16xf32>
    %8 = vector.shape_cast %7 : vector<1x16x16xf32> to vector<16x16xf32>
    %cst_6 = arith.constant dense<0.000000e+00> : vector<64x16xf32>
    %9 = tpu.matmul %6, %8, %cst_6 {dimension_numbers = #tpu.dot_dimension_numbers<[1], [0], [0], [1], [0, 0, 1, 1], [], []>} : vector<64x16xf32>, vector<16x16xf32>, vector<64x16xf32> -> vector<64x16xf32>
    %10 = arith.addf %1, %9 : vector<64x16xf32>
    %c0_i32_7 = arith.constant 0 : i32
    %11 = arith.addi %0, %c0_i32_7 : i32
    %c0_8 = arith.constant 0 : index
    %c1 = arith.constant 1 : index
    %12 = arith.index_cast %11 : i32 to index
    %c0_9 = arith.constant 0 : index
    %c0_10 = arith.constant 0 : index
    %13 = vector.load %arg2[%c0_8, %c1, %12, %c0_9, %c0_10] : memref<1x4x9x9x16xf32, #tpu.memory_space<vmem>>, vector<1x1x8x8x16xf32>
    %14 = vector.shape_cast %13 : vector<1x1x8x8x16xf32> to vector<8x8x16xf32>
    %15 = vector.shape_cast %14 : vector<8x8x16xf32> to vector<64x16xf32>
    %c1_11 = arith.constant 1 : index
    %c0_12 = arith.constant 0 : index
    %c0_13 = arith.constant 0 : index
    %16 = vector.load %arg3[%c1_11, %c0_12, %c0_13] : memref<9x16x16xf32, #tpu.memory_space<vmem>>, vector<1x16x16xf32>
    %17 = vector.shape_cast %16 : vector<1x16x16xf32> to vector<16x16xf32>
    %cst_14 = arith.constant dense<0.000000e+00> : vector<64x16xf32>
    %18 = tpu.matmul %15, %17, %cst_14 {dimension_numbers = #tpu.dot_dimension_numbers<[1], [0], [0], [1], [0, 0, 1, 1], [], []>} : vector<64x16xf32>, vector<16x16xf32>, vector<64x16xf32> -> vector<64x16xf32>
    %19 = arith.addf %10, %18 : vector<64x16xf32>
    %c0_i32_15 = arith.constant 0 : i32
    %20 = arith.addi %0, %c0_i32_15 : i32
    %c0_16 = arith.constant 0 : index
    %c0_17 = arith.constant 0 : index
    %21 = arith.index_cast %20 : i32 to index
    %c1_18 = arith.constant 1 : index
    %c0_19 = arith.constant 0 : index
    %22 = vector.load %arg2[%c0_16, %c0_17, %21, %c1_18, %c0_19] : memref<1x4x9x9x16xf32, #tpu.memory_space<vmem>>, vector<1x1x8x8x16xf32>
    %23 = vector.shape_cast %22 : vector<1x1x8x8x16xf32> to vector<8x8x16xf32>
    %24 = vector.shape_cast %23 : vector<8x8x16xf32> to vector<64x16xf32>
    %c2 = arith.constant 2 : index
    %c0_20 = arith.constant 0 : index
    %c0_21 = arith.constant 0 : index
    %25 = vector.load %arg3[%c2, %c0_20, %c0_21] : memref<9x16x16xf32, #tpu.memory_space<vmem>>, vector<1x16x16xf32>
    %26 = vector.shape_cast %25 : vector<1x16x16xf32> to vector<16x16xf32>
    %cst_22 = arith.constant dense<0.000000e+00> : vector<64x16xf32>
    %27 = tpu.matmul %24, %26, %cst_22 {dimension_numbers = #tpu.dot_dimension_numbers<[1], [0], [0], [1], [0, 0, 1, 1], [], []>} : vector<64x16xf32>, vector<16x16xf32>, vector<64x16xf32> -> vector<64x16xf32>
    %28 = arith.addf %19, %27 : vector<64x16xf32>
    %c0_i32_23 = arith.constant 0 : i32
    %29 = arith.addi %0, %c0_i32_23 : i32
    %c0_24 = arith.constant 0 : index
    %c2_25 = arith.constant 2 : index
    %30 = arith.index_cast %29 : i32 to index
    %c0_26 = arith.constant 0 : index
    %c0_27 = arith.constant 0 : index
    %31 = vector.load %arg2[%c0_24, %c2_25, %30, %c0_26, %c0_27] : memref<1x4x9x9x16xf32, #tpu.memory_space<vmem>>, vector<1x1x8x8x16xf32>
    %32 = vector.shape_cast %31 : vector<1x1x8x8x16xf32> to vector<8x8x16xf32>
    %33 = vector.shape_cast %32 : vector<8x8x16xf32> to vector<64x16xf32>
    %c3 = arith.constant 3 : index
    %c0_28 = arith.constant 0 : index
    %c0_29 = arith.constant 0 : index
    %34 = vector.load %arg3[%c3, %c0_28, %c0_29] : memref<9x16x16xf32, #tpu.memory_space<vmem>>, vector<1x16x16xf32>
    %35 = vector.shape_cast %34 : vector<1x16x16xf32> to vector<16x16xf32>
    %cst_30 = arith.constant dense<0.000000e+00> : vector<64x16xf32>
    %36 = tpu.matmul %33, %35, %cst_30 {dimension_numbers = #tpu.dot_dimension_numbers<[1], [0], [0], [1], [0, 0, 1, 1], [], []>} : vector<64x16xf32>, vector<16x16xf32>, vector<64x16xf32> -> vector<64x16xf32>
    %37 = arith.addf %28, %36 : vector<64x16xf32>
    %c0_i32_31 = arith.constant 0 : i32
    %38 = arith.addi %0, %c0_i32_31 : i32
    %c0_32 = arith.constant 0 : index
    %c3_33 = arith.constant 3 : index
    %39 = arith.index_cast %38 : i32 to index
    %c0_34 = arith.constant 0 : index
    %c0_35 = arith.constant 0 : index
    %40 = vector.load %arg2[%c0_32, %c3_33, %39, %c0_34, %c0_35] : memref<1x4x9x9x16xf32, #tpu.memory_space<vmem>>, vector<1x1x8x8x16xf32>
    %41 = vector.shape_cast %40 : vector<1x1x8x8x16xf32> to vector<8x8x16xf32>
    %42 = vector.shape_cast %41 : vector<8x8x16xf32> to vector<64x16xf32>
    %c4 = arith.constant 4 : index
    %c0_36 = arith.constant 0 : index
    %c0_37 = arith.constant 0 : index
    %43 = vector.load %arg3[%c4, %c0_36, %c0_37] : memref<9x16x16xf32, #tpu.memory_space<vmem>>, vector<1x16x16xf32>
    %44 = vector.shape_cast %43 : vector<1x16x16xf32> to vector<16x16xf32>
    %cst_38 = arith.constant dense<0.000000e+00> : vector<64x16xf32>
    %45 = tpu.matmul %42, %44, %cst_38 {dimension_numbers = #tpu.dot_dimension_numbers<[1], [0], [0], [1], [0, 0, 1, 1], [], []>} : vector<64x16xf32>, vector<16x16xf32>, vector<64x16xf32> -> vector<64x16xf32>
    %46 = arith.addf %37, %45 : vector<64x16xf32>
    %c0_i32_39 = arith.constant 0 : i32
    %47 = arith.addi %0, %c0_i32_39 : i32
    %c0_40 = arith.constant 0 : index
    %c2_41 = arith.constant 2 : index
    %48 = arith.index_cast %47 : i32 to index
    %c1_42 = arith.constant 1 : index
    %c0_43 = arith.constant 0 : index
    %49 = vector.load %arg2[%c0_40, %c2_41, %48, %c1_42, %c0_43] : memref<1x4x9x9x16xf32, #tpu.memory_space<vmem>>, vector<1x1x8x8x16xf32>
    %50 = vector.shape_cast %49 : vector<1x1x8x8x16xf32> to vector<8x8x16xf32>
    %51 = vector.shape_cast %50 : vector<8x8x16xf32> to vector<64x16xf32>
    %c5 = arith.constant 5 : index
    %c0_44 = arith.constant 0 : index
    %c0_45 = arith.constant 0 : index
    %52 = vector.load %arg3[%c5, %c0_44, %c0_45] : memref<9x16x16xf32, #tpu.memory_space<vmem>>, vector<1x16x16xf32>
    %53 = vector.shape_cast %52 : vector<1x16x16xf32> to vector<16x16xf32>
    %cst_46 = arith.constant dense<0.000000e+00> : vector<64x16xf32>
    %54 = tpu.matmul %51, %53, %cst_46 {dimension_numbers = #tpu.dot_dimension_numbers<[1], [0], [0], [1], [0, 0, 1, 1], [], []>} : vector<64x16xf32>, vector<16x16xf32>, vector<64x16xf32> -> vector<64x16xf32>
    %55 = arith.addf %46, %54 : vector<64x16xf32>
    %c1_i32 = arith.constant 1 : i32
    %56 = arith.addi %0, %c1_i32 : i32
    %c0_47 = arith.constant 0 : index
    %c0_48 = arith.constant 0 : index
    %57 = arith.index_cast %56 : i32 to index
    %c0_49 = arith.constant 0 : index
    %c0_50 = arith.constant 0 : index
    %58 = vector.load %arg2[%c0_47, %c0_48, %57, %c0_49, %c0_50] : memref<1x4x9x9x16xf32, #tpu.memory_space<vmem>>, vector<1x1x8x8x16xf32>
    %59 = vector.shape_cast %58 : vector<1x1x8x8x16xf32> to vector<8x8x16xf32>
    %60 = vector.shape_cast %59 : vector<8x8x16xf32> to vector<64x16xf32>
    %c6 = arith.constant 6 : index
    %c0_51 = arith.constant 0 : index
    %c0_52 = arith.constant 0 : index
    %61 = vector.load %arg3[%c6, %c0_51, %c0_52] : memref<9x16x16xf32, #tpu.memory_space<vmem>>, vector<1x16x16xf32>
    %62 = vector.shape_cast %61 : vector<1x16x16xf32> to vector<16x16xf32>
    %cst_53 = arith.constant dense<0.000000e+00> : vector<64x16xf32>
    %63 = tpu.matmul %60, %62, %cst_53 {dimension_numbers = #tpu.dot_dimension_numbers<[1], [0], [0], [1], [0, 0, 1, 1], [], []>} : vector<64x16xf32>, vector<16x16xf32>, vector<64x16xf32> -> vector<64x16xf32>
    %64 = arith.addf %55, %63 : vector<64x16xf32>
    %c1_i32_54 = arith.constant 1 : i32
    %65 = arith.addi %0, %c1_i32_54 : i32
    %c0_55 = arith.constant 0 : index
    %c1_56 = arith.constant 1 : index
    %66 = arith.index_cast %65 : i32 to index
    %c0_57 = arith.constant 0 : index
    %c0_58 = arith.constant 0 : index
    %67 = vector.load %arg2[%c0_55, %c1_56, %66, %c0_57, %c0_58] : memref<1x4x9x9x16xf32, #tpu.memory_space<vmem>>, vector<1x1x8x8x16xf32>
    %68 = vector.shape_cast %67 : vector<1x1x8x8x16xf32> to vector<8x8x16xf32>
    %69 = vector.shape_cast %68 : vector<8x8x16xf32> to vector<64x16xf32>
    %c7 = arith.constant 7 : index
    %c0_59 = arith.constant 0 : index
    %c0_60 = arith.constant 0 : index
    %70 = vector.load %arg3[%c7, %c0_59, %c0_60] : memref<9x16x16xf32, #tpu.memory_space<vmem>>, vector<1x16x16xf32>
    %71 = vector.shape_cast %70 : vector<1x16x16xf32> to vector<16x16xf32>
    %cst_61 = arith.constant dense<0.000000e+00> : vector<64x16xf32>
    %72 = tpu.matmul %69, %71, %cst_61 {dimension_numbers = #tpu.dot_dimension_numbers<[1], [0], [0], [1], [0, 0, 1, 1], [], []>} : vector<64x16xf32>, vector<16x16xf32>, vector<64x16xf32> -> vector<64x16xf32>
    %73 = arith.addf %64, %72 : vector<64x16xf32>
    %c1_i32_62 = arith.constant 1 : i32
    %74 = arith.addi %0, %c1_i32_62 : i32
    %c0_63 = arith.constant 0 : index
    %c0_64 = arith.constant 0 : index
    %75 = arith.index_cast %74 : i32 to index
    %c1_65 = arith.constant 1 : index
    %c0_66 = arith.constant 0 : index
    %76 = vector.load %arg2[%c0_63, %c0_64, %75, %c1_65, %c0_66] : memref<1x4x9x9x16xf32, #tpu.memory_space<vmem>>, vector<1x1x8x8x16xf32>
    %77 = vector.shape_cast %76 : vector<1x1x8x8x16xf32> to vector<8x8x16xf32>
    %78 = vector.shape_cast %77 : vector<8x8x16xf32> to vector<64x16xf32>
    %c8 = arith.constant 8 : index
    %c0_67 = arith.constant 0 : index
    %c0_68 = arith.constant 0 : index
    %79 = vector.load %arg3[%c8, %c0_67, %c0_68] : memref<9x16x16xf32, #tpu.memory_space<vmem>>, vector<1x16x16xf32>
    %80 = vector.shape_cast %79 : vector<1x16x16xf32> to vector<16x16xf32>
    %cst_69 = arith.constant dense<0.000000e+00> : vector<64x16xf32>
    %81 = tpu.matmul %78, %80, %cst_69 {dimension_numbers = #tpu.dot_dimension_numbers<[1], [0], [0], [1], [0, 0, 1, 1], [], []>} : vector<64x16xf32>, vector<16x16xf32>, vector<64x16xf32> -> vector<64x16xf32>
    %82 = arith.addf %73, %81 : vector<64x16xf32>
    %83 = vector.shape_cast %82 : vector<64x16xf32> to vector<1x8x8x16xf32>
    %c0_70 = arith.constant 0 : index
    %c0_71 = arith.constant 0 : index
    %c0_72 = arith.constant 0 : index
    %c0_73 = arith.constant 0 : index
    %84 = vector.load %arg4[%c0_70, %c0_71, %c0_72, %c0_73] : memref<1x8x8x16xf32, #tpu.memory_space<vmem>>, vector<1x8x8x16xf32>
    tpu.vector_store %arg4[%c0_70, %c0_71, %c0_72, %c0_73], %83 {strides = array<i32>} : memref<1x8x8x16xf32, #tpu.memory_space<vmem>>, vector<1x8x8x16xf32>,
    %cst_74 = arith.constant dense<0.000000e+00> : vector<16xf32>
    %85 = vector.multi_reduction <add>, %82, %cst_74 [0] : vector<64x16xf32> to vector<16xf32>
    %86 = vector.shape_cast %85 : vector<16xf32> to vector<1x1x1x16xf32>
    %87 = arith.mulf %82, %82 : vector<64x16xf32>
    %cst_75 = arith.constant dense<0.000000e+00> : vector<16xf32>
    %88 = vector.multi_reduction <add>, %87, %cst_75 [0] : vector<64x16xf32> to vector<16xf32>
    %89 = vector.shape_cast %88 : vector<16xf32> to vector<1x1x1x16xf32>
    %90 = vector.shape_cast %86 : vector<1x1x1x16xf32> to vector<1x1x1x16xf32>
    %91 = vector.broadcast %90 : vector<1x1x1x16xf32> to vector<1x1x8x16xf32>
    %c0_76 = arith.constant 0 : index
    %c0_77 = arith.constant 0 : index
    %c0_78 = arith.constant 0 : index
    %c0_79 = arith.constant 0 : index
    %92 = vector.load %arg5[%c0_76, %c0_77, %c0_78, %c0_79] : memref<1x1x8x16xf32, #tpu.memory_space<vmem>>, vector<1x1x8x16xf32>
    tpu.vector_store %arg5[%c0_76, %c0_77, %c0_78, %c0_79], %91 {strides = array<i32>} : memref<1x1x8x16xf32, #tpu.memory_space<vmem>>, vector<1x1x8x16xf32>,
    %93 = vector.shape_cast %89 : vector<1x1x1x16xf32> to vector<1x1x1x16xf32>
    %94 = vector.broadcast %93 : vector<1x1x1x16xf32> to vector<1x1x8x16xf32>
    %c0_80 = arith.constant 0 : index
    %c0_81 = arith.constant 0 : index
    %c0_82 = arith.constant 0 : index
    %c0_83 = arith.constant 0 : index
    %95 = vector.load %arg6[%c0_80, %c0_81, %c0_82, %c0_83] : memref<1x1x8x16xf32, #tpu.memory_space<vmem>>, vector<1x1x8x16xf32>
    tpu.vector_store %arg6[%c0_80, %c0_81, %c0_82, %c0_83], %94 {strides = array<i32>} : memref<1x1x8x16xf32, #tpu.memory_space<vmem>>, vector<1x1x8x16xf32>,
    return
  }
  func.func @transform_0(%arg0: i32, %arg1: i32) -> (i32, i32, i32, i32, i32) {
    %c0_i32 = arith.constant 0 : i32
    %c0_i32_0 = arith.constant 0 : i32
    %c0_i32_1 = arith.constant 0 : i32
    %c0_i32_2 = arith.constant 0 : i32
    %c0_i32_3 = arith.constant 0 : i32
    return %arg0, %c0_i32, %c0_i32_0, %c0_i32_1, %c0_i32_2 : i32, i32, i32, i32, i32
  }
  func.func @transform_1(%arg0: i32, %arg1: i32) -> (i32, i32, i32) {
    %c0_i32 = arith.constant 0 : i32
    %c0_i32_0 = arith.constant 0 : i32
    %c0_i32_1 = arith.constant 0 : i32
    %c0_i32_2 = arith.constant 0 : i32
    return %c0_i32, %c0_i32_0, %c0_i32_1 : i32, i32, i32
  }
  func.func @transform_2(%arg0: i32, %arg1: i32) -> (i32, i32, i32, i32) {
    %c0_i32 = arith.constant 0 : i32
    %c0_i32_0 = arith.constant 0 : i32
    %c0_i32_1 = arith.constant 0 : i32
    return %arg0, %arg1, %c0_i32, %c0_i32_0 : i32, i32, i32, i32
  }
  func.func @transform_3(%arg0: i32, %arg1: i32) -> (i32, i32, i32, i32) {
    %c0_i32 = arith.constant 0 : i32
    %c0_i32_0 = arith.constant 0 : i32
    %c0_i32_1 = arith.constant 0 : i32
    return %arg0, %arg1, %c0_i32, %c0_i32_0 : i32, i32, i32, i32
  }
  func.func @transform_4(%arg0: i32, %arg1: i32) -> (i32, i32, i32, i32) {
    %c0_i32 = arith.constant 0 : i32
    %c0_i32_0 = arith.constant 0 : i32
    %c0_i32_1 = arith.constant 0 : i32
    return %arg0, %arg1, %c0_i32, %c0_i32_0 : i32, i32, i32, i32
  }
}

module attributes {stable_mosaic.version = 11 : i64} {
  func.func @_head_kernel(%arg0: memref<2x16xf32, #tpu.memory_space<vmem>>, %arg1: memref<16x32xf32, #tpu.memory_space<vmem>>, %arg2: memref<1x32xf32, #tpu.memory_space<vmem>>, %arg3: memref<32x1xf32, #tpu.memory_space<vmem>>, %arg4: memref<1x1xf32, #tpu.memory_space<vmem>>, %arg5: memref<2x1xf32, #tpu.memory_space<vmem>>) attributes {dimension_semantics = [], scalar_prefetch = 0 : i64, scratch_operands = 0 : i64, tpu.core_type = #tpu.core_type<tc>} {
    %c0 = arith.constant 0 : index
    %c0_0 = arith.constant 0 : index
    %0 = vector.load %arg0[%c0, %c0_0] : memref<2x16xf32, #tpu.memory_space<vmem>>, vector<2x16xf32>
    %c0_1 = arith.constant 0 : index
    %c0_2 = arith.constant 0 : index
    %1 = vector.load %arg1[%c0_1, %c0_2] : memref<16x32xf32, #tpu.memory_space<vmem>>, vector<16x32xf32>
    %cst = arith.constant dense<0.000000e+00> : vector<2x32xf32>
    %2 = tpu.matmul %0, %1, %cst {dimension_numbers = #tpu.dot_dimension_numbers<[1], [0], [0], [1], [0, 0, 1, 1], [], []>} : vector<2x16xf32>, vector<16x32xf32>, vector<2x32xf32> -> vector<2x32xf32>
    %c0_3 = arith.constant 0 : index
    %c0_4 = arith.constant 0 : index
    %3 = vector.load %arg2[%c0_3, %c0_4] : memref<1x32xf32, #tpu.memory_space<vmem>>, vector<1x32xf32>
    %4 = vector.broadcast %3 : vector<1x32xf32> to vector<2x32xf32>
    %5 = arith.addf %2, %4 : vector<2x32xf32>
    %cst_5 = arith.constant 0.000000e+00 : f32
    %6 = vector.broadcast %cst_5 : f32 to vector<2x32xf32>
    %7 = arith.cmpf oge, %5, %6 : vector<2x32xf32>
    %cst_6 = arith.constant 2.000000e-01 : f32
    %8 = vector.broadcast %cst_6 : f32 to vector<2x32xf32>
    %9 = arith.mulf %8, %5 : vector<2x32xf32>
    %10 = arith.select %7, %5, %9 : vector<2x32xi1>, vector<2x32xf32>
    %c0_7 = arith.constant 0 : index
    %c0_8 = arith.constant 0 : index
    %11 = vector.load %arg3[%c0_7, %c0_8] : memref<32x1xf32, #tpu.memory_space<vmem>>, vector<32x1xf32>
    %cst_9 = arith.constant dense<0.000000e+00> : vector<2x1xf32>
    %12 = tpu.matmul %10, %11, %cst_9 {dimension_numbers = #tpu.dot_dimension_numbers<[1], [0], [0], [1], [0, 0, 1, 1], [], []>} : vector<2x32xf32>, vector<32x1xf32>, vector<2x1xf32> -> vector<2x1xf32>
    %c0_10 = arith.constant 0 : index
    %c0_11 = arith.constant 0 : index
    %13 = vector.load %arg4[%c0_10, %c0_11] : memref<1x1xf32, #tpu.memory_space<vmem>>, vector<1x1xf32>
    %14 = vector.broadcast %13 : vector<1x1xf32> to vector<2x1xf32>
    %15 = arith.addf %12, %14 : vector<2x1xf32>
    %16 = arith.negf %15 : vector<2x1xf32>
    %17 = math.exp %16 : vector<2x1xf32>
    %cst_12 = arith.constant 1.000000e+00 : f32
    %18 = vector.broadcast %cst_12 : f32 to vector<2x1xf32>
    %19 = arith.addf %18, %17 : vector<2x1xf32>
    %20 = arith.divf %18, %19 : vector<2x1xf32>
    %c0_13 = arith.constant 0 : index
    %c0_14 = arith.constant 0 : index
    %21 = vector.load %arg5[%c0_13, %c0_14] : memref<2x1xf32, #tpu.memory_space<vmem>>, vector<2x1xf32>
    tpu.vector_store %arg5[%c0_13, %c0_14], %20 {strides = array<i32>} : memref<2x1xf32, #tpu.memory_space<vmem>>, vector<2x1xf32>,
    return
  }
}

</mosaic_0001>

<bundles_post_ra>
// kernel: discriminator_forward.8
= control target key start
LH: loop header
LB: loop body
LE: loop exit
PB: predicated region body
PF: predicated region fallthrough
CT: control target
= control target key end

     0   :  { %10 = vsyncpa [#allocation3], 0  ;;  %s1572_s0 = inlined_call_operand.vmem [shape: f32[2,16,16,16], index: 0, kind: input, shape index: {}]   ;;  %s1573_s1 = inlined_call_operand.vmem [shape: f32[1,16], index: 1, kind: input, shape index: {}]   ;;  %s1574_s2 = inlined_call_operand.vmem [shape: f32[1,16], index: 2, kind: input, shape index: {}]   ;;  %s1575_s3 = inlined_call_operand.vmem [shape: f32[2,16,16,16], index: 3, kind: output, shape index: {0}]   ;;  %s1576_s4 = inlined_call_operand.hbm [shape: f32[2,1,8,16], index: 4, kind: output, shape index: {1}]  }
   0x1   :  { %12 = vsyncpa [#allocation3 + $0x1], 0  ;;  %s891_s15 = smov 0   ;;  %s893_s16 = smov 0  }
   0x2   :  { %s895_s17 = smov 0   ;;  %s897_s18 = smov 0  }
   0x3   :  { %s899_s19 = smov 0   ;;  %s901_s20 = smov 0  }
   0x4 LB: > { %s712_s21 = sadd.s32 4294967295, %s863_s20   ;;  %s713_s22 = sadd.s32 4294967294, %s863_s20   ;;  %s863_s20 = sphi %s901_s20, %s18_s20   ;;  %s859_s19 = sphi %s899_s19, %s1598_s19   ;;  %s855_s18 = sphi %s897_s18, %s1597_s18   ;;  %s851_s17 = sphi %s895_s17, %s1596_s17   ;;  %s847_s16 = sphi %s893_s16, %s1595_s16   ;;  %s843_s15 = sphi %s891_s15, %s1594_s15  }
   0x5   : > { %s30_s23 = sadd.s32 1, %s859_s19  ;;  %s137_s24 = sadd.s32 1, %s851_s17 }
   0x6   : > { %p32_p0 = scmp.ge.s32.totalorder %s30_s23, 2  ;;  %p147_p1 = scmp.ne.s32.totalorder %s851_s17, %s847_s16 }
   0x7   : > { %p148_p2 = scmp.eq.s32.totalorder %s712_s21, 1  ;;  %p153_p3 = scmp.ne.s32.totalorder %s847_s16, %s843_s15 }
   0x8   : > { %s1600_s23 = smov (%p32_p0, %s30_s23), 0  ;;  %p154_p5 = scmp.eq.s32.totalorder %s713_s22, 1 }
   0x9   : > { %p931_p4 = por %p148_p2, %p147_p1  ;;  %s132_s26 = ssub.s32 %s859_s19, %s1600_s23 }
   0xa   : > { %p716_p6 = scmp.ge.s32.totalorder %s863_s20, 1  ;;  %p135_p7 = scmp.eq.s32.totalorder %s132_s26, 0 }
   0xb   : > { %p938_p8 = por %p154_p5, %p153_p3  ;;  %p192_p9 = scmp.lt.s32.totalorder %s863_s20, 3 }
   0xc   : > { %s944_s28 = scalar_select %p135_p7, %s851_s17, %s137_s24  }
   0xd   : > { %p193_p10 = pnand %p716_p6, %p192_p9 }
   0xe   : > { %p234_p11 = scmp.lt.s32.totalorder (!%p193_p10), %s855_s18, 1  ;;  %v962_v1 = vld [vmem:[%s1573_s1] ss:$0 sm:$0xff] (!%p193_p10)  ;;  %vm461_vm0 = vcmask (!%p193_p10), 130048   ;;  %s230_s21 = sand.u32 (!%p193_p10), 1, %s847_s16  }
   0xf   : > { %196 = sbr.rel (%p193_p10) target bundleno = 157 (0x9d), region = 32  ;;  %v971_v6 = vld [vmem:[%s1574_s2] ss:$0 sm:$0xff] (!%p193_p10)  ;;  %s717_s22 = sshll.u32 (!%p193_p10), %s230_s21, 3 }
  0x10   : > { %s232_s24 = scalar_lea.vmem (!%p193_p10), [#allocation2], %s717_s22 }
  0x11   : > { %s593_s26 = sshll.u32 (!%p193_p10), %s232_s24, 4  ;;  %s1521_s26 = int_to_ptr.vmem [resolvable:$true] %s593_s26 }
  0x12   : > { %s785_s8 = scalar_lea.vmem (!%p193_p10), %s1521_s26, 128 }
  0x13   : > { %p786_p12 = scmp.ne.s32.totalorder (!%p193_p10), %s1521_s26, %s785_s8 }
  0x15   : > { %p787_p13 = pnand (!%p193_p10), %p786_p12, %p931_p4 }
  0x16   : > { %s948_s29 = scalar_select %p234_p11, %s855_s18, 1 }
  0x17   : > { %p788_p0 = pneg %p787_p13 }
  0x18   : > { %s728_s30 = sshll.u32 %s948_s29, 8  ;;  %s725_s29 = sshll.u32 %s855_s18, 7 }
  0x19   : > { %s956_s7 = scalar_lea.vmem %s1572_s0, %s728_s30  ;;  %s1145_s14 = scalar_lea.vmem %s1575_s3, %s728_s30 }
  0x1a   : > { %v255_v0 = vld [vmem:[%s956_s7] sm:$0xff]  ;;  %v256_v2 = vld [vmem:[%s956_s7 + $0x8] sm:$0xff]  ;;  %v257_v3 = vld [vmem:[%s956_s7 + $0x10] sm:$0xff]  ;;  %s1526_s6 = scalar_lea.hbm %s1576_s4, %s725_s29  ;;  %s865_s18 = smov [#allocation2]  }
  0x1b   : > { %v258_v4 = vld [vmem:[%s956_s7 + $0x18] sm:$0xff]  ;;  %v259_v5 = vld [vmem:[%s956_s7 + $0x20] sm:$0xff]  ;;  %v260_v7 = vld [vmem:[%s956_s7 + $0x28] sm:$0xff]  ;;  %v294_v10 = vmul.f32 %v962_v1, %v255_v0  ;;  %v295_v14 = vmul.f32 %v962_v1, %v256_v2  ;;  %v296_v18 = vmul.f32 %v962_v1, %v257_v3  ;;  %s789_s9 = sshll.u32 %s865_s18, 4  ;;  %s790_s9 = int_to_ptr.vmem [resolvable:$false] %s789_s9 }
  0x1c   : > { %v261_v8 = vld [vmem:[%s956_s7 + $0x30] sm:$0xff]  ;;  %v262_v9 = vld [vmem:[%s956_s7 + $0x38] sm:$0xff]  ;;  %v263_v11 = vld [vmem:[%s956_s7 + $0x40] sm:$0xff]  ;;  %v297_v19 = vmul.f32 %v962_v1, %v258_v4  ;;  %v298_v23 = vmul.f32 %v962_v1, %v259_v5  ;;  %v299_v24 = vmul.f32 %v962_v1, %v260_v7  ;;  %s791_s10 = scalar_lea.vmem %s790_s9, 256  ;;  %p792_p1 = scmp.lt.s32.totalorder %s1521_s26, %s790_s9 }
  0x1d   : > { %v264_v12 = vld [vmem:[%s956_s7 + $0x48] sm:$0xff]  ;;  %v265_v13 = vld [vmem:[%s956_s7 + $0x50] sm:$0xff]  ;;  %v266_v15 = vld [vmem:[%s956_s7 + $0x58] sm:$0xff]  ;;  %v300_v25 = vmul.f32 %v962_v1, %v261_v8  ;;  %v301_v26 = vmul.f32 %v962_v1, %v262_v9  ;;  %v302_v30 = vmul.f32 %v962_v1, %v263_v11  ;;  %v1000_v33 = vadd.f32 %v971_v6, %v294_v10  ;;  %p793_p2 = scmp.lt.s32.totalorder %s791_s10, %s785_s8 }
  0x1e   : > { %v267_v16 = vld [vmem:[%s956_s7 + $0x60] sm:$0xff]  ;;  %v268_v17 = vld [vmem:[%s956_s7 + $0x68] sm:$0xff]  ;;  %v269_v20 = vld [vmem:[%s956_s7 + $0x70] sm:$0xff]  ;;  %v303_v31 = vmul.f32 %v962_v1, %v264_v12  ;;  %v304_v32 = vmul.f32 %v962_v1, %v265_v13  ;;  %v305_v37 = vmul.f32 %v962_v1, %v266_v15  ;;  %v1009_v40 = vadd.f32 %v971_v6, %v295_v14 }
  0x1f   : > { %v270_v21 = vld [vmem:[%s956_s7 + $0x78] sm:$0xff]  ;;  %v271_v22 = vld [vmem:[%s956_s7 + $0x80] sm:$0xff]  ;;  %v272_v27 = vld [vmem:[%s956_s7 + $0x88] sm:$0xff]  ;;  %v306_v38 = vmul.f32 %v962_v1, %v267_v16  ;;  %v307_v39 = vmul.f32 %v962_v1, %v268_v17  ;;  %v308_v44 = vmul.f32 %v962_v1, %v269_v20  ;;  %v1018_v47 = vadd.f32 %v971_v6, %v296_v18  ;;  %p794_p3 = por %p793_p2, %p792_p1 }
  0x20   : > { %v273_v28 = vld [vmem:[%s956_s7 + $0x90] sm:$0xff]  ;;  %v274_v29 = vld [vmem:[%s956_s7 + $0x98] sm:$0xff]  ;;  %v275_v34 = vld [vmem:[%s956_s7 + $0xa0] sm:$0xff]  ;;  %v309_v45 = vmul.f32 %v962_v1, %v270_v21  ;;  %v310_v46 = vmul.f32 %v962_v1, %v271_v22  ;;  %v311_v51 = vmul.f32 %v962_v1, %v272_v27  ;;  %v1027_v54 = vadd.f32 %v971_v6, %v297_v19 }
  0x21   : > { %v276_v35 = vld [vmem:[%s956_s7 + $0xa8] sm:$0xff]  ;;  %v277_v36 = vld [vmem:[%s956_s7 + $0xb0] sm:$0xff]  ;;  %v278_v41 = vld [vmem:[%s956_s7 + $0xb8] sm:$0xff]  ;;  %v312_v52 = vmul.f32 %v962_v1, %v273_v28  ;;  %v313_v53 = vmul.f32 %v962_v1, %v274_v29  ;;  %v314_v58 = vmul.f32 %v962_v1, %v275_v34  ;;  %v1036_v61 = vadd.f32 %v971_v6, %v298_v23  ;;  %p795_p5 = pnand %p794_p3, %p788_p0 }
  0x22   : > { %v279_v42 = vld [vmem:[%s956_s7 + $0xc0] sm:$0xff]  ;;  %v280_v43 = vld [vmem:[%s956_s7 + $0xc8] sm:$0xff]  ;;  %v281_v48 = vld [vmem:[%s956_s7 + $0xd0] sm:$0xff]  ;;  %v315_v59 = vmul.f32 %v962_v1, %v276_v35  ;;  %v316_v60 = vmul.f32 %v962_v1, %v277_v36  ;;  %v317_v62 = vmul.f32 %v962_v1, %v278_v41  ;;  %v1042_v2 = vadd.f32 %v971_v6, %v299_v24 }
  0x23   : > { %v282_v49 = vld [vmem:[%s956_s7 + $0xd8] sm:$0xff]  ;;  %v283_v50 = vld [vmem:[%s956_s7 + $0xe0] sm:$0xff]  ;;  %v284_v55 = vld [vmem:[%s956_s7 + $0xe8] sm:$0xff]  ;;  %v318_v63 = vmul.f32 %v962_v1, %v279_v42  ;;  %v319_v0 = vmul.f32 %v962_v1, %v280_v43  ;;  %v320_v3 = vmul.f32 %v962_v1, %v281_v48  ;;  %v1048_v7 = vadd.f32 %v971_v6, %v300_v25 }
  0x24   : > { %v285_v56 = vld [vmem:[%s956_s7 + $0xf0] sm:$0xff]  ;;  %v286_v57 = vld [vmem:[%s956_s7 + $0xf8] sm:$0xff]  ;;  %v321_v4 = vmul.f32 %v962_v1, %v282_v49  ;;  %v322_v5 = vmul.f32 %v962_v1, %v283_v50  ;;  %v323_v8 = vmul.f32 %v962_v1, %v284_v55  ;;  %v1054_v11 = vadd.f32 %v971_v6, %v301_v26  ;;  %s575_s7 = scalar_lea.sflag [#allocation3], %s230_s21 }
  0x25   : > { %v324_v9 = vmul.f32 %v962_v1, %v285_v56  ;;  %v325_v10 = vmul.f32 %v962_v1, %v286_v57  ;;  %v1057_v12 = vadd.f32 %v971_v6, %v302_v30  ;;  %v1060_v13 = vadd.f32 %v971_v6, %v303_v31 }
  0x26   : > { %v1063_v14 = vadd.f32 %v971_v6, %v304_v32  ;;  %v1066_v15 = vadd.f32 %v971_v6, %v305_v37  ;;  %v1069_v16 = vadd.f32 %v971_v6, %v306_v38  ;;  %v1072_v1 = vadd.f32 %v971_v6, %v307_v39 }
  0x27   : > { %v1075_v17 = vadd.f32 %v971_v6, %v308_v44  ;;  %v1078_v18 = vadd.f32 %v971_v6, %v309_v45  ;;  %v1081_v19 = vadd.f32 %v971_v6, %v310_v46  ;;  %v1084_v20 = vadd.f32 %v971_v6, %v311_v51 }
  0x28   : > { %v1087_v21 = vadd.f32 %v971_v6, %v312_v52  ;;  %v1090_v22 = vadd.f32 %v971_v6, %v313_v53  ;;  %v1093_v23 = vadd.f32 %v971_v6, %v314_v58  ;;  %v1096_v24 = vadd.f32 %v971_v6, %v315_v59 }
  0x29   : > { %v1099_v25 = vadd.f32 %v971_v6, %v316_v60  ;;  %v1102_v26 = vadd.f32 %v971_v6, %v317_v62  ;;  %v1105_v27 = vadd.f32 %v971_v6, %v318_v63  ;;  %v1108_v28 = vadd.f32 %v971_v6, %v319_v0 }
  0x2a   : > { %v1111_v29 = vadd.f32 %v971_v6, %v320_v3  ;;  %v1114_v30 = vadd.f32 %v971_v6, %v321_v4  ;;  %v1117_v31 = vadd.f32 %v971_v6, %v322_v5  ;;  %v1120_v32 = vadd.f32 %v971_v6, %v323_v8 }
  0x2b   : > { %v1123_v34 = vadd.f32 %v971_v6, %v324_v9  ;;  %vm365_vm1 = vcmp.ge.f32.partialorder %v1000_v33, 0.0  ;;  %vm366_vm2 = vcmp.ge.f32.partialorder %v1009_v40, 0.0  ;;  %vm367_vm3 = vcmp.ge.f32.partialorder %v1018_v47, 0.0 }
  0x2c   : > { %vm368_vm4 = vcmp.ge.f32.partialorder %v1027_v54, 0.0  ;;  %vm369_vm5 = vcmp.ge.f32.partialorder %v1036_v61, 0.0  ;;  %vm370_vm6 = vcmp.ge.f32.partialorder %v1042_v2, 0.0  ;;  %vm371_vm7 = vcmp.ge.f32.partialorder %v1048_v7, 0.0 }
  0x2d   : > { %vm372_vm8 = vcmp.ge.f32.partialorder %v1054_v11, 0.0  ;;  %v397_v35 = vmul.f32 0.2, %v1000_v33  ;;  %v398_v36 = vmul.f32 0.2, %v1009_v40  ;;  %v1148_v37 = vadd.f32 %v971_v6, %v325_v10 }
  0x2e   : > { %vm379_vm15 = vcmp.ge.f32.partialorder %v1075_v17, 0.0  ;;  %vm380_vm12 = vcmp.ge.f32.partialorder %v1078_v18, 0.0  ;;  %v399_v38 = vmul.f32 0.2, %v1018_v47  ;;  %v400_v39 = vmul.f32 0.2, %v1027_v54 }
  0x2f   : > { %v401_v41 = vmul.f32 0.2, %v1036_v61  ;;  %vm383_vm10 = vcmp.ge.f32.partialorder %v1087_v21, 0.0  ;;  %v402_v6 = vmul.f32 0.2, %v1042_v2  ;;  %v1167_v44 = vsel %vm365_vm1, %v1000_v33, %v397_v35 }
  0x30   : > { %v403_v42 = vmul.f32 0.2, %v1048_v7  ;;  %v404_v43 = vmul.f32 0.2, %v1054_v11  ;;  %vm386_vm11 = vcmp.ge.f32.partialorder %v1096_v24, 0.0  ;;  %v1179_v33 = vsel %vm366_vm2, %v1009_v40, %v398_v36  ;;  %462 = vst.msk [vmem:[%s1145_s14] sm:$0xff] %vm461_vm0, %v1167_v44 }
  0x31   : > { %v405_v45 = vmul.f32 0.2, %v1057_v12  ;;  %v406_v46 = vmul.f32 0.2, %v1060_v13  ;;  %v407_v48 = vmul.f32 0.2, %v1063_v14  ;;  %v1194_v51 = vsel %vm367_vm3, %v1018_v47, %v399_v38 }
  0x32   : > { %vm390_vm1 = vcmp.ge.f32.partialorder %v1108_v28, 0.0  ;;  %vm391_vm9 = vcmp.ge.f32.partialorder %v1111_v29, 0.0  ;;  %v408_v49 = vmul.f32 0.2, %v1066_v15  ;;  %v409_v50 = vmul.f32 0.2, %v1069_v16 }
  0x33   : > { %v410_v40 = vmul.f32 0.2, %v1072_v1  ;;  %463 = vst.msk [vmem:[%s1145_s14 + $0x8] sm:$0xff] %vm461_vm0, %v1179_v33  ;;  %vm394_vm2 = vcmp.ge.f32.partialorder %v1120_v32, 0.0  ;;  %vm395_vm14 = vcmp.ge.f32.partialorder %v1123_v34, 0.0  ;;  %vm396_vm13 = vcmp.ge.f32.partialorder %v1148_v37, 0.0 }
  0x34   : > { %v411_v52 = vmul.f32 0.2, %v1075_v17  ;;  %v412_v53 = vmul.f32 0.2, %v1078_v18  ;;  %v413_v55 = vmul.f32 0.2, %v1081_v19  ;;  %v1208_v47 = vsel %vm368_vm4, %v1027_v54, %v400_v39 }
  0x35   : > { %464 = vst.msk [vmem:[%s1145_s14 + $0x10] sm:$0xff] %vm461_vm0, %v1194_v51  ;;  %v414_v56 = vmul.f32 0.2, %v1084_v20  ;;  %v415_v57 = vmul.f32 0.2, %v1087_v21  ;;  %v1219_v59 = vsel %vm369_vm5, %v1036_v61, %v401_v41  ;;  %465 = vst.msk [vmem:[%s1145_s14 + $0x18] sm:$0xff] %vm461_vm0, %v1208_v47  ;;  %v1230_v63 = vsel %vm370_vm6, %v1042_v2, %v402_v6 }
  0x36   : > { %v416_v58 = vmul.f32 0.2, %v1090_v22  ;;  %v417_v54 = vmul.f32 0.2, %v1093_v23  ;;  %v418_v60 = vmul.f32 0.2, %v1096_v24  ;;  %v1241_v4 = vsel %vm371_vm7, %v1048_v7, %v403_v42 }
  0x37   : > { %v419_v62 = vmul.f32 0.2, %v1099_v25  ;;  %466 = vst.msk [vmem:[%s1145_s14 + $0x20] sm:$0xff] %vm461_vm0, %v1219_v59  ;;  %v420_v61 = vmul.f32 0.2, %v1102_v26  ;;  %467 = vst.msk [vmem:[%s1145_s14 + $0x28] sm:$0xff] %vm461_vm0, %v1230_v63  ;;  %v1252_v9 = vsel %vm372_vm8, %v1054_v11, %v404_v43 }
  0x38   : > { %v421_v0 = vmul.f32 0.2, %v1105_v27  ;;  %v422_v3 = vmul.f32 0.2, %v1108_v28  ;;  %v423_v2 = vmul.f32 0.2, %v1111_v29 }
  0x39   : > { %v424_v5 = vmul.f32 0.2, %v1114_v30  ;;  %v425_v8 = vmul.f32 0.2, %v1117_v31  ;;  %468 = vst.msk [vmem:[%s1145_s14 + $0x30] sm:$0xff] %vm461_vm0, %v1241_v4  ;;  %vm1579_vm3 = vcmp.ge.f32.partialorder %v1057_v12, 0.0 }
  0x3a   : > { %v426_v7 = vmul.f32 0.2, %v1120_v32  ;;  %v427_v10 = vmul.f32 0.2, %v1123_v34  ;;  %v428_v35 = vmul.f32 0.2, %v1148_v37  ;;  %v1263_v36 = vsel %vm1579_vm3, %v1057_v12, %v405_v45 }
  0x3b   : > { %469 = vst.msk [vmem:[%s1145_s14 + $0x38] sm:$0xff] %vm461_vm0, %v1252_v9  ;;  %vm1580_vm4 = vcmp.ge.f32.partialorder %v1060_v13, 0.0  ;;  %vm1581_vm5 = vcmp.ge.f32.partialorder %v1063_v14, 0.0  ;;  %vm1582_vm6 = vcmp.ge.f32.partialorder %v1066_v15, 0.0  ;;  %vm1583_vm7 = vcmp.ge.f32.partialorder %v1069_v16, 0.0  ;;  %470 = vst.msk [vmem:[%s1145_s14 + $0x40] sm:$0xff] %vm461_vm0, %v1263_v36 }
  0x3c   : > { %v1271_v11 = vsel %vm1580_vm4, %v1060_v13, %v406_v46  ;;  %v1276_v38 = vsel %vm1581_vm5, %v1063_v14, %v407_v48  ;;  %v1281_v39 = vsel %vm1582_vm6, %v1066_v15, %v408_v49  ;;  %v1286_v12 = vsel %vm1583_vm7, %v1069_v16, %v409_v50 }
  0x3d   : > { %vm1584_vm8 = vcmp.ge.f32.partialorder %v1072_v1, 0.0  ;;  %v1299_v14 = vsel %vm379_vm15, %v1075_v17, %v411_v52  ;;  %v1304_v15 = vsel %vm380_vm12, %v1078_v18, %v412_v53  ;;  %vm1585_vm3 = vcmp.ge.f32.partialorder %v1081_v19, 0.0  ;;  %471 = vst.msk [vmem:[%s1145_s14 + $0x48] sm:$0xff] %vm461_vm0, %v1271_v11  ;;  %472 = vst.msk [vmem:[%s1145_s14 + $0x50] sm:$0xff] %vm461_vm0, %v1276_v38 }
  0x3e   : > { %v1294_v13 = vsel %vm1584_vm8, %v1072_v1, %v410_v40  ;;  %v1309_v16 = vsel %vm1585_vm3, %v1081_v19, %v413_v55  ;;  %473 = vst.msk [vmem:[%s1145_s14 + $0x58] sm:$0xff] %vm461_vm0, %v1281_v39  ;;  %474 = vst.msk [vmem:[%s1145_s14 + $0x60] sm:$0xff] %vm461_vm0, %v1286_v12  ;;  %vm1586_vm12 = vcmp.ge.f32.partialorder %v1084_v20, 0.0  ;;  %v1331_v17 = vsel %vm383_vm10, %v1087_v21, %v415_v57 }
  0x3f   : > { %v1326_v1 = vsel %vm1586_vm12, %v1084_v20, %v414_v56  ;;  %vm1587_vm15 = vcmp.ge.f32.partialorder %v1090_v22, 0.0  ;;  %vm1588_vm4 = vcmp.ge.f32.partialorder %v1093_v23, 0.0  ;;  %475 = vst.msk [vmem:[%s1145_s14 + $0x68] sm:$0xff] %vm461_vm0, %v1294_v13  ;;  %476 = vst.msk [vmem:[%s1145_s14 + $0x70] sm:$0xff] %vm461_vm0, %v1299_v14  ;;  %v1358_v20 = vsel %vm386_vm11, %v1096_v24, %v418_v60 }
  0x40   : > { %v1336_v18 = vsel %vm1587_vm15, %v1090_v22, %v416_v58  ;;  %v1341_v19 = vsel %vm1588_vm4, %v1093_v23, %v417_v54  ;;  %477 = vst.msk [vmem:[%s1145_s14 + $0x78] sm:$0xff] %vm461_vm0, %v1304_v15  ;;  %478 = vst.msk [vmem:[%s1145_s14 + $0x80] sm:$0xff] %vm461_vm0, %v1309_v16  ;;  %vm1589_vm10 = vcmp.ge.f32.partialorder %v1099_v25, 0.0  ;;  %vm1590_vm5 = vcmp.ge.f32.partialorder %v1102_v26, 0.0 }
  0x41   : > { %v1363_v21 = vsel %vm1589_vm10, %v1099_v25, %v419_v62  ;;  %v1368_v22 = vsel %vm1590_vm5, %v1102_v26, %v420_v61  ;;  %vm1591_vm6 = vcmp.ge.f32.partialorder %v1105_v27, 0.0  ;;  %479 = vst.msk [vmem:[%s1145_s14 + $0x88] sm:$0xff] %vm461_vm0, %v1326_v1  ;;  %480 = vst.msk [vmem:[%s1145_s14 + $0x90] sm:$0xff] %vm461_vm0, %v1331_v17  ;;  %v1390_v24 = vsel %vm390_vm1, %v1108_v28, %v422_v3 }
  0x42   : > { %v1373_v23 = vsel %vm1591_vm6, %v1105_v27, %v421_v0  ;;  %481 = vst.msk [vmem:[%s1145_s14 + $0x98] sm:$0xff] %vm461_vm0, %v1336_v18  ;;  %482 = vst.msk [vmem:[%s1145_s14 + $0xa0] sm:$0xff] %vm461_vm0, %v1341_v19  ;;  %v1395_v25 = vsel %vm391_vm9, %v1111_v29, %v423_v2  ;;  %vm1592_vm11 = vcmp.ge.f32.partialorder %v1114_v30, 0.0  ;;  %vm1593_vm7 = vcmp.ge.f32.partialorder %v1117_v31, 0.0 }
  0x43   : > { %v1400_v26 = vsel %vm1592_vm11, %v1114_v30, %v424_v5  ;;  %v1405_v27 = vsel %vm1593_vm7, %v1117_v31, %v425_v8  ;;  %483 = vst.msk [vmem:[%s1145_s14 + $0xa8] sm:$0xff] %vm461_vm0, %v1358_v20  ;;  %484 = vst.msk [vmem:[%s1145_s14 + $0xb0] sm:$0xff] %vm461_vm0, %v1363_v21  ;;  %v1422_v28 = vsel %vm394_vm2, %v1120_v32, %v426_v7  ;;  %v494_v31 = vsel %vm461_vm0, %v1167_v44, 0.0 }
  0x44   : > { %485 = vst.msk [vmem:[%s1145_s14 + $0xb8] sm:$0xff] %vm461_vm0, %v1368_v22  ;;  %486 = vst.msk [vmem:[%s1145_s14 + $0xc0] sm:$0xff] %vm461_vm0, %v1373_v23  ;;  %v1427_v29 = vsel %vm395_vm14, %v1123_v34, %v427_v10  ;;  %v1432_v30 = vsel %vm396_vm13, %v1148_v37, %v428_v35  ;;  %v495_v32 = vsel %vm461_vm0, %v1179_v33, 0.0  ;;  %v497_v34 = vsel %vm461_vm0, %v1194_v51, 0.0 }
  0x45   : > { %487 = vst.msk [vmem:[%s1145_s14 + $0xc8] sm:$0xff] %vm461_vm0, %v1390_v24  ;;  %488 = vst.msk [vmem:[%s1145_s14 + $0xd0] sm:$0xff] %vm461_vm0, %v1395_v25  ;;  %v496_v37 = vadd.f32 %v495_v32, %v494_v31  ;;  %v499_v41 = vsel %vm461_vm0, %v1208_v47, 0.0  ;;  %v501_v42 = vsel %vm461_vm0, %v1219_v59, 0.0  ;;  %v503_v44 = vsel %vm461_vm0, %v1230_v63, 0.0 }
  0x46   : > { %489 = vst.msk [vmem:[%s1145_s14 + $0xd8] sm:$0xff] %vm461_vm0, %v1400_v26  ;;  %490 = vst.msk [vmem:[%s1145_s14 + $0xe0] sm:$0xff] %vm461_vm0, %v1405_v27  ;;  %v505_v46 = vsel %vm461_vm0, %v1241_v4, 0.0  ;;  %v507_v33 = vsel %vm461_vm0, %v1252_v9, 0.0  ;;  %v509_v50 = vsel %vm461_vm0, %v1263_v36, 0.0  ;;  %v511_v51 = vsel %vm461_vm0, %v1271_v11, 0.0 }
  0x47   : > { %491 = vst.msk [vmem:[%s1145_s14 + $0xe8] sm:$0xff] %vm461_vm0, %v1422_v28  ;;  %492 = vst.msk [vmem:[%s1145_s14 + $0xf0] sm:$0xff] %vm461_vm0, %v1427_v29  ;;  %v498_v6 = vadd.f32 %v497_v34, %v496_v37  ;;  %v513_v53 = vsel %vm461_vm0, %v1276_v38, 0.0  ;;  %v515_v47 = vsel %vm461_vm0, %v1281_v39, 0.0  ;;  %v517_v57 = vsel %vm461_vm0, %v1286_v12, 0.0 }
  0x48   : > { %493 = vst.msk [vmem:[%s1145_s14 + $0xf8] sm:$0xff] %vm461_vm0, %v1432_v30  ;;  %v519_v59 = vsel %vm461_vm0, %v1294_v13, 0.0  ;;  %v521_v60 = vsel %vm461_vm0, %v1299_v14, 0.0  ;;  %v523_v63 = vsel %vm461_vm0, %v1304_v15, 0.0  ;;  %v525_v0 = vsel %vm461_vm0, %v1309_v16, 0.0 }
  0x49   : > { %v500_v43 = vadd.f32 %v499_v41, %v498_v6  ;;  %v527_v4 = vsel %vm461_vm0, %v1326_v1, 0.0  ;;  %v529_v5 = vsel %vm461_vm0, %v1331_v17, 0.0  ;;  %v531_v9 = vsel %vm461_vm0, %v1336_v18, 0.0 }
  0x4a   : > { %v533_v10 = vsel %vm461_vm0, %v1341_v19, 0.0  ;;  %v535_v36 = vsel %vm461_vm0, %v1358_v20, 0.0  ;;  %v537_v38 = vsel %vm461_vm0, %v1363_v21, 0.0  ;;  %v539_v12 = vsel %vm461_vm0, %v1368_v22, 0.0 }
  0x4b   : > { %v502_v45 = vadd.f32 %v501_v42, %v500_v43  ;;  %v541_v14 = vsel %vm461_vm0, %v1373_v23, 0.0  ;;  %v543_v16 = vsel %vm461_vm0, %v1390_v24, 0.0  ;;  %v545_v17 = vsel %vm461_vm0, %v1395_v25, 0.0 }
  0x4c   : > { %v547_v19 = vsel %vm461_vm0, %v1400_v26, 0.0  ;;  %v549_v21 = vsel %vm461_vm0, %v1405_v27, 0.0  ;;  %v551_v23 = vsel %vm461_vm0, %v1422_v28, 0.0  ;;  %v553_v24 = vsel %vm461_vm0, %v1427_v29, 0.0 }
  0x4d   : > { %v504_v48 = vadd.f32 %v503_v44, %v502_v45  ;;  %v555_v25 = vsel %vm461_vm0, %v1432_v30, 0.0 }
  0x4f   : > { %v506_v49 = vadd.f32 %v505_v46, %v504_v48 }
  0x51   : > { %v508_v40 = vadd.f32 %v507_v33, %v506_v49 }
  0x53   : > { %v510_v52 = vadd.f32 %v509_v50, %v508_v40 }
  0x55   : > { %v512_v55 = vadd.f32 %v511_v51, %v510_v52 }
  0x57   : > { %v514_v56 = vadd.f32 %v513_v53, %v512_v55 }
  0x59   : > { %v516_v58 = vadd.f32 %v515_v47, %v514_v56 }
  0x5b   : > { %v518_v54 = vadd.f32 %v517_v57, %v516_v58 }
  0x5d   : > { %v520_v62 = vadd.f32 %v519_v59, %v518_v54 }
  0x5f   : > { %v522_v61 = vadd.f32 %v521_v60, %v520_v62 }
  0x61   : > { %v524_v3 = vadd.f32 %v523_v63, %v522_v61 }
  0x63   : > { %v526_v2 = vadd.f32 %v525_v0, %v524_v3 }
  0x65   : > { %v528_v8 = vadd.f32 %v527_v4, %v526_v2 }
  0x67   : > { %v530_v7 = vadd.f32 %v529_v5, %v528_v8 }
  0x69   : > { %v532_v35 = vadd.f32 %v531_v9, %v530_v7 }
  0x6b   : > { %v534_v11 = vadd.f32 %v533_v10, %v532_v35 }
  0x6d   : > { %v536_v39 = vadd.f32 %v535_v36, %v534_v11 }
  0x6f   : > { %v538_v13 = vadd.f32 %v537_v38, %v536_v39 }
  0x71   : > { %v540_v15 = vadd.f32 %v539_v12, %v538_v13 }
  0x73   : > { %v542_v1 = vadd.f32 %v541_v14, %v540_v15 }
  0x75   : > { %v544_v18 = vadd.f32 %v543_v16, %v542_v1 }
  0x77   : > { %v546_v20 = vadd.f32 %v545_v17, %v544_v18 }
  0x79   : > { %v548_v22 = vadd.f32 %v547_v19, %v546_v20 }
  0x7b   : > { %v550_v31 = vadd.f32 %v549_v21, %v548_v22 }
  0x7d   : > { %v552_v32 = vadd.f32 %v551_v23, %v550_v31 }
  0x7f   : > { %v554_v34 = vadd.f32 %v553_v24, %v552_v32 }
  0x81   : > { %v556_v26 = vadd.f32 %v555_v25, %v554_v34 }
  0x83   : > { %v557_v37 = vrot.slane %v556_v26, 4 }
  0x85   : > { %v558_v27 = vadd.f32 %v557_v37, %v556_v26 }
  0x87   : > { %v559_v41 = vrot.slane %v558_v27, 2 }
  0x89   : > { %v560_v6 = vadd.f32 %v559_v41, %v558_v27 }
  0x8b   : > { %v561_v28 = vrot.slane %v560_v6, 1 }
  0x8d   : > { %v562_v42 = vadd.f32 %v561_v28, %v560_v6 }
  0x8f   : > { %563 = vst.msk [vmem:[%s232_s24] sm:$0xff] %vm461_vm0, %v562_v42 }
  0x90   : > { %798 = shalt.err (!%p795_p5)
}
  0x91   : > { %s799_s11 = scalar_lea.hbm %s1526_s6, 128  ;;  %s803_s14 = scalar_lea.hbm %s1576_s4, 256 }
  0x92   : > { %p800_p6 = scmp.ne.s32.totalorder %s1526_s6, %s799_s11  ;;  %p804_p10 = scmp.lt.u32.totalorder %s1526_s6, %s1576_s4 }
  0x93   : > { %p805_p11 = scmp.lt.u32.totalorder %s803_s14, %s799_s11  ;;  %p807_p13 = scmp.lt.u32.totalorder %s799_s11, %s1526_s6 }
  0x94   : > { %p801_p7 = pnand %p800_p6, %p931_p4 }
  0x95   : > { %p806_p12 = por %p805_p11, %p804_p10 }
  0x96   : > { %p802_p9 = pneg %p801_p7 }
  0x97   : > { %p808_p0 = por %p807_p13, %p806_p12 }
  0x99   : > { %p809_p1 = pnand %p808_p0, %p802_p9 }
  0x9b   : > { %812 = shalt.err (!%p809_p1)
}
  0x9c   : > { %730 = dma.vmem_to_hbm [thread:$0]  (%p931_p4), %s1521_s26, 128, %s1526_s6, %s575_s7  }
  0x9d PF: > { %p736_p2 = scmp.ge.s32.totalorder %s863_s20, 2  ;;  %s618_s24 = sand.u32 1, %s843_s15  }
  0x9e   : > { %s619_s29 = scalar_lea.sflag [#allocation3], %s618_s24 }
  0x9f   : > { %p733_p3 = pnand %p736_p2, %p938_p8 }
  0xa1   : > { %838 = dma.done.wait (!%p733_p3), %s619_s29, 128  }
  0xa2   : > { %840 = vsyncadd (!%p733_p3), %s619_s29, 4294967168  ;;  %s18_s20 = sadd.s32 1, %s863_s20   ;;  %s1594_s15 = smov %s847_s16 }
  0xa3   : > { %p15_p5 = scmp.ge.s32.totalorder %s18_s20, 4   ;;  %s1595_s16 = smov %s851_s17 }
  0xa4   : > { %s1596_s17 = smov %s944_s28  ;;  %s1597_s18 = smov %s859_s19 }
  0xa5   : > { %s1598_s19 = smov %s1600_s23  ;;  %17 = sbr.rel (!%p15_p5) target bundleno = 4 (0x4), region = 79 }
  0xac   :  { %624 = vsyncpa [#allocation3], 1 }
  0xad   :  { %626 = vsyncpa [#allocation3 + $0x1], 1 }

// kernel: discriminator_forward.10
= control target key start
LH: loop header
LB: loop body
LE: loop exit
PB: predicated region body
PF: predicated region fallthrough
CT: control target
= control target key end

     0   :  { %10 = vsyncpa [#allocation3], 0  ;;  %s821_s0 = inlined_call_operand.vmem [shape: f32[2,8,8,16], index: 0, kind: input, shape index: {}]   ;;  %s822_s1 = inlined_call_operand.vmem [shape: f32[1,16], index: 1, kind: input, shape index: {}]   ;;  %s823_s2 = inlined_call_operand.vmem [shape: f32[1,16], index: 2, kind: input, shape index: {}]   ;;  %s824_s3 = inlined_call_operand.hbm [shape: f32[2,8,8,16], index: 3, kind: output, shape index: {0}]   ;;  %s825_s4 = inlined_call_operand.vmem [shape: f32[2,1,8,16], index: 4, kind: output, shape index: {1}]  }
   0x1   :  { %12 = vsyncpa [#allocation3 + $0x1], 0  ;;  %s658_s15 = smov 0   ;;  %s660_s16 = smov 0  }
   0x2   :  { %s662_s17 = smov 0   ;;  %s664_s18 = smov 0  }
   0x3   :  { %s666_s19 = smov 0   ;;  %s668_s20 = smov 0  }
   0x4 LB: > { %s475_s21 = sadd.s32 4294967295, %s628_s20   ;;  %s476_s22 = sadd.s32 4294967294, %s628_s20   ;;  %s628_s20 = sphi %s668_s20, %s18_s20   ;;  %s624_s19 = sphi %s666_s19, %s832_s19   ;;  %s620_s18 = sphi %s664_s18, %s831_s18   ;;  %s616_s17 = sphi %s662_s17, %s830_s17   ;;  %s612_s16 = sphi %s660_s16, %s829_s16   ;;  %s608_s15 = sphi %s658_s15, %s828_s15  }
   0x5   : > { %s30_s23 = sadd.s32 1, %s624_s19  ;;  %s109_s24 = sadd.s32 1, %s616_s17 }
   0x6   : > { %p32_p0 = scmp.ge.s32.totalorder %s30_s23, 2  ;;  %p119_p1 = scmp.ne.s32.totalorder %s616_s17, %s612_s16 }
   0x7   : > { %p120_p2 = scmp.eq.s32.totalorder %s475_s21, 1  ;;  %p125_p3 = scmp.ne.s32.totalorder %s612_s16, %s608_s15 }
   0x8   : > { %s834_s23 = smov (%p32_p0, %s30_s23), 0  ;;  %p126_p5 = scmp.eq.s32.totalorder %s476_s22, 1 }
   0x9   : > { %p698_p4 = por %p120_p2, %p119_p1  ;;  %s104_s26 = ssub.s32 %s624_s19, %s834_s23 }
   0xa   : > { %p479_p6 = scmp.ge.s32.totalorder %s628_s20, 1  ;;  %p107_p7 = scmp.eq.s32.totalorder %s104_s26, 0 }
   0xb   : > { %p705_p8 = por %p126_p5, %p125_p3  ;;  %p191_p9 = scmp.lt.s32.totalorder %s628_s20, 3 }
   0xc   : > { %s711_s28 = scalar_select %p107_p7, %s616_s17, %s109_s24  }
   0xd   : > { %p192_p10 = pnand %p479_p6, %p191_p9 }
   0xe   : > { %p229_p11 = scmp.lt.s32.totalorder (!%p192_p10), %s620_s18, 1  ;;  %s216_s30 = sand.u32 (!%p192_p10), 1, %s612_s16   ;;  %v484_v0 = vld [vmem:[%s822_s1] ss:$0 sm:$0xff] (!%p192_p10)  ;;  %vm308_vm0 = vcmask (!%p192_p10), 130048  }
   0xf   : > { %195 = sbr.rel (%p192_p10) target bundleno = 73 (0x49), region = 32  ;;  %v485_v1 = vld [vmem:[%s823_s2] ss:$0 sm:$0xff] (!%p192_p10)  ;;  %s730_s13 = sshll.u32 (!%p192_p10), %s216_s30, 6 }
  0x10   : > { %s733_s14 = scalar_lea.vmem (!%p192_p10), [#allocation2], %s730_s13  ;;  %s492_s22 = sshll.u32 (!%p192_p10), %s620_s18, 10 }
  0x11   : > { %s362_s21 = sshll.u32 (!%p192_p10), %s733_s14, 4  ;;  %s759_s26 = scalar_lea.hbm (!%p192_p10), %s824_s3, %s492_s22  ;;  %s752_s21 = int_to_ptr.vmem [resolvable:$true] %s362_s21 }
  0x12   : > { %s550_s6 = scalar_lea.vmem (!%p192_p10), %s752_s21, 1024  ;;  %s630_s7 = smov (!%p192_p10), [#allocation2]  }
  0x13   : > { %p551_p12 = scmp.ne.s32.totalorder (!%p192_p10), %s752_s21, %s550_s6  ;;  %s554_s8 = sshll.u32 (!%p192_p10), %s630_s7, 4  ;;  %s555_s8 = int_to_ptr.vmem [resolvable:$false] %s554_s8 }
  0x14   : > { %s556_s9 = scalar_lea.vmem (!%p192_p10), %s555_s8, 2048  ;;  %p557_p1 = scmp.lt.s32.totalorder (!%p192_p10), %s752_s21, %s555_s8 }
  0x15   : > { %p552_p13 = pnand (!%p192_p10), %p551_p12, %p698_p4  ;;  %p558_p2 = scmp.lt.s32.totalorder (!%p192_p10), %s556_s9, %s550_s6 }
  0x16   : > { %s715_s29 = scalar_select %p229_p11, %s620_s18, 1 }
  0x17   : > { %p553_p0 = pneg %p552_p13  ;;  %p559_p3 = por %p558_p2, %p557_p1 }
  0x18   : > { %s491_s5 = sshll.u32 %s715_s29, 6 }
  0x19   : > { %s236_s10 = scalar_lea.vmem %s821_s0, %s491_s5  ;;  %s769_s5 = scalar_lea.sflag [#allocation3], %s216_s30 }
  0x1a   : > { %v246_v2 = vld [vmem:[%s236_s10] sm:$0xff]  ;;  %v247_v3 = vld [vmem:[%s236_s10 + $0x8] sm:$0xff]  ;;  %v248_v4 = vld [vmem:[%s236_s10 + $0x10] sm:$0xff]  ;;  %p560_p5 = pnand %p559_p3, %p553_p0 }
  0x1b   : > { %v261_v5 = vmul.f32 %v484_v0, %v246_v2  ;;  %v262_v6 = vmul.f32 %v484_v0, %v247_v3  ;;  %v263_v7 = vmul.f32 %v484_v0, %v248_v4  ;;  %v249_v8 = vld [vmem:[%s236_s10 + $0x18] sm:$0xff]  ;;  %v250_v9 = vld [vmem:[%s236_s10 + $0x20] sm:$0xff]  ;;  %v251_v10 = vld [vmem:[%s236_s10 + $0x28] sm:$0xff] }
  0x1c   : > { %v264_v11 = vmul.f32 %v484_v0, %v249_v8  ;;  %v265_v12 = vmul.f32 %v484_v0, %v250_v9  ;;  %v266_v13 = vmul.f32 %v484_v0, %v251_v10  ;;  %v252_v14 = vld [vmem:[%s236_s10 + $0x30] sm:$0xff]  ;;  %v253_v15 = vld [vmem:[%s236_s10 + $0x38] sm:$0xff] }
  0x1d   : > { %v276_v16 = vadd.f32 %v485_v1, %v261_v5  ;;  %v277_v17 = vadd.f32 %v485_v1, %v262_v6  ;;  %v278_v18 = vadd.f32 %v485_v1, %v263_v7  ;;  %v267_v19 = vmul.f32 %v484_v0, %v252_v14 }
  0x1e   : > { %v279_v20 = vadd.f32 %v485_v1, %v264_v11  ;;  %v280_v21 = vadd.f32 %v485_v1, %v265_v12  ;;  %v281_v22 = vadd.f32 %v485_v1, %v266_v13  ;;  %v268_v23 = vmul.f32 %v484_v0, %v253_v15 }
  0x1f   : > { %vm284_vm1 = vcmp.ge.f32.partialorder %v276_v16, 0.0  ;;  %v292_v24 = vmul.f32 0.2, %v276_v16  ;;  %vm285_vm2 = vcmp.ge.f32.partialorder %v277_v17, 0.0  ;;  %v293_v25 = vmul.f32 0.2, %v277_v17 }
  0x20   : > { %vm286_vm3 = vcmp.ge.f32.partialorder %v278_v18, 0.0  ;;  %v294_v26 = vmul.f32 0.2, %v278_v18  ;;  %vm287_vm4 = vcmp.ge.f32.partialorder %v279_v20, 0.0  ;;  %v295_v27 = vmul.f32 0.2, %v279_v20 }
  0x21   : > { %v300_v28 = vsel %vm284_vm1, %v276_v16, %v292_v24  ;;  %v301_v29 = vsel %vm285_vm2, %v277_v17, %v293_v25  ;;  %vm288_vm5 = vcmp.ge.f32.partialorder %v280_v21, 0.0  ;;  %v296_v30 = vmul.f32 0.2, %v280_v21 }
  0x22   : > { %309 = vst.msk [vmem:[%s733_s14] sm:$0xff] %vm308_vm0, %v300_v28  ;;  %v317_v31 = vsel %vm308_vm0, %v300_v28, 0.0  ;;  %310 = vst.msk [vmem:[%s733_s14 + $0x8] sm:$0xff] %vm308_vm0, %v301_v29  ;;  %v318_v32 = vsel %vm308_vm0, %v301_v29, 0.0  ;;  %v302_v33 = vsel %vm286_vm3, %v278_v18, %v294_v26  ;;  %v303_v34 = vsel %vm287_vm4, %v279_v20, %v295_v27 }
  0x23   : > { %v319_v35 = vadd.f32 %v318_v32, %v317_v31  ;;  %311 = vst.msk [vmem:[%s733_s14 + $0x10] sm:$0xff] %vm308_vm0, %v302_v33  ;;  %v320_v36 = vsel %vm308_vm0, %v302_v33, 0.0  ;;  %312 = vst.msk [vmem:[%s733_s14 + $0x18] sm:$0xff] %vm308_vm0, %v303_v34  ;;  %v304_v37 = vsel %vm288_vm5, %v280_v21, %v296_v30  ;;  %v322_v38 = vsel %vm308_vm0, %v303_v34, 0.0 }
  0x24   : > { %313 = vst.msk [vmem:[%s733_s14 + $0x20] sm:$0xff] %vm308_vm0, %v304_v37  ;;  %vm289_vm6 = vcmp.ge.f32.partialorder %v281_v22, 0.0  ;;  %v297_v39 = vmul.f32 0.2, %v281_v22  ;;  %v282_v40 = vadd.f32 %v485_v1, %v267_v19  ;;  %v283_v42 = vadd.f32 %v485_v1, %v268_v23 }
  0x25   : > { %v321_v41 = vadd.f32 %v320_v36, %v319_v35  ;;  %v324_v43 = vsel %vm308_vm0, %v304_v37, 0.0 }
  0x26   : > { %v305_v44 = vsel %vm289_vm6, %v281_v22, %v297_v39  ;;  %vm290_vm7 = vcmp.ge.f32.partialorder %v282_v40, 0.0  ;;  %v298_v45 = vmul.f32 0.2, %v282_v40  ;;  %vm291_vm8 = vcmp.ge.f32.partialorder %v283_v42, 0.0 }
  0x27   : > { %v323_v46 = vadd.f32 %v322_v38, %v321_v41  ;;  %314 = vst.msk [vmem:[%s733_s14 + $0x28] sm:$0xff] %vm308_vm0, %v305_v44  ;;  %v299_v47 = vmul.f32 0.2, %v283_v42  ;;  %v326_v48 = vsel %vm308_vm0, %v305_v44, 0.0 }
  0x28   : > { %v306_v49 = vsel %vm290_vm7, %v282_v40, %v298_v45 }
  0x29   : > { %v325_v50 = vadd.f32 %v324_v43, %v323_v46  ;;  %315 = vst.msk [vmem:[%s733_s14 + $0x30] sm:$0xff] %vm308_vm0, %v306_v49  ;;  %v307_v51 = vsel %vm291_vm8, %v283_v42, %v299_v47  ;;  %v328_v52 = vsel %vm308_vm0, %v306_v49, 0.0 }
  0x2a   : > { %316 = vst.msk [vmem:[%s733_s14 + $0x38] sm:$0xff] %vm308_vm0, %v307_v51 }
  0x2b   : > { %v327_v53 = vadd.f32 %v326_v48, %v325_v50 }
  0x2c   : > { %563 = shalt.err (!%p560_p5)
}
  0x2d   : > { %s564_s30 = scalar_lea.hbm %s759_s26, 1024  ;;  %s568_s12 = scalar_lea.hbm %s824_s3, 2048 }
  0x2e   : > { %p565_p6 = scmp.ne.s32.totalorder %s759_s26, %s564_s30  ;;  %p569_p10 = scmp.lt.u32.totalorder %s759_s26, %s824_s3 }
  0x2f   : > { %p570_p11 = scmp.lt.u32.totalorder %s568_s12, %s564_s30  ;;  %p572_p13 = scmp.lt.u32.totalorder %s564_s30, %s759_s26 }
  0x30   : > { %p566_p7 = pnand %p565_p6, %p698_p4 }
  0x31   : > { %p571_p12 = por %p570_p11, %p569_p10 }
  0x32   : > { %p567_p9 = pneg %p566_p7 }
  0x33   : > { %p573_p0 = por %p572_p13, %p571_p12 }
  0x35   : > { %p574_p1 = pnand %p573_p0, %p567_p9 }
  0x37   : > { %577 = shalt.err (!%p574_p1)
}
  0x38   : > { %s631_s22 = smov 128   ;;  %s632_s18 = smov 8   ;;  %v330_v54 = vsel %vm308_vm0, %v307_v51, 0.0  ;;  %v329_v55 = vadd.f32 %v328_v52, %v327_v53 }
  0x39   : > { %493 = dma.vmem_to_hbm [thread:$0]  (%p698_p4), %s752_s21, 1024, %s759_s26, %s769_s5, %s631_s22, %s631_s22, %s632_s18  }
  0x3a   : > { %v331_v56 = vadd.f32 %v330_v54, %v329_v55  ;;  %s483_s24 = sshll.u32 %s715_s29, 3 }
  0x3b   : > { %s245_s8 = scalar_lea.vmem %s825_s4, %s483_s24 }
  0x3c   : > { %v332_v57 = vrot.slane %v331_v56, 4 }
  0x3e   : > { %v333_v58 = vadd.f32 %v332_v57, %v331_v56 }
  0x40   : > { %v334_v59 = vrot.slane %v333_v58, 2 }
  0x42   : > { %v335_v60 = vadd.f32 %v334_v59, %v333_v58 }
  0x44   : > { %v336_v61 = vrot.slane %v335_v60, 1 }
  0x46   : > { %v337_v62 = vadd.f32 %v336_v61, %v335_v60 }
  0x48   : > { %338 = vst.msk [vmem:[%s245_s8] sm:$0xff] %vm308_vm0, %v337_v62 }
  0x49 PF: > { %p499_p4 = scmp.ge.s32.totalorder %s628_s20, 2  ;;  %s380_s25 = sand.u32 1, %s608_s15  }
  0x4a   : > { %s381_s21 = scalar_lea.sflag [#allocation3], %s380_s25 }
  0x4b   : > { %p496_p2 = pnand %p499_p4, %p705_p8 }
  0x4d   : > { %603 = dma.done.wait (!%p496_p2), %s381_s21, 1024  }
  0x4e   : > { %605 = vsyncadd (!%p496_p2), %s381_s21, 4294966272  ;;  %s18_s20 = sadd.s32 1, %s628_s20   ;;  %s828_s15 = smov %s612_s16 }
  0x4f   : > { %p15_p3 = scmp.ge.s32.totalorder %s18_s20, 4   ;;  %s829_s16 = smov %s616_s17 }
  0x50   : > { %s830_s17 = smov %s711_s28  ;;  %s831_s18 = smov %s624_s19 }
  0x51   : > { %s832_s19 = smov %s834_s23  ;;  %17 = sbr.rel (!%p15_p3) target bundleno = 4 (0x4), region = 79 }
  0x58   :  { %396 = vsyncpa [#allocation3], 1 }
  0x59   :  { %398 = vsyncpa [#allocation3 + $0x1], 1 }

// kernel: discriminator_forward.6
= control target key start
LH: loop header
LB: loop body
LE: loop exit
PB: predicated region body
PF: predicated region fallthrough
CT: control target
= control target key end

     0   :  { %11 = vsyncpa [#allocation3], 0  ;;  %s7073_s0 = inlined_call_operand.vmem [shape: f32[2,1,18,18,3], index: 0, kind: input, shape index: {}]   ;;  %s7074_s1 = inlined_call_operand.vmem [shape: f32[9,3,8], index: 1, kind: input, shape index: {}]   ;;  %s7075_s2 = inlined_call_operand.vmem [shape: f32[1,8], index: 2, kind: input, shape index: {}]   ;;  %s7076_s3 = inlined_call_operand.vmem [shape: f32[1,8], index: 3, kind: input, shape index: {}]   ;;  %s7077_s4 = inlined_call_operand.vmem [shape: f32[2,16,16,8], index: 4, kind: output, shape index: {0}]   ;;  %s7078_s5 = inlined_call_operand.hbm [shape: f32[2,1,8,8], index: 5, kind: output, shape index: {1}]  }
   0x1   :  { %13 = vsyncpa [#allocation3 + $0x1], 0  ;;  %s5830_s18 = smov 0   ;;  %s5832_s19 = smov 0  }
   0x2   :  { %s5834_s20 = smov 0   ;;  %s5836_s21 = smov 0  }
   0x3   :  { %s5838_s22 = smov 0   ;;  %s5840_s23 = smov 0  }
   0x4 LB: > { %s4145_s24 = sadd.s32 4294967295, %s5797_s23   ;;  %s4146_s25 = sadd.s32 4294967294, %s5797_s23   ;;  %s5797_s23 = sphi %s5840_s23, %s19_s23   ;;  %s5793_s22 = sphi %s5838_s22, %s7194_s22   ;;  %s5789_s21 = sphi %s5836_s21, %s7193_s21   ;;  %s5785_s20 = sphi %s5834_s20, %s7192_s20   ;;  %s5781_s19 = sphi %s5832_s19, %s7191_s19   ;;  %s5777_s18 = sphi %s5830_s18, %s7190_s18  }
   0x5   : > { %s31_s26 = sadd.s32 1, %s5793_s22  ;;  %s157_s27 = sadd.s32 1, %s5785_s20 }
   0x6   : > { %p33_p0 = scmp.ge.s32.totalorder %s31_s26, 2  ;;  %p167_p1 = scmp.ne.s32.totalorder %s5785_s20, %s5781_s19 }
   0x7   : > { %p168_p2 = scmp.eq.s32.totalorder %s4145_s24, 1  ;;  %p173_p3 = scmp.ne.s32.totalorder %s5781_s19, %s5777_s18 }
   0x8   : > { %s7196_s26 = smov (%p33_p0, %s31_s26), 0  ;;  %p174_p5 = scmp.eq.s32.totalorder %s4146_s25, 1 }
   0x9   : > { %p5870_p4 = por %p168_p2, %p167_p1  ;;  %s152_s29 = ssub.s32 %s5793_s22, %s7196_s26 }
   0xa   : > { %p4149_p6 = scmp.ge.s32.totalorder %s5797_s23, 1  ;;  %p155_p7 = scmp.eq.s32.totalorder %s152_s29, 0 }
   0xb   : > { %p5877_p8 = por %p174_p5, %p173_p3  ;;  %p209_p9 = scmp.lt.s32.totalorder %s5797_s23, 3 }
   0xc   : > { %s5883_s6 = scalar_select %p155_p7, %s5785_s20, %s157_s27  }
   0xd   : > { %p210_p10 = pnand %p4149_p6, %p209_p9 }
   0xf   : > { %213 = sbr.rel (%p210_p10) target bundleno = 571 (0x23b), region = 36 }
  0x16   : > { %v4154_v0 = vld [vmem:[%s7074_s1 + $0x4] sm:$0x7]  ;;  %vm430_vm0 = vcmask 1042432   ;;  %v5891_v1 = vld [vmem:[%s7074_s1 + $0x10] sm:$0x7]  ;;  %p247_p11 = scmp.lt.s32.totalorder %s5789_s21, 1 }
  0x17   : > { %4955 = vmatprep.subr.msk.mxu1 %vm430_vm0, %v4154_v0  ;;  %5155 = vmatprep.subr.msk.mxu0 %vm430_vm0, %v5891_v1  ;;  %v298_v2 = vld [vmem:[%s7074_s1] sm:$0x7]  ;;  %v4419_v3 = vld [vmem:[%s7074_s1 + $0x14] sm:$0x7]  ;;  %vm333_vm1 = vcmask 23552   ;;  %vm3893_vm3 = vcmask 64512  }
  0x18   : > { %4956 = vmatpush3.msk.msra.mxu1 %vm430_vm0, %v4154_v0  ;;  %5156 = vmatpush3.msk.msra.mxu0 %vm430_vm0, %v5891_v1  ;;  %s5907_s15 = scalar_select %p247_p11, %s5789_s21, 1  ;;  %v4485_v9 = vld [vmem:[%s7074_s1 + $0x18] sm:$0x7]  ;;  %v5934_v10 = vld [vmem:[%s7074_s1 + $0x8] sm:$0x7] }
  0x19   : > { %5005 = vmatprep.subr.msk.mxu1 %vm430_vm0, %v298_v2  ;;  %5205 = vmatprep.subr.msk.mxu0 %vm430_vm0, %v4419_v3  ;;  %v6053_v28 = vld [vmem:[%s7074_s1 + $0x1c] sm:$0x7]  ;;  %v6216_v61 = vld [vmem:[%s7074_s1 + $0xc] sm:$0x7]  ;;  %s4654_s10 = sshll.u32 %s5789_s21, 7  ;;  %s5799_s21 = smov [#allocation2]  }
  0x1a   : > { %s5663_s16 = smul.u32 432, %s5907_s15  ;;  %s4657_s27 = sshll.u32 %s5907_s15, 8 }
  0x1b   : > { %s6854_s8 = scalar_lea.vmem %s7077_s4, %s4657_s27  ;;  %s244_s15 = sand.u32 1, %s5781_s19  }
  0x1c   : > { %s5915_s25 = scalar_lea.vmem %s7073_s0, %s5663_s16  ;;  %s4150_s9 = sshll.u32 %s244_s15, 3 }
  0x1d   : > { %v299_v4 = vld [vmem:[%s5915_s25 + $0x1] sm:$0xff]  ;;  %v4321_v5 = vld [vmem:[%s5915_s25 + $0x19] sm:$0xff]  ;;  %v300_v6 = vld [vmem:[%s5915_s25 + $0x9] sm:$0xff]  ;;  %s246_s11 = scalar_lea.vmem [#allocation2], %s4150_s9  ;;  %s7025_s16 = scalar_lea.hbm %s7078_s5, %s4654_s10 }
  0x1e   : > { %4957 = vmatprep.mubr.msk.f32.mxu1 %vm333_vm1, %v299_v4  ;;  %5157 = vmatprep.mubr.msk.f32.mxu0 %vm333_vm1, %v4321_v5  ;;  %v4322_v7 = vld [vmem:[%s5915_s25 + $0x21] sm:$0xff]  ;;  %v5924_v8 = vld [vmem:[%s5915_s25 + $0x31] sm:$0xff]  ;;  %v5939_v11 = vld [vmem:[%s5915_s25 + $0x39] sm:$0xff]  ;;  %s4025_s12 = sshll.u32 %s246_s11, 4  ;;  %s4007_s17 = scalar_lea.sflag [#allocation3], %s244_s15  ;;  %s7027_s12 = int_to_ptr.vmem [resolvable:$true] %s4025_s12 }
  0x1f   : > { %4958 = vmatmul.mubr.msk.f32.vlgmr.msra.gmra.mrb[0].mxu1 %vm333_vm1, %v300_v6  ;;  %5158 = vmatmul.mubr.msk.f32.vlgmr.msra.gmra.mrb[0].mxu0 %vm333_vm1, %v4322_v7  ;;  %v5945_v12 = vld [vmem:[%s5915_s25 + $0x49] sm:$0xff]  ;;  %v5958_v13 = vld [vmem:[%s5915_s25 + $0x51] sm:$0xff]  ;;  %v5961_v14 = vld [vmem:[%s5915_s25 + $0x61] sm:$0xff]  ;;  %s5719_s24 = scalar_lea.vmem %s7027_s12, 128 }
  0x20   : > { %5006 = vmatpush3.msk.msra.mxu1 %vm430_vm0, %v298_v2  ;;  %5206 = vmatpush3.msk.msra.mxu0 %vm430_vm0, %v4419_v3  ;;  %v5972_v15 = vld [vmem:[%s5915_s25 + $0x69] sm:$0xff]  ;;  %v5975_v16 = vld [vmem:[%s5915_s25 + $0x79] sm:$0xff]  ;;  %v5986_v17 = vld [vmem:[%s5915_s25 + $0x81] sm:$0xff]  ;;  %p5720_p12 = scmp.ne.s32.totalorder %s7027_s12, %s5719_s24 }
  0x21   : > { %4960 = vmatprep.mubr.msk.f32.mxu1 %vm333_vm1, %v4321_v5  ;;  %5160 = vmatprep.mubr.msk.f32.mxu0 %vm333_vm1, %v5924_v8  ;;  %v5989_v18 = vld [vmem:[%s5915_s25 + $0x91] sm:$0xff]  ;;  %v6000_v19 = vld [vmem:[%s5915_s25 + $0x99] sm:$0xff]  ;;  %v6003_v20 = vld [vmem:[%s5915_s25 + $0xa9] sm:$0xff] }
  0x22   : > { %5255 = vmatprep.subr.msk.mxu0 %vm430_vm0, %v4485_v9  ;;  %5055 = vmatprep.subr.msk.mxu1 %vm430_vm0, %v5934_v10  ;;  %v6014_v21 = vld [vmem:[%s5915_s25 + $0xb1] sm:$0xff]  ;;  %v6017_v22 = vld [vmem:[%s5915_s25 + $0xc1] sm:$0xff]  ;;  %v6028_v23 = vld [vmem:[%s5915_s25 + $0xc9] sm:$0xff]  ;;  %p5721_p13 = pnand %p5720_p12, %p5870_p4 }
  0x23   : > { %4961 = vmatmul.mubr.msk.f32.gmra.mrb[2].mxu1 %vm333_vm1, %v4322_v7  ;;  %5161 = vmatmul.mubr.msk.f32.gmra.mrb[2].mxu0 %vm333_vm1, %v5939_v11  ;;  %v6031_v24 = vld [vmem:[%s5915_s25 + $0x1a] sm:$0xff]  ;;  %v6042_v25 = vld [vmem:[%s5915_s25 + $0x22] sm:$0xff]  ;;  %v6048_v27 = vld [vmem:[%s5915_s25 + $0x32] sm:$0xff] }
  0x24   : > { %4963 = vmatprep.mubr.msk.f32.mxu1 %vm333_vm1, %v5924_v8  ;;  %5163 = vmatprep.mubr.msk.f32.mxu0 %vm333_vm1, %v5945_v12  ;;  %v6045_v26 = vld [vmem:[%s5915_s25 + $0xd9] sm:$0xff]  ;;  %v6063_v29 = vld [vmem:[%s5915_s25 + $0xe1] sm:$0xff]  ;;  %v6071_v31 = vld [vmem:[%s5915_s25 + $0xf1] sm:$0xff]  ;;  %p5722_p0 = pneg %p5721_p13 }
  0x25   : > { %7126 = vst [vmem:[#allocation5_spill] sm:$0xff] %v6063_v29  ;;  %v6066_v30 = vld [vmem:[%s5915_s25 + $0x3a] sm:$0xff]  ;;  %7127 = vst [vmem:[#allocation6_spill] sm:$0xff] %v6071_v31  ;;  %v6074_v32 = vld [vmem:[%s5915_s25 + $0x4a] sm:$0xff] }
  0x26   : > { %v6087_v33 = vld [vmem:[%s5915_s25 + $0xf9] sm:$0xff]  ;;  %v6093_v35 = vld [vmem:[%s5915_s25 + $0x109] sm:$0xff]  ;;  %v6107_v37 = vld [vmem:[%s5915_s25 + $0x111] sm:$0xff] }
  0x27   : > { %4964 = vmatmul.mubr.msk.f32.gmra.mrb[4].mxu1 %vm333_vm1, %v5939_v11  ;;  %5164 = vmatmul.mubr.msk.f32.gmra.mrb[4].mxu0 %vm333_vm1, %v5958_v13  ;;  %7128 = vst [vmem:[#allocation7_spill] sm:$0xff] %v6087_v33  ;;  %v6090_v34 = vld [vmem:[%s5915_s25 + $0x52] sm:$0xff]  ;;  %7129 = vst [vmem:[#allocation8_spill] sm:$0xff] %v6093_v35  ;;  %v6096_v36 = vld [vmem:[%s5915_s25 + $0x62] sm:$0xff] }
  0x28   : > { %4966 = vmatprep.mubr.msk.f32.mxu1 %vm333_vm1, %v5945_v12  ;;  %5166 = vmatprep.mubr.msk.f32.mxu0 %vm333_vm1, %v5961_v14  ;;  %7130 = vst [vmem:[#allocation9_spill] sm:$0xff] %v6107_v37  ;;  %v6110_v38 = vld [vmem:[%s5915_s25 + $0x6a] sm:$0xff]  ;;  %v6113_v39 = vld [vmem:[%s5915_s25 + $0x121] sm:$0xff]  ;;  %v6133_v43 = vld [vmem:[%s5915_s25 + $0x139] sm:$0xff] }
  0x29   : > { %7131 = vst [vmem:[#allocation10_spill] sm:$0xff] %v6113_v39  ;;  %v6116_v40 = vld [vmem:[%s5915_s25 + $0x7a] sm:$0xff]  ;;  %v6127_v41 = vld [vmem:[%s5915_s25 + $0x129] sm:$0xff]  ;;  %7133 = vst [vmem:[#allocation12_spill] sm:$0xff] %v6133_v43 }
  0x2a   : > { %7132 = vst [vmem:[#allocation11_spill] sm:$0xff] %v6127_v41  ;;  %v6130_v42 = vld [vmem:[%s5915_s25 + $0x82] sm:$0xff]  ;;  %v6136_v44 = vld [vmem:[%s5915_s25 + $0x92] sm:$0xff]  ;;  %v6150_v46 = vld [vmem:[%s5915_s25 + $0x9a] sm:$0xff] }
  0x2b   : > { %4967 = vmatmul.mubr.msk.f32.gmra.mrb[6].mxu1 %vm333_vm1, %v5958_v13  ;;  %5167 = vmatmul.mubr.msk.f32.gmra.mrb[6].mxu0 %vm333_vm1, %v5972_v15  ;;  %v6147_v45 = vld [vmem:[%s5915_s25 + $0x141] sm:$0xff]  ;;  %v6153_v47 = vld [vmem:[%s5915_s25 + $0x151] sm:$0xff]  ;;  %v6167_v49 = vld [vmem:[%s5915_s25 + $0x159] sm:$0xff] }
  0x2c   : > { %4969 = vmatprep.mubr.msk.f32.mxu1 %vm333_vm1, %v5961_v14  ;;  %5169 = vmatprep.mubr.msk.f32.mxu0 %vm333_vm1, %v5975_v16  ;;  %7134 = vst [vmem:[#allocation13_spill] sm:$0xff] %v6147_v45  ;;  %7135 = vst [vmem:[#allocation14_spill] sm:$0xff] %v6153_v47  ;;  %v6156_v48 = vld [vmem:[%s5915_s25 + $0xaa] sm:$0xff]  ;;  %v6170_v50 = vld [vmem:[%s5915_s25 + $0xb2] sm:$0xff] }
  0x2d   : > { %7136 = vst [vmem:[#allocation15_spill] sm:$0xff] %v6167_v49  ;;  %v6173_v51 = vld [vmem:[%s5915_s25 + $0x169] sm:$0xff]  ;;  %v6187_v53 = vld [vmem:[%s5915_s25 + $0x171] sm:$0xff]  ;;  %v266_v55 = vld [vmem:[%s5915_s25] sm:$0xff] }
  0x2e   : > { %7137 = vst [vmem:[#allocation16_spill] sm:$0xff] %v6173_v51  ;;  %v6176_v52 = vld [vmem:[%s5915_s25 + $0xc2] sm:$0xff]  ;;  %7138 = vst [vmem:[#allocation17_spill] sm:$0xff] %v6187_v53  ;;  %v6190_v54 = vld [vmem:[%s5915_s25 + $0xca] sm:$0xff] }
  0x2f   : > { %4970 = vmatmul.mubr.msk.f32.gmra.mrb[8].mxu1 %vm333_vm1, %v5972_v15  ;;  %5170 = vmatmul.mubr.msk.f32.gmra.mrb[8].mxu0 %vm333_vm1, %v5986_v17  ;;  %v6194_v56 = vld [vmem:[%s5915_s25 + $0xda] sm:$0xff]  ;;  %v267_v57 = vld [vmem:[%s5915_s25 + $0x8] sm:$0xff]  ;;  %v6211_v60 = vld [vmem:[%s5915_s25 + $0xf2] sm:$0xff] }
  0x30   : > { %4972 = vmatprep.mubr.msk.f32.mxu1 %vm333_vm1, %v5975_v16  ;;  %5172 = vmatprep.mubr.msk.f32.mxu0 %vm333_vm1, %v5989_v18  ;;  %v6205_v58 = vld [vmem:[%s5915_s25 + $0xe2] sm:$0xff]  ;;  %v6208_v59 = vld [vmem:[%s5915_s25 + $0x18] sm:$0xff]  ;;  %v6234_v0 = vld [vmem:[%s5915_s25 + $0x30] sm:$0xff] }
  0x31   : > { %7139 = vst [vmem:[#allocation18_spill] sm:$0xff] %v6208_v59  ;;  %v6226_v62 = vld [vmem:[%s5915_s25 + $0x20] sm:$0xff]  ;;  %7141 = vst [vmem:[#allocation20_spill] sm:$0xff] %v6234_v0  ;;  %v6237_v2 = vld [vmem:[%s5915_s25 + $0x10a] sm:$0xff] }
  0x32   : > { %7140 = vst [vmem:[#allocation19_spill] sm:$0xff] %v6226_v62  ;;  %v6229_v63 = vld [vmem:[%s5915_s25 + $0xfa] sm:$0xff]  ;;  %v6253_v4 = vld [vmem:[%s5915_s25 + $0x112] sm:$0xff]  ;;  %v6256_v5 = vld [vmem:[%s5915_s25 + $0x48] sm:$0xff] }
  0x33   : > { %4973 = vmatmul.mubr.msk.f32.gmra.mrb[10].mxu1 %vm333_vm1, %v5986_v17  ;;  %5173 = vmatmul.mubr.msk.f32.gmra.mrb[10].mxu0 %vm333_vm1, %v6000_v19  ;;  %v6250_v3 = vld [vmem:[%s5915_s25 + $0x38] sm:$0xff]  ;;  %7143 = vst [vmem:[#allocation22_spill] sm:$0xff] %v6256_v5  ;;  %v6259_v6 = vld [vmem:[%s5915_s25 + $0x122] sm:$0xff]  ;;  %v6270_v7 = vld [vmem:[%s5915_s25 + $0x50] sm:$0xff] }
  0x34   : > { %4975 = vmatprep.mubr.msk.f32.mxu1 %vm333_vm1, %v5989_v18  ;;  %5175 = vmatprep.mubr.msk.f32.mxu0 %vm333_vm1, %v6003_v20  ;;  %7142 = vst [vmem:[#allocation21_spill] sm:$0xff] %v6250_v3  ;;  %7144 = vst [vmem:[#allocation23_spill] sm:$0xff] %v6270_v7 }
  0x37   : > { %4976 = vmatmul.mubr.msk.f32.gmra.mrb[12].mxu1 %vm333_vm1, %v6000_v19  ;;  %5176 = vmatmul.mubr.msk.f32.gmra.mrb[12].mxu0 %vm333_vm1, %v6014_v21 }
  0x38   : > { %4978 = vmatprep.mubr.msk.f32.mxu1 %vm333_vm1, %v6003_v20  ;;  %5178 = vmatprep.mubr.msk.f32.mxu0 %vm333_vm1, %v6017_v22 }
  0x3b   : > { %4979 = vmatmul.mubr.msk.f32.gmra.mrb[14].mxu1 %vm333_vm1, %v6014_v21  ;;  %5179 = vmatmul.mubr.msk.f32.gmra.mrb[14].mxu0 %vm333_vm1, %v6028_v23 }
  0x3c   : > { %4981 = vmatprep.mubr.msk.f32.mxu1 %vm333_vm1, %v6017_v22  ;;  %5207 = vmatprep.mubr.msk.f32.mxu0 %vm333_vm1, %v6031_v24 }
  0x3f   : > { %4982 = vmatmul.mubr.msk.f32.gmra.mrb[16].mxu1 %vm333_vm1, %v6028_v23  ;;  %5208 = vmatmul.mubr.msk.f32.vlgmr.msra.gmra.mrb[0].mxu0 %vm333_vm1, %v6042_v25 }
  0x40   : > { %5256 = vmatpush3.msk.msra.mxu0 %vm430_vm0, %v4485_v9  ;;  %4984 = vmatprep.mubr.msk.f32.mxu1 %vm333_vm1, %v6045_v26  ;;  %v6273_v9 = vld [vmem:[%s5915_s25 + $0x12a] sm:$0xff] }
  0x41   : > { %5210 = vmatprep.mubr.msk.f32.mxu0 %vm333_vm1, %v6048_v27  ;;  %5305 = vmatprep.subr.msk.mxu0 %vm430_vm0, %v6053_v28 }
  0x43   : > { %4985 = vmatmul.mubr.msk.f32.gmra.mrb[18].mxu1 %vm333_vm1, %v6063_v29  ;;  %5211 = vmatmul.mubr.msk.f32.gmra.mrb[2].mxu0 %vm333_vm1, %v6066_v30  ;;  %v6370_v29 = vld [vmem:[%s5915_s25 + $0xd8] sm:$0xff] }
  0x44   : > { %4987 = vmatprep.mubr.msk.f32.mxu1 %vm333_vm1, %v6071_v31  ;;  %5213 = vmatprep.mubr.msk.f32.mxu0 %vm333_vm1, %v6074_v32  ;;  %v6353_v31 = vld [vmem:[%s5915_s25 + $0x18a] sm:$0xff] }
  0x45   : > { %7155 = vst [vmem:[#allocation34_spill] sm:$0xff] %v6353_v31 }
  0x47   : > { %4988 = vmatmul.mubr.msk.f32.gmra.mrb[20].mxu1 %vm333_vm1, %v6087_v33  ;;  %5214 = vmatmul.mubr.msk.f32.gmra.mrb[4].mxu0 %vm333_vm1, %v6090_v34  ;;  %v6339_v33 = vld [vmem:[%s5915_s25 + $0x182] sm:$0xff] }
  0x48   : > { %4990 = vmatprep.mubr.msk.f32.mxu1 %vm333_vm1, %v6093_v35  ;;  %5216 = vmatprep.mubr.msk.f32.mxu0 %vm333_vm1, %v6096_v36  ;;  %v6336_v35 = vld [vmem:[%s5915_s25 + $0xa8] sm:$0xff]  ;;  %7153 = vst [vmem:[#allocation32_spill] sm:$0xff] %v6339_v33 }
  0x49   : > { %7152 = vst [vmem:[#allocation31_spill] sm:$0xff] %v6336_v35 }
  0x4b   : > { %4991 = vmatmul.mubr.msk.f32.gmra.mrb[22].mxu1 %vm333_vm1, %v6107_v37  ;;  %5217 = vmatmul.mubr.msk.f32.gmra.mrb[6].mxu0 %vm333_vm1, %v6110_v38  ;;  %v6333_v37 = vld [vmem:[%s5915_s25 + $0x172] sm:$0xff] }
  0x4c   : > { %4993 = vmatprep.mubr.msk.f32.mxu1 %vm333_vm1, %v6113_v39  ;;  %5219 = vmatprep.mubr.msk.f32.mxu0 %vm333_vm1, %v6116_v40  ;;  %v6330_v39 = vld [vmem:[%s5915_s25 + $0x98] sm:$0xff]  ;;  %7151 = vst [vmem:[#allocation30_spill] sm:$0xff] %v6333_v37 }
  0x4d   : > { %7150 = vst [vmem:[#allocation29_spill] sm:$0xff] %v6330_v39 }
  0x4f   : > { %4994 = vmatmul.mubr.msk.f32.gmra.mrb[24].mxu1 %vm333_vm1, %v6127_v41  ;;  %5220 = vmatmul.mubr.msk.f32.gmra.mrb[8].mxu0 %vm333_vm1, %v6130_v42  ;;  %v6319_v41 = vld [vmem:[%s5915_s25 + $0x16a] sm:$0xff] }
  0x50   : > { %4996 = vmatprep.mubr.msk.f32.mxu1 %vm333_vm1, %v6133_v43  ;;  %5222 = vmatprep.mubr.msk.f32.mxu0 %vm333_vm1, %v6136_v44  ;;  %v6316_v43 = vld [vmem:[%s5915_s25 + $0x90] sm:$0xff] }
  0x51   : > { %7149 = vst [vmem:[#allocation28_spill] sm:$0xff] %v6316_v43 }
  0x53   : > { %4997 = vmatmul.mubr.msk.f32.gmra.mrb[26].mxu1 %vm333_vm1, %v6147_v45  ;;  %5223 = vmatmul.mubr.msk.f32.gmra.mrb[10].mxu0 %vm333_vm1, %v6150_v46  ;;  %v6313_v45 = vld [vmem:[%s5915_s25 + $0x15a] sm:$0xff] }
  0x54   : > { %4999 = vmatprep.mubr.msk.f32.mxu1 %vm333_vm1, %v6153_v47  ;;  %5225 = vmatprep.mubr.msk.f32.mxu0 %vm333_vm1, %v6156_v48  ;;  %v6310_v47 = vld [vmem:[%s5915_s25 + $0x80] sm:$0xff] }
  0x55   : > { %7148 = vst [vmem:[#allocation27_spill] sm:$0xff] %v6310_v47 }
  0x57   : > { %5000 = vmatmul.mubr.msk.f32.gmra.mrb[28].mxu1 %vm333_vm1, %v6167_v49  ;;  %5226 = vmatmul.mubr.msk.f32.gmra.mrb[12].mxu0 %vm333_vm1, %v6170_v50  ;;  %v6299_v49 = vld [vmem:[%s5915_s25 + $0x152] sm:$0xff] }
  0x58   : > { %5002 = vmatprep.mubr.msk.f32.mxu1 %vm333_vm1, %v6173_v51  ;;  %5228 = vmatprep.mubr.msk.f32.mxu0 %vm333_vm1, %v6176_v52  ;;  %v6296_v51 = vld [vmem:[%s5915_s25 + $0x78] sm:$0xff] }
  0x59   : > { %7147 = vst [vmem:[#allocation26_spill] sm:$0xff] %v6296_v51 }
  0x5b   : > { %5003 = vmatmul.mubr.msk.f32.gmra.mrb[30].mxu1 %vm333_vm1, %v6187_v53  ;;  %5229 = vmatmul.mubr.msk.f32.gmra.mrb[14].mxu0 %vm333_vm1, %v6190_v54  ;;  %v6293_v53 = vld [vmem:[%s5915_s25 + $0x142] sm:$0xff] }
  0x5c   : > { %5007 = vmatprep.mubr.msk.f32.mxu1 %vm333_vm1, %v266_v55  ;;  %5231 = vmatprep.mubr.msk.f32.mxu0 %vm333_vm1, %v6194_v56  ;;  %v6279_v55 = vld [vmem:[%s5915_s25 + $0x13a] sm:$0xff] }
  0x5f   : > { %5008 = vmatmul.mubr.msk.f32.vlgmr.msra.gmra.mrb[0].mxu1 %vm333_vm1, %v267_v57  ;;  %5232 = vmatmul.mubr.msk.f32.gmra.mrb[16].mxu0 %vm333_vm1, %v6205_v58  ;;  %v6290_v57 = vld [vmem:[%s5915_s25 + $0x68] sm:$0xff] }
  0x60   : > { %5056 = vmatpush3.msk.msra.mxu1 %vm430_vm0, %v5934_v10  ;;  %5010 = vmatprep.mubr.msk.f32.mxu1 %vm333_vm1, %v6208_v59  ;;  %v6276_v10 = vld [vmem:[%s5915_s25 + $0x60] sm:$0xff]  ;;  %7146 = vst [vmem:[#allocation25_spill] sm:$0xff] %v6290_v57 }
  0x61   : > { %5234 = vmatprep.mubr.msk.f32.mxu0 %vm333_vm1, %v6211_v60  ;;  %5105 = vmatprep.subr.msk.mxu1 %vm430_vm0, %v6216_v61  ;;  %7145 = vst [vmem:[#allocation24_spill] sm:$0xff] %v6276_v10  ;;  %v6356_v59 = vld [vmem:[%s5915_s25 + $0xc0] sm:$0xff] }
  0x63   : > { %5011 = vmatmul.mubr.msk.f32.gmra.mrb[2].mxu1 %vm333_vm1, %v6226_v62  ;;  %5235 = vmatmul.mubr.msk.f32.gmra.mrb[18].mxu0 %vm333_vm1, %v6229_v63  ;;  %v6350_v62 = vld [vmem:[%s5915_s25 + $0xb0] sm:$0xff] }
  0x64   : > { %5013 = vmatprep.mubr.msk.f32.mxu1 %vm333_vm1, %v6234_v0  ;;  %5237 = vmatprep.mubr.msk.f32.mxu0 %vm333_vm1, %v6237_v2  ;;  %7154 = vst [vmem:[#allocation33_spill] sm:$0xff] %v6350_v62 }
  0x67   : > { %5014 = vmatmul.mubr.msk.f32.gmra.mrb[4].mxu1 %vm333_vm1, %v6250_v3  ;;  %5238 = vmatmul.mubr.msk.f32.gmra.mrb[20].mxu0 %vm333_vm1, %v6253_v4 }
  0x68   : > { %5016 = vmatprep.mubr.msk.f32.mxu1 %vm333_vm1, %v6256_v5  ;;  %5240 = vmatprep.mubr.msk.f32.mxu0 %vm333_vm1, %v6259_v6 }
  0x6b   : > { %5017 = vmatmul.mubr.msk.f32.gmra.mrb[6].mxu1 %vm333_vm1, %v6270_v7  ;;  %5241 = vmatmul.mubr.msk.f32.gmra.mrb[22].mxu0 %vm333_vm1, %v6273_v9 }
  0x6c   : > { %5019 = vmatprep.mubr.msk.f32.mxu1 %vm333_vm1, %v6276_v10  ;;  %5243 = vmatprep.mubr.msk.f32.mxu0 %vm333_vm1, %v6279_v55 }
  0x6f   : > { %5020 = vmatmul.mubr.msk.f32.gmra.mrb[8].mxu1 %vm333_vm1, %v6290_v57  ;;  %5244 = vmatmul.mubr.msk.f32.gmra.mrb[24].mxu0 %vm333_vm1, %v6293_v53 }
  0x70   : > { %5022 = vmatprep.mubr.msk.f32.mxu1 %vm333_vm1, %v6296_v51  ;;  %5246 = vmatprep.mubr.msk.f32.mxu0 %vm333_vm1, %v6299_v49 }
  0x73   : > { %5023 = vmatmul.mubr.msk.f32.gmra.mrb[10].mxu1 %vm333_vm1, %v6310_v47  ;;  %5247 = vmatmul.mubr.msk.f32.gmra.mrb[26].mxu0 %vm333_vm1, %v6313_v45 }
  0x74   : > { %5025 = vmatprep.mubr.msk.f32.mxu1 %vm333_vm1, %v6316_v43  ;;  %5249 = vmatprep.mubr.msk.f32.mxu0 %vm333_vm1, %v6319_v41 }
  0x77   : > { %5026 = vmatmul.mubr.msk.f32.gmra.mrb[12].mxu1 %vm333_vm1, %v6330_v39  ;;  %5250 = vmatmul.mubr.msk.f32.gmra.mrb[28].mxu0 %vm333_vm1, %v6333_v37  ;;  %v6375_v37 = vld [vmem:[%s7074_s1 + $0x20] sm:$0x7] }
  0x78   : > { %5028 = vmatprep.mubr.msk.f32.mxu1 %vm333_vm1, %v6336_v35  ;;  %5252 = vmatprep.mubr.msk.f32.mxu0 %vm333_vm1, %v6339_v33  ;;  %v6367_v33 = vld [vmem:[%s5915_s25 + $0xc8] sm:$0xff] }
  0x79   : > { %7156 = vst [vmem:[#allocation35_spill] sm:$0xff] %v6367_v33 }
  0x7b   : > { %5029 = vmatmul.mubr.msk.f32.gmra.mrb[14].mxu1 %vm333_vm1, %v6350_v62  ;;  %5253 = vmatmul.mubr.msk.f32.gmra.mrb[30].mxu0 %vm333_vm1, %v6353_v31  ;;  %v6386_v31 = vld [vmem:[%s5915_s25 + $0xe0] sm:$0xff] }
  0x7c   : > { %5031 = vmatprep.mubr.msk.f32.mxu1 %vm333_vm1, %v6356_v59  ;;  %5257 = vmatprep.mubr.msk.f32.mxu0 %vm333_vm1, %v6234_v0  ;;  %v6391_v0 = vld [vmem:[%s5915_s25 + $0xf0] sm:$0xff] }
  0x7f   : > { %5032 = vmatmul.mubr.msk.f32.gmra.mrb[16].mxu1 %vm333_vm1, %v6367_v33  ;;  %5258 = vmatmul.mubr.msk.f32.vlgmr.msra.gmra.mrb[0].mxu0 %vm333_vm1, %v6250_v3  ;;  %v983_v3 = vld [vmem:[%s5915_s25 + $0x2] sm:$0xff] }
  0x80   : > { %5306 = vmatpush3.msk.msra.mxu0 %vm430_vm0, %v6053_v28  ;;  %5034 = vmatprep.mubr.msk.f32.mxu1 %vm333_vm1, %v6370_v29  ;;  %v6404_v28 = vld [vmem:[%s5915_s25 + $0xf8] sm:$0xff] }
  0x81   : > { %5260 = vmatprep.mubr.msk.f32.mxu0 %vm333_vm1, %v6256_v5  ;;  %5355 = vmatprep.subr.msk.mxu0 %vm430_vm0, %v6375_v37  ;;  %v6407_v5 = vld [vmem:[%s5915_s25 + $0x108] sm:$0xff] }
  0x83   : > { %5035 = vmatmul.mubr.msk.f32.gmra.mrb[18].mxu1 %vm333_vm1, %v6386_v31  ;;  %5261 = vmatmul.mubr.msk.f32.gmra.mrb[2].mxu0 %vm333_vm1, %v6270_v7  ;;  %v6418_v7 = vld [vmem:[%s5915_s25 + $0x110] sm:$0xff] }
  0x84   : > { %5037 = vmatprep.mubr.msk.f32.mxu1 %vm333_vm1, %v6391_v0  ;;  %5263 = vmatprep.mubr.msk.f32.mxu0 %vm333_vm1, %v6276_v10  ;;  %v6421_v10 = vld [vmem:[%s5915_s25 + $0x120] sm:$0xff] }
  0x87   : > { %5038 = vmatmul.mubr.msk.f32.gmra.mrb[20].mxu1 %vm333_vm1, %v6404_v28  ;;  %5264 = vmatmul.mubr.msk.f32.gmra.mrb[4].mxu0 %vm333_vm1, %v6290_v57  ;;  %v6432_v57 = vld [vmem:[%s5915_s25 + $0x128] sm:$0xff] }
  0x88   : > { %5040 = vmatprep.mubr.msk.f32.mxu1 %vm333_vm1, %v6407_v5  ;;  %5266 = vmatprep.mubr.msk.f32.mxu0 %vm333_vm1, %v6296_v51  ;;  %v6435_v51 = vld [vmem:[%s5915_s25 + $0x138] sm:$0xff] }
  0x8b   : > { %5041 = vmatmul.mubr.msk.f32.gmra.mrb[22].mxu1 %vm333_vm1, %v6418_v7  ;;  %5267 = vmatmul.mubr.msk.f32.gmra.mrb[6].mxu0 %vm333_vm1, %v6310_v47  ;;  %v6446_v47 = vld [vmem:[%s5915_s25 + $0x140] sm:$0xff] }
  0x8c   : > { %5043 = vmatprep.mubr.msk.f32.mxu1 %vm333_vm1, %v6421_v10  ;;  %5269 = vmatprep.mubr.msk.f32.mxu0 %vm333_vm1, %v6316_v43  ;;  %v6449_v43 = vld [vmem:[%s5915_s25 + $0x150] sm:$0xff] }
  0x8f   : > { %5044 = vmatmul.mubr.msk.f32.gmra.mrb[24].mxu1 %vm333_vm1, %v6432_v57  ;;  %5270 = vmatmul.mubr.msk.f32.gmra.mrb[8].mxu0 %vm333_vm1, %v6330_v39  ;;  %v6460_v39 = vld [vmem:[%s5915_s25 + $0x158] sm:$0xff] }
  0x90   : > { %5046 = vmatprep.mubr.msk.f32.mxu1 %vm333_vm1, %v6435_v51  ;;  %5272 = vmatprep.mubr.msk.f32.mxu0 %vm333_vm1, %v6336_v35  ;;  %v6463_v35 = vld [vmem:[%s5915_s25 + $0x168] sm:$0xff] }
  0x93   : > { %5047 = vmatmul.mubr.msk.f32.gmra.mrb[26].mxu1 %vm333_vm1, %v6446_v47  ;;  %5273 = vmatmul.mubr.msk.f32.gmra.mrb[10].mxu0 %vm333_vm1, %v6350_v62  ;;  %v6474_v62 = vld [vmem:[%s5915_s25 + $0x170] sm:$0xff] }
  0x94   : > { %5049 = vmatprep.mubr.msk.f32.mxu1 %vm333_vm1, %v6449_v43  ;;  %5275 = vmatprep.mubr.msk.f32.mxu0 %vm333_vm1, %v6356_v59 }
  0x97   : > { %5050 = vmatmul.mubr.msk.f32.gmra.mrb[28].mxu1 %vm333_vm1, %v6460_v39  ;;  %5276 = vmatmul.mubr.msk.f32.gmra.mrb[12].mxu0 %vm333_vm1, %v6367_v33  ;;  %v984_v33 = vld [vmem:[%s5915_s25 + $0xa] sm:$0xff] }
  0x98   : > { %5052 = vmatprep.mubr.msk.f32.mxu1 %vm333_vm1, %v6463_v35  ;;  %5278 = vmatprep.mubr.msk.f32.mxu0 %vm333_vm1, %v6370_v29 }
  0x9b   : > { %5053 = vmatmul.mubr.msk.f32.gmra.mrb[30].mxu1 %vm333_vm1, %v6474_v62  ;;  %5279 = vmatmul.mubr.msk.f32.gmra.mrb[14].mxu0 %vm333_vm1, %v6386_v31 }
  0x9c   : > { %5057 = vmatprep.mubr.msk.f32.mxu1 %vm333_vm1, %v983_v3  ;;  %5281 = vmatprep.mubr.msk.f32.mxu0 %vm333_vm1, %v6391_v0  ;;  %v7173_v3 = vld [vmem:[#allocation25_spill] sm:$0xff] }
  0x9f   : > { %5058 = vmatmul.mubr.msk.f32.vlgmr.msra.gmra.mrb[0].mxu1 %vm333_vm1, %v984_v33  ;;  %5282 = vmatmul.mubr.msk.f32.gmra.mrb[16].mxu0 %vm333_vm1, %v6404_v28  ;;  %v4483_v33 = vld [vmem:[%s5915_s25 + $0x198] sm:$0xff] }
  0xa0   : > { %5106 = vmatpush3.msk.msra.mxu1 %vm430_vm0, %v6216_v61  ;;  %5060 = vmatprep.mubr.msk.f32.mxu1 %vm333_vm1, %v6031_v24  ;;  %v6529_v24 = vld [vmem:[%s5915_s25 + $0x180] sm:$0xff] }
  0xa1   : > { %5284 = vmatprep.mubr.msk.f32.mxu0 %vm333_vm1, %v6407_v5  ;;  %5405 = vmatprep.subr.msk.mxu1 %vm430_vm0, %v5891_v1  ;;  %v4484_v61 = vld [vmem:[%s5915_s25 + $0x1a0] sm:$0xff] }
  0xa3   : > { %5061 = vmatmul.mubr.msk.f32.gmra.mrb[2].mxu1 %vm333_vm1, %v6042_v25  ;;  %5285 = vmatmul.mubr.msk.f32.gmra.mrb[18].mxu0 %vm333_vm1, %v6418_v7  ;;  %v6540_v25 = vld [vmem:[%s5915_s25 + $0x188] sm:$0xff] }
  0xa4   : > { %5063 = vmatprep.mubr.msk.f32.mxu1 %vm333_vm1, %v6048_v27  ;;  %5287 = vmatprep.mubr.msk.f32.mxu0 %vm333_vm1, %v6421_v10 }
  0xa7   : > { %5064 = vmatmul.mubr.msk.f32.gmra.mrb[4].mxu1 %vm333_vm1, %v6066_v30  ;;  %5288 = vmatmul.mubr.msk.f32.gmra.mrb[20].mxu0 %vm333_vm1, %v6432_v57 }
  0xa8   : > { %5066 = vmatprep.mubr.msk.f32.mxu1 %vm333_vm1, %v6074_v32  ;;  %5290 = vmatprep.mubr.msk.f32.mxu0 %vm333_vm1, %v6435_v51 }
  0xab   : > { %5067 = vmatmul.mubr.msk.f32.gmra.mrb[6].mxu1 %vm333_vm1, %v6090_v34  ;;  %5291 = vmatmul.mubr.msk.f32.gmra.mrb[22].mxu0 %vm333_vm1, %v6446_v47 }
  0xac   : > { %5069 = vmatprep.mubr.msk.f32.mxu1 %vm333_vm1, %v6096_v36  ;;  %5293 = vmatprep.mubr.msk.f32.mxu0 %vm333_vm1, %v6449_v43 }
  0xaf   : > { %5070 = vmatmul.mubr.msk.f32.gmra.mrb[8].mxu1 %vm333_vm1, %v6110_v38  ;;  %5294 = vmatmul.mubr.msk.f32.gmra.mrb[24].mxu0 %vm333_vm1, %v6460_v39 }
  0xb0   : > { %5072 = vmatprep.mubr.msk.f32.mxu1 %vm333_vm1, %v6116_v40  ;;  %5296 = vmatprep.mubr.msk.f32.mxu0 %vm333_vm1, %v6463_v35 }
  0xb3   : > { %5073 = vmatmul.mubr.msk.f32.gmra.mrb[10].mxu1 %vm333_vm1, %v6130_v42  ;;  %5297 = vmatmul.mubr.msk.f32.gmra.mrb[26].mxu0 %vm333_vm1, %v6474_v62 }
  0xb4   : > { %5075 = vmatprep.mubr.msk.f32.mxu1 %vm333_vm1, %v6136_v44  ;;  %5299 = vmatprep.mubr.msk.f32.mxu0 %vm333_vm1, %v6529_v24 }
  0xb7   : > { %5076 = vmatmul.mubr.msk.f32.gmra.mrb[12].mxu1 %vm333_vm1, %v6150_v46  ;;  %5300 = vmatmul.mubr.msk.f32.gmra.mrb[28].mxu0 %vm333_vm1, %v6540_v25 }
  0xb8   : > { %5078 = vmatprep.mubr.msk.f32.mxu1 %vm333_vm1, %v6156_v48  ;;  %5302 = vmatprep.mubr.msk.f32.mxu0 %vm333_vm1, %v4483_v33  ;;  %v7174_v33 = vld [vmem:[#allocation13_spill] sm:$0xff] }
  0xbb   : > { %5079 = vmatmul.mubr.msk.f32.gmra.mrb[14].mxu1 %vm333_vm1, %v6170_v50  ;;  %5303 = vmatmul.mubr.msk.f32.gmra.mrb[30].mxu0 %vm333_vm1, %v4484_v61  ;;  %v7175_v61 = vld [vmem:[#allocation26_spill] sm:$0xff] }
  0xbc   : > { %5081 = vmatprep.mubr.msk.f32.mxu1 %vm333_vm1, %v6176_v52  ;;  %5307 = vmatprep.mubr.msk.f32.mxu0 %vm333_vm1, %v5924_v8  ;;  %v7157_v8 = vld [vmem:[#allocation30_spill] sm:$0xff] }
  0xbf   : > { %5082 = vmatmul.mubr.msk.f32.gmra.mrb[16].mxu1 %vm333_vm1, %v6190_v54  ;;  %5308 = vmatmul.mubr.msk.f32.vlgmr.msra.gmra.mrb[0].mxu0 %vm333_vm1, %v5939_v11  ;;  %v7158_v11 = vld [vmem:[#allocation5_spill] sm:$0xff] }
  0xc0   : > { %5356 = vmatpush3.msk.msra.mxu0 %vm430_vm0, %v6375_v37  ;;  %5084 = vmatprep.mubr.msk.f32.mxu1 %vm333_vm1, %v6194_v56  ;;  %v7172_v37 = vld [vmem:[#allocation12_spill] sm:$0xff] }
  0xc1   : > { %5310 = vmatprep.mubr.msk.f32.mxu0 %vm333_vm1, %v5945_v12  ;;  %v7159_v12 = vld [vmem:[#allocation18_spill] sm:$0xff] }
  0xc3   : > { %5085 = vmatmul.mubr.msk.f32.gmra.mrb[18].mxu1 %vm333_vm1, %v6205_v58  ;;  %5311 = vmatmul.mubr.msk.f32.gmra.mrb[2].mxu0 %vm333_vm1, %v5958_v13  ;;  %v7160_v13 = vld [vmem:[#allocation6_spill] sm:$0xff] }
  0xc4   : > { %5087 = vmatprep.mubr.msk.f32.mxu1 %vm333_vm1, %v6211_v60  ;;  %5313 = vmatprep.mubr.msk.f32.mxu0 %vm333_vm1, %v5961_v14  ;;  %v7161_v14 = vld [vmem:[#allocation19_spill] sm:$0xff] }
  0xc7   : > { %5088 = vmatmul.mubr.msk.f32.gmra.mrb[20].mxu1 %vm333_vm1, %v6229_v63  ;;  %5314 = vmatmul.mubr.msk.f32.gmra.mrb[4].mxu0 %vm333_vm1, %v5972_v15  ;;  %v7162_v15 = vld [vmem:[#allocation7_spill] sm:$0xff] }
  0xc8   : > { %5090 = vmatprep.mubr.msk.f32.mxu1 %vm333_vm1, %v6237_v2  ;;  %5316 = vmatprep.mubr.msk.f32.mxu0 %vm333_vm1, %v5975_v16  ;;  %v7163_v16 = vld [vmem:[#allocation20_spill] sm:$0xff] }
  0xcb   : > { %5091 = vmatmul.mubr.msk.f32.gmra.mrb[22].mxu1 %vm333_vm1, %v6253_v4  ;;  %5317 = vmatmul.mubr.msk.f32.gmra.mrb[6].mxu0 %vm333_vm1, %v5986_v17  ;;  %v7164_v17 = vld [vmem:[#allocation8_spill] sm:$0xff] }
  0xcc   : > { %5093 = vmatprep.mubr.msk.f32.mxu1 %vm333_vm1, %v6259_v6  ;;  %5319 = vmatprep.mubr.msk.f32.mxu0 %vm333_vm1, %v5989_v18  ;;  %v7165_v18 = vld [vmem:[#allocation21_spill] sm:$0xff] }
  0xcf   : > { %5094 = vmatmul.mubr.msk.f32.gmra.mrb[24].mxu1 %vm333_vm1, %v6273_v9  ;;  %5320 = vmatmul.mubr.msk.f32.gmra.mrb[8].mxu0 %vm333_vm1, %v6000_v19  ;;  %v7166_v19 = vld [vmem:[#allocation9_spill] sm:$0xff] }
  0xd0   : > { %5096 = vmatprep.mubr.msk.f32.mxu1 %vm333_vm1, %v6279_v55  ;;  %5322 = vmatprep.mubr.msk.f32.mxu0 %vm333_vm1, %v6003_v20  ;;  %v7167_v20 = vld [vmem:[#allocation22_spill] sm:$0xff] }
  0xd3   : > { %5097 = vmatmul.mubr.msk.f32.gmra.mrb[26].mxu1 %vm333_vm1, %v6293_v53  ;;  %5323 = vmatmul.mubr.msk.f32.gmra.mrb[10].mxu0 %vm333_vm1, %v6014_v21  ;;  %v7168_v21 = vld [vmem:[#allocation10_spill] sm:$0xff] }
  0xd4   : > { %5099 = vmatprep.mubr.msk.f32.mxu1 %vm333_vm1, %v6299_v49  ;;  %5325 = vmatprep.mubr.msk.f32.mxu0 %vm333_vm1, %v6017_v22  ;;  %v7170_v22 = vld [vmem:[#allocation11_spill] sm:$0xff] }
  0xd7   : > { %5100 = vmatmul.mubr.msk.f32.gmra.mrb[28].mxu1 %vm333_vm1, %v6313_v45  ;;  %5326 = vmatmul.mubr.msk.f32.gmra.mrb[12].mxu0 %vm333_vm1, %v6028_v23  ;;  %v7171_v23 = vld [vmem:[#allocation24_spill] sm:$0xff] }
  0xd8   : > { %5102 = vmatprep.mubr.msk.f32.mxu1 %vm333_vm1, %v6319_v41  ;;  %5328 = vmatprep.mubr.msk.f32.mxu0 %vm333_vm1, %v6045_v26 }
  0xdb   : > { %5103 = vmatmul.mubr.msk.f32.gmra.mrb[30].mxu1 %vm333_vm1, %v7157_v8  ;;  %5329 = vmatmul.mubr.msk.f32.gmra.mrb[14].mxu0 %vm333_vm1, %v7158_v11  ;;  %v7184_v8 = vld [vmem:[#allocation33_spill] sm:$0xff] }
  0xdc   : > { %5107 = vmatprep.mubr.msk.f32.mxu1 %vm333_vm1, %v7159_v12  ;;  %5331 = vmatprep.mubr.msk.f32.mxu0 %vm333_vm1, %v7160_v13  ;;  %v7176_v12 = vld [vmem:[#allocation14_spill] sm:$0xff] }
  0xdf   : > { %5108 = vmatmul.mubr.msk.f32.vlgmr.msra.gmra.mrb[0].mxu1 %vm333_vm1, %v7161_v14  ;;  %5332 = vmatmul.mubr.msk.f32.gmra.mrb[16].mxu0 %vm333_vm1, %v7162_v15  ;;  %v7177_v14 = vld [vmem:[#allocation27_spill] sm:$0xff] }
  0xe0   : > { %5406 = vmatpush3.msk.msra.mxu1 %vm430_vm0, %v5891_v1  ;;  %5110 = vmatprep.mubr.msk.f32.mxu1 %vm333_vm1, %v7163_v16  ;;  %v7169_v1 = vld [vmem:[#allocation23_spill] sm:$0xff] }
  0xe1   : > { %5334 = vmatprep.mubr.msk.f32.mxu0 %vm333_vm1, %v7164_v17  ;;  %v7178_v16 = vld [vmem:[#allocation15_spill] sm:$0xff] }
  0xe3   : > { %5111 = vmatmul.mubr.msk.f32.gmra.mrb[2].mxu1 %vm333_vm1, %v7165_v18  ;;  %5335 = vmatmul.mubr.msk.f32.gmra.mrb[18].mxu0 %vm333_vm1, %v7166_v19  ;;  %v7179_v18 = vld [vmem:[#allocation28_spill] sm:$0xff] }
  0xe4   : > { %5113 = vmatprep.mubr.msk.f32.mxu1 %vm333_vm1, %v7167_v20  ;;  %5337 = vmatprep.mubr.msk.f32.mxu0 %vm333_vm1, %v7168_v21  ;;  %v7180_v20 = vld [vmem:[#allocation16_spill] sm:$0xff] }
  0xe7   : > { %5114 = vmatmul.mubr.msk.f32.gmra.mrb[4].mxu1 %vm333_vm1, %v7169_v1  ;;  %5338 = vmatmul.mubr.msk.f32.gmra.mrb[20].mxu0 %vm333_vm1, %v7170_v22  ;;  %v6667_v1 = vld [vmem:[%s5915_s25 + $0x181] sm:$0xff] }
  0xe8   : > { %5116 = vmatprep.mubr.msk.f32.mxu1 %vm333_vm1, %v7171_v23  ;;  %5340 = vmatprep.mubr.msk.f32.mxu0 %vm333_vm1, %v7172_v37  ;;  %v7181_v23 = vld [vmem:[#allocation29_spill] sm:$0xff] }
  0xeb   : > { %5117 = vmatmul.mubr.msk.f32.gmra.mrb[6].mxu1 %vm333_vm1, %v7173_v3  ;;  %5341 = vmatmul.mubr.msk.f32.gmra.mrb[22].mxu0 %vm333_vm1, %v7174_v33  ;;  %v7182_v3 = vld [vmem:[#allocation17_spill] sm:$0xff] }
  0xec   : > { %5119 = vmatprep.mubr.msk.f32.mxu1 %vm333_vm1, %v7175_v61  ;;  %5343 = vmatprep.mubr.msk.f32.mxu0 %vm333_vm1, %v7176_v12  ;;  %v7183_v61 = vld [vmem:[#allocation31_spill] sm:$0xff] }
  0xef   : > { %5120 = vmatmul.mubr.msk.f32.gmra.mrb[8].mxu1 %vm333_vm1, %v7177_v14  ;;  %5344 = vmatmul.mubr.msk.f32.gmra.mrb[24].mxu0 %vm333_vm1, %v7178_v16  ;;  %v6678_v14 = vld [vmem:[%s5915_s25 + $0x189] sm:$0xff] }
  0xf0   : > { %5122 = vmatprep.mubr.msk.f32.mxu1 %vm333_vm1, %v7179_v18  ;;  %5346 = vmatprep.mubr.msk.f32.mxu0 %vm333_vm1, %v7180_v20  ;;  %v4549_v18 = vld [vmem:[%s5915_s25 + $0x199] sm:$0xff] }
  0xf3   : > { %5123 = vmatmul.mubr.msk.f32.gmra.mrb[10].mxu1 %vm333_vm1, %v7181_v23  ;;  %5347 = vmatmul.mubr.msk.f32.gmra.mrb[26].mxu0 %vm333_vm1, %v7182_v3  ;;  %v4550_v23 = vld [vmem:[%s5915_s25 + $0x1a1] sm:$0xff] }
  0xf4   : > { %5125 = vmatprep.mubr.msk.f32.mxu1 %vm333_vm1, %v7183_v61  ;;  %5349 = vmatprep.mubr.msk.f32.mxu0 %vm333_vm1, %v6667_v1  ;;  %v7185_v3 = vld [vmem:[#allocation35_spill] sm:$0xff] }
  0xf7   : > { %5126 = vmatmul.mubr.msk.f32.gmra.mrb[12].mxu1 %vm333_vm1, %v7184_v8  ;;  %5350 = vmatmul.mubr.msk.f32.gmra.mrb[28].mxu0 %vm333_vm1, %v6678_v14 }
  0xf8   : > { %5128 = vmatprep.mubr.msk.f32.mxu1 %vm333_vm1, %v6356_v59  ;;  %5352 = vmatprep.mubr.msk.f32.mxu0 %vm333_vm1, %v4549_v18 }
  0xfb   : > { %5129 = vmatmul.mubr.msk.f32.gmra.mrb[14].mxu1 %vm333_vm1, %v7185_v3  ;;  %5353 = vmatmul.mubr.msk.f32.gmra.mrb[30].mxu0 %vm333_vm1, %v4550_v23 }
  0xfc   : > { %5131 = vmatprep.mubr.msk.f32.mxu1 %vm333_vm1, %v6370_v29  ;;  %5357 = vmatprep.mubr.msk.f32.mxu0 %vm333_vm1, %v6048_v27  ;;  %v7187_v27 = vld [vmem:[#allocation32_spill] sm:$0xff]  ;;  %v4615_v29 = vld [vmem:[%s5915_s25 + $0x19a] sm:$0xff] }
  0xff   : > { %5132 = vmatmul.mubr.msk.f32.gmra.mrb[16].mxu1 %vm333_vm1, %v6386_v31  ;;  %5358 = vmatmul.mubr.msk.f32.vlgmr.msra.gmra.mrb[0].mxu0 %vm333_vm1, %v6066_v30  ;;  %v7188_v30 = vld [vmem:[#allocation17_spill] sm:$0xff]  ;;  %v7189_v31 = vld [vmem:[#allocation34_spill] sm:$0xff] }
 0x100   : > { %5134 = vmatprep.mubr.msk.f32.mxu1 %vm333_vm1, %v6391_v0  ;;  %5360 = vmatprep.mubr.msk.f32.mxu0 %vm333_vm1, %v6074_v32  ;;  %v4616_v32 = vld [vmem:[%s5915_s25 + $0x1a2] sm:$0xff]  ;;  %s5723_s25 = sshll.u32 %s5799_s21, 4  ;;  %s5724_s25 = int_to_ptr.vmem [resolvable:$false] %s5723_s25 }
 0x101   : > { %s5725_s27 = scalar_lea.vmem %s5724_s25, 256  ;;  %p5726_p1 = scmp.lt.s32.totalorder %s7027_s12, %s5724_s25 }
 0x102   : > { %p5727_p2 = scmp.lt.s32.totalorder %s5725_s27, %s5719_s24 }
 0x103   : > { %5135 = vmatmul.mubr.msk.f32.gmra.mrb[18].mxu1 %vm333_vm1, %v6404_v28  ;;  %5361 = vmatmul.mubr.msk.f32.gmra.mrb[2].mxu0 %vm333_vm1, %v6090_v34 }
 0x104   : > { %5137 = vmatprep.mubr.msk.f32.mxu1 %vm333_vm1, %v6407_v5  ;;  %5363 = vmatprep.mubr.msk.f32.mxu0 %vm333_vm1, %v6096_v36  ;;  %p5728_p3 = por %p5727_p2, %p5726_p1 }
 0x106   : > { %p5729_p5 = pnand %p5728_p3, %p5722_p0 }
 0x107   : > { %5138 = vmatmul.mubr.msk.f32.gmra.mrb[20].mxu1 %vm333_vm1, %v6418_v7  ;;  %5364 = vmatmul.mubr.msk.f32.gmra.mrb[4].mxu0 %vm333_vm1, %v6110_v38 }
 0x108   : > { %5140 = vmatprep.mubr.msk.f32.mxu1 %vm333_vm1, %v6421_v10  ;;  %5366 = vmatprep.mubr.msk.f32.mxu0 %vm333_vm1, %v6116_v40 }
 0x10b   : > { %5141 = vmatmul.mubr.msk.f32.gmra.mrb[22].mxu1 %vm333_vm1, %v6432_v57  ;;  %5367 = vmatmul.mubr.msk.f32.gmra.mrb[6].mxu0 %vm333_vm1, %v6130_v42 }
 0x10c   : > { %5143 = vmatprep.mubr.msk.f32.mxu1 %vm333_vm1, %v6435_v51  ;;  %5369 = vmatprep.mubr.msk.f32.mxu0 %vm333_vm1, %v6136_v44 }
 0x10f   : > { %5144 = vmatmul.mubr.msk.f32.gmra.mrb[24].mxu1 %vm333_vm1, %v6446_v47  ;;  %5370 = vmatmul.mubr.msk.f32.gmra.mrb[8].mxu0 %vm333_vm1, %v6150_v46 }
 0x110   : > { %5146 = vmatprep.mubr.msk.f32.mxu1 %vm333_vm1, %v6449_v43  ;;  %5372 = vmatprep.mubr.msk.f32.mxu0 %vm333_vm1, %v6156_v48 }
 0x113   : > { %5147 = vmatmul.mubr.msk.f32.gmra.mrb[26].mxu1 %vm333_vm1, %v6460_v39  ;;  %5373 = vmatmul.mubr.msk.f32.gmra.mrb[10].mxu0 %vm333_vm1, %v6170_v50 }
 0x114   : > { %5149 = vmatprep.mubr.msk.f32.mxu1 %vm333_vm1, %v6463_v35  ;;  %5375 = vmatprep.mubr.msk.f32.mxu0 %vm333_vm1, %v6176_v52  ;;  %v6839_v52 = vld [vmem:[%s7075_s2] ss:$0 sm:$0xff] }
 0x117   : > { %5150 = vmatmul.mubr.msk.f32.gmra.mrb[28].mxu1 %vm333_vm1, %v6474_v62  ;;  %5376 = vmatmul.mubr.msk.f32.gmra.mrb[12].mxu0 %vm333_vm1, %v6190_v54 }
 0x118   : > { %5152 = vmatprep.mubr.msk.f32.mxu1 %vm333_vm1, %v6529_v24  ;;  %5378 = vmatprep.mubr.msk.f32.mxu0 %vm333_vm1, %v6194_v56  ;;  %v6844_v56 = vld [vmem:[%s7076_s3] ss:$0 sm:$0xff] }
 0x11b   : > { %5153 = vmatmul.mubr.msk.f32.gmra.mrb[30].mxu1 %vm333_vm1, %v6540_v25  ;;  %5379 = vmatmul.mubr.msk.f32.gmra.mrb[14].mxu0 %vm333_vm1, %v6205_v58 }
 0x11c   : > { %5181 = vmatprep.mubr.msk.f32.mxu1 %vm333_vm1, %v6045_v26  ;;  %5381 = vmatprep.mubr.msk.f32.mxu0 %vm333_vm1, %v6211_v60  ;;  %v7186_v26 = vld [vmem:[#allocation30_spill] sm:$0xff] }
 0x11f   : > { %5182 = vmatmul.mubr.msk.f32.vlgmr.msra.gmra.mrb[16].mxu1 %vm333_vm1, %v7158_v11  ;;  %5382 = vmatmul.mubr.msk.f32.gmra.mrb[16].mxu0 %vm333_vm1, %v6229_v63 }
 0x120   : > { %5184 = vmatprep.mubr.msk.f32.mxu1 %vm333_vm1, %v7160_v13  ;;  %5384 = vmatprep.mubr.msk.f32.mxu0 %vm333_vm1, %v6237_v2 }
 0x123   : > { %5185 = vmatmul.mubr.msk.f32.gmra.mrb[18].mxu1 %vm333_vm1, %v7162_v15  ;;  %5385 = vmatmul.mubr.msk.f32.gmra.mrb[18].mxu0 %vm333_vm1, %v6253_v4 }
 0x124   : > { %5187 = vmatprep.mubr.msk.f32.mxu1 %vm333_vm1, %v7164_v17  ;;  %5387 = vmatprep.mubr.msk.f32.mxu0 %vm333_vm1, %v6259_v6 }
 0x127   : > { %5188 = vmatmul.mubr.msk.f32.gmra.mrb[20].mxu1 %vm333_vm1, %v7166_v19  ;;  %5388 = vmatmul.mubr.msk.f32.gmra.mrb[20].mxu0 %vm333_vm1, %v6273_v9 }
 0x128   : > { %5190 = vmatprep.mubr.msk.f32.mxu1 %vm333_vm1, %v7168_v21  ;;  %5390 = vmatprep.mubr.msk.f32.mxu0 %vm333_vm1, %v6279_v55 }
 0x12b   : > { %5191 = vmatmul.mubr.msk.f32.gmra.mrb[22].mxu1 %vm333_vm1, %v7170_v22  ;;  %5391 = vmatmul.mubr.msk.f32.gmra.mrb[22].mxu0 %vm333_vm1, %v6293_v53 }
 0x12c   : > { %5193 = vmatprep.mubr.msk.f32.mxu1 %vm333_vm1, %v7172_v37  ;;  %5393 = vmatprep.mubr.msk.f32.mxu0 %vm333_vm1, %v6299_v49 }
 0x12f   : > { %5194 = vmatmul.mubr.msk.f32.gmra.mrb[24].mxu1 %vm333_vm1, %v7174_v33  ;;  %5394 = vmatmul.mubr.msk.f32.gmra.mrb[24].mxu0 %vm333_vm1, %v6313_v45 }
 0x130   : > { %5196 = vmatprep.mubr.msk.f32.mxu1 %vm333_vm1, %v7176_v12  ;;  %5396 = vmatprep.mubr.msk.f32.mxu0 %vm333_vm1, %v6319_v41 }
 0x133   : > { %5197 = vmatmul.mubr.msk.f32.gmra.mrb[26].mxu1 %vm333_vm1, %v7178_v16  ;;  %5397 = vmatmul.mubr.msk.f32.gmra.mrb[26].mxu0 %vm333_vm1, %v7186_v26 }
 0x134   : > { %5199 = vmatprep.mubr.msk.f32.mxu1 %vm333_vm1, %v7180_v20  ;;  %5399 = vmatprep.mubr.msk.f32.mxu0 %vm333_vm1, %v7187_v27 }
 0x137   : > { %5200 = vmatmul.mubr.msk.f32.gmra.mrb[28].mxu1 %vm333_vm1, %v7188_v30  ;;  %5400 = vmatmul.mubr.msk.f32.gmra.mrb[28].mxu0 %vm333_vm1, %v7189_v31 }
 0x138   : > { %5202 = vmatprep.mubr.msk.f32.mxu1 %vm333_vm1, %v6667_v1  ;;  %5402 = vmatprep.mubr.msk.f32.mxu0 %vm333_vm1, %v4615_v29 }
 0x13b   : > { %5203 = vmatmul.mubr.msk.f32.gmra.mrb[30].mxu1 %vm333_vm1, %v6678_v14  ;;  %5403 = vmatmul.mubr.msk.f32.gmra.mrb[30].mxu0 %vm333_vm1, %v4616_v32 }
 0x1b2   : > { %v5109_v34 = vpop.f32.mrb[0].mxu1 }
 0x1b3   : > { %v1575_v35 = vpop.f32.mrb[1].mxu1 }
 0x1b6   : > { %v5112_v36 = vpop.f32.mrb[2].mxu1 }
 0x1b7   : > { %v1585_v38 = vpop.f32.mrb[3].mxu1 }
 0x1ba   : > { %v5115_v39 = vpop.f32.mrb[4].mxu1 }
 0x1bb   : > { %v1595_v40 = vpop.f32.mrb[5].mxu1 }
 0x1be   : > { %v5118_v41 = vpop.f32.mrb[6].mxu1 }
 0x1bf   : > { %v1605_v42 = vpop.f32.mrb[7].mxu1 }
 0x1c2   : > { %v6820_v43 = vpop.f32.mrb[8].mxu1 }
 0x1c3   : > { %v6822_v44 = vpop.f32.mrb[9].mxu1 }
 0x1c6   : > { %v6824_v45 = vpop.f32.mrb[10].mxu1 }
 0x1c7   : > { %v6826_v46 = vpop.f32.mrb[11].mxu1 }
 0x1ca   : > { %v6828_v47 = vpop.f32.mrb[12].mxu1 }
 0x1cb   : > { %v6830_v48 = vpop.f32.mrb[13].mxu1 }
 0x1ce   : > { %v6832_v49 = vpop.f32.mrb[14].mxu1 }
 0x1cf   : > { %v6834_v50 = vpop.f32.mrb[15].mxu1 }
 0x1d2   : > { %v5359_v51 = vpop.f32.mrb[0].mxu0 }
 0x1d3   : > { %v5407_v53 = vadd.f32 %v5359_v51, %v5109_v34  ;;  %v3528_v54 = vpop.f32.mrb[1].mxu0 }
 0x1d4   : > { %v5408_v58 = vadd.f32 %v3528_v54, %v1575_v35 }
 0x1d5   : > { %v3727_v59 = vmul.f32 %v5407_v53, %v6839_v52 }
 0x1d6   : > { %v3726_v60 = vmul.f32 %v5408_v58, %v6839_v52  ;;  %v5362_v62 = vpop.f32.mrb[2].mxu0 }
 0x1d7   : > { %v3766_v63 = vadd.f32 %v6844_v56, %v3727_v59  ;;  %v5409_v0 = vadd.f32 %v5362_v62, %v5112_v36  ;;  %v3538_v2 = vpop.f32.mrb[3].mxu0 }
 0x1d8   : > { %v3765_v4 = vadd.f32 %v6844_v56, %v3726_v60  ;;  %v5410_v5 = vadd.f32 %v3538_v2, %v1585_v38 }
 0x1d9   : > { %vm3798_vm2 = vcmp.ge.f32.partialorder %v3766_v63, 0.0  ;;  %v3830_v6 = vmul.f32 0.2, %v3766_v63  ;;  %v3729_v7 = vmul.f32 %v5409_v0, %v6839_v52 }
 0x1da   : > { %vm3797_vm4 = vcmp.ge.f32.partialorder %v3765_v4, 0.0  ;;  %v3829_v9 = vmul.f32 0.2, %v3765_v4  ;;  %v3728_v10 = vmul.f32 %v5410_v5, %v6839_v52  ;;  %v5365_v55 = vpop.f32.mrb[4].mxu0 }
 0x1db   : > { %v3862_v57 = vsel %vm3798_vm2, %v3766_v63, %v3830_v6  ;;  %v3768_v28 = vadd.f32 %v6844_v56, %v3729_v7  ;;  %v5411_v24 = vadd.f32 %v5365_v55, %v5115_v39  ;;  %v3548_v25 = vpop.f32.mrb[5].mxu0 }
 0x1dc   : > { %3895 = vst.msk [vmem:[%s6854_s8 + $0x8] sm:$0xff] %vm3893_vm3, %v3862_v57  ;;  %v3927_v8 = vsel %vm3893_vm3, %v3862_v57, 0.0  ;;  %v3861_v11 = vsel %vm3797_vm4, %v3765_v4, %v3829_v9  ;;  %v3767_v13 = vadd.f32 %v6844_v56, %v3728_v10  ;;  %v5412_v15 = vadd.f32 %v3548_v25, %v1595_v40 }
 0x1dd   : > { %3894 = vst.msk [vmem:[%s6854_s8] sm:$0xff] %vm3893_vm3, %v3861_v11  ;;  %v3926_v17 = vsel %vm3893_vm3, %v3861_v11, 0.0  ;;  %vm3800_vm5 = vcmp.ge.f32.partialorder %v3768_v28, 0.0  ;;  %v3832_v19 = vmul.f32 0.2, %v3768_v28  ;;  %v3731_v21 = vmul.f32 %v5411_v24, %v6839_v52 }
 0x1de   : > { %v3928_v22 = vadd.f32 %v3927_v8, %v3926_v17  ;;  %vm3799_vm6 = vcmp.ge.f32.partialorder %v3767_v13, 0.0  ;;  %v3831_v37 = vmul.f32 0.2, %v3767_v13  ;;  %v3730_v33 = vmul.f32 %v5412_v15, %v6839_v52  ;;  %v5368_v12 = vpop.f32.mrb[6].mxu0 }
 0x1df   : > { %v3864_v16 = vsel %vm3800_vm5, %v3768_v28, %v3832_v19  ;;  %v3770_v20 = vadd.f32 %v6844_v56, %v3731_v21  ;;  %v5413_v1 = vadd.f32 %v5368_v12, %v5118_v41  ;;  %v3558_v3 = vpop.f32.mrb[7].mxu0 }
 0x1e0   : > { %3897 = vst.msk [vmem:[%s6854_s8 + $0x18] sm:$0xff] %vm3893_vm3, %v3864_v16  ;;  %v3863_v61 = vsel %vm3799_vm6, %v3767_v13, %v3831_v37  ;;  %v3769_v14 = vadd.f32 %v6844_v56, %v3730_v33  ;;  %v5414_v18 = vadd.f32 %v3558_v3, %v1605_v42  ;;  %v3931_v34 = vsel %vm3893_vm3, %v3864_v16, 0.0 }
 0x1e1   : > { %3896 = vst.msk [vmem:[%s6854_s8 + $0x10] sm:$0xff] %vm3893_vm3, %v3863_v61  ;;  %v3929_v23 = vsel %vm3893_vm3, %v3863_v61, 0.0  ;;  %vm3802_vm7 = vcmp.ge.f32.partialorder %v3770_v20, 0.0  ;;  %v3834_v26 = vmul.f32 0.2, %v3770_v20  ;;  %v3733_v27 = vmul.f32 %v5413_v1, %v6839_v52 }
 0x1e2   : > { %v3930_v29 = vadd.f32 %v3929_v23, %v3928_v22  ;;  %vm3801_vm8 = vcmp.ge.f32.partialorder %v3769_v14, 0.0  ;;  %v3833_v30 = vmul.f32 0.2, %v3769_v14  ;;  %v3732_v31 = vmul.f32 %v5414_v18, %v6839_v52  ;;  %v5371_v32 = vpop.f32.mrb[8].mxu0 }
 0x1e3   : > { %v3866_v35 = vsel %vm3802_vm7, %v3770_v20, %v3834_v26  ;;  %v3772_v36 = vadd.f32 %v6844_v56, %v3733_v27  ;;  %v5415_v38 = vadd.f32 %v5371_v32, %v6820_v43  ;;  %v3568_v39 = vpop.f32.mrb[9].mxu0 }
 0x1e4   : > { %3899 = vst.msk [vmem:[%s6854_s8 + $0x28] sm:$0xff] %vm3893_vm3, %v3866_v35  ;;  %v3865_v40 = vsel %vm3801_vm8, %v3769_v14, %v3833_v30  ;;  %v3932_v41 = vadd.f32 %v3931_v34, %v3930_v29  ;;  %v3771_v42 = vadd.f32 %v6844_v56, %v3732_v31  ;;  %v5416_v59 = vadd.f32 %v3568_v39, %v6822_v44 }
 0x1e5   : > { %3898 = vst.msk [vmem:[%s6854_s8 + $0x20] sm:$0xff] %vm3893_vm3, %v3865_v40  ;;  %v3933_v51 = vsel %vm3893_vm3, %v3865_v40, 0.0  ;;  %vm3804_vm9 = vcmp.ge.f32.partialorder %v3772_v36, 0.0  ;;  %v3836_v53 = vmul.f32 0.2, %v3772_v36  ;;  %v3735_v54 = vmul.f32 %v5415_v38, %v6839_v52 }
 0x1e6   : > { %v3934_v58 = vadd.f32 %v3933_v51, %v3932_v41  ;;  %vm3803_vm10 = vcmp.ge.f32.partialorder %v3771_v42, 0.0  ;;  %v3835_v43 = vmul.f32 0.2, %v3771_v42  ;;  %v5374_v60 = vpop.f32.mrb[10].mxu0  ;;  %v3935_v62 = vsel %vm3893_vm3, %v3866_v35, 0.0 }
 0x1e7   : > { %v3868_v63 = vsel %vm3804_vm9, %v3772_v36, %v3836_v53  ;;  %v3774_v0 = vadd.f32 %v6844_v56, %v3735_v54  ;;  %v5417_v2 = vadd.f32 %v5374_v60, %v6824_v45  ;;  %v3578_v4 = vpop.f32.mrb[11].mxu0  ;;  %v3734_v7 = vmul.f32 %v5416_v59, %v6839_v52 }
 0x1e8   : > { %3901 = vst.msk [vmem:[%s6854_s8 + $0x38] sm:$0xff] %vm3893_vm3, %v3868_v63  ;;  %v3867_v5 = vsel %vm3803_vm10, %v3771_v42, %v3835_v43  ;;  %v3936_v6 = vadd.f32 %v3935_v62, %v3934_v58  ;;  %v5418_v45 = vadd.f32 %v3578_v4, %v6826_v46  ;;  %v3939_v24 = vsel %vm3893_vm3, %v3868_v63, 0.0 }
 0x1e9   : > { %3900 = vst.msk [vmem:[%s6854_s8 + $0x30] sm:$0xff] %vm3893_vm3, %v3867_v5  ;;  %v3937_v44 = vsel %vm3893_vm3, %v3867_v5, 0.0  ;;  %vm3806_vm11 = vcmp.ge.f32.partialorder %v3774_v0, 0.0  ;;  %v3838_v9 = vmul.f32 0.2, %v3774_v0  ;;  %v3737_v10 = vmul.f32 %v5417_v2, %v6839_v52 }
 0x1ea   : > { %v3938_v55 = vadd.f32 %v3937_v44, %v3936_v6  ;;  %v3773_v57 = vadd.f32 %v6844_v56, %v3734_v7  ;;  %v5377_v28 = vpop.f32.mrb[12].mxu0  ;;  %v3736_v46 = vmul.f32 %v5418_v45, %v6839_v52 }
 0x1eb   : > { %v3870_v25 = vsel %vm3806_vm11, %v3774_v0, %v3838_v9  ;;  %v3776_v8 = vadd.f32 %v6844_v56, %v3737_v10  ;;  %v5419_v11 = vadd.f32 %v5377_v28, %v6828_v47  ;;  %v3588_v13 = vpop.f32.mrb[13].mxu0 }
 0x1ec   : > { %3903 = vst.msk [vmem:[%s6854_s8 + $0x48] sm:$0xff] %vm3893_vm3, %v3870_v25  ;;  %vm3805_vm12 = vcmp.ge.f32.partialorder %v3773_v57, 0.0  ;;  %v3837_v15 = vmul.f32 0.2, %v3773_v57  ;;  %v3940_v17 = vadd.f32 %v3939_v24, %v3938_v55  ;;  %v5420_v37 = vadd.f32 %v3588_v13, %v6830_v48 }
 0x1ed   : > { %vm3808_vm13 = vcmp.ge.f32.partialorder %v3776_v8, 0.0  ;;  %v3840_v19 = vmul.f32 0.2, %v3776_v8  ;;  %v3739_v21 = vmul.f32 %v5419_v11, %v6839_v52  ;;  %v3775_v16 = vadd.f32 %v6844_v56, %v3736_v46 }
 0x1ee   : > { %v3869_v22 = vsel %vm3805_vm12, %v3773_v57, %v3837_v15  ;;  %v5380_v33 = vpop.f32.mrb[14].mxu0  ;;  %v3943_v3 = vsel %vm3893_vm3, %v3870_v25, 0.0  ;;  %v3738_v14 = vmul.f32 %v5420_v37, %v6839_v52 }
 0x1ef   : > { %3902 = vst.msk [vmem:[%s6854_s8 + $0x40] sm:$0xff] %vm3893_vm3, %v3869_v22  ;;  %v3941_v47 = vsel %vm3893_vm3, %v3869_v22, 0.0  ;;  %v3872_v12 = vsel %vm3808_vm13, %v3776_v8, %v3840_v19  ;;  %v3778_v20 = vadd.f32 %v6844_v56, %v3739_v21  ;;  %v3598_v1 = vpop.f32.mrb[15].mxu0  ;;  %v5421_v48 = vadd.f32 %v5380_v33, %v6832_v49 }
 0x1f0   : > { %v3942_v61 = vadd.f32 %v3941_v47, %v3940_v17  ;;  %3905 = vst.msk [vmem:[%s6854_s8 + $0x58] sm:$0xff] %vm3893_vm3, %v3872_v12  ;;  %vm3807_vm14 = vcmp.ge.f32.partialorder %v3775_v16, 0.0  ;;  %v3839_v18 = vmul.f32 0.2, %v3775_v16  ;;  %v3777_v27 = vadd.f32 %v6844_v56, %v3738_v14 }
 0x1f1   : > { %vm3810_vm15 = vcmp.ge.f32.partialorder %v3778_v20, 0.0  ;;  %v3842_v23 = vmul.f32 0.2, %v3778_v20  ;;  %v3741_v29 = vmul.f32 %v5421_v48, %v6839_v52  ;;  %v5422_v30 = vadd.f32 %v3598_v1, %v6834_v50 }
 0x1f2   : > { %v3944_v26 = vadd.f32 %v3943_v3, %v3942_v61  ;;  %v5183_v31 = vpop.f32.mrb[16].mxu1  ;;  %v5383_v32 = vpop.f32.mrb[16].mxu0  ;;  %v3871_v34 = vsel %vm3807_vm14, %v3775_v16, %v3839_v18  ;;  %vm3809_vm0 = vcmp.ge.f32.partialorder %v3777_v27, 0.0  ;;  %v3841_v40 = vmul.f32 0.2, %v3777_v27 }
 0x1f3   : > { %v3874_v35 = vsel %vm3810_vm15, %v3778_v20, %v3842_v23  ;;  %v5423_v36 = vadd.f32 %v5383_v32, %v5183_v31  ;;  %v2045_v38 = vpop.f32.mrb[17].mxu1  ;;  %v3608_v49 = vpop.f32.mrb[17].mxu0  ;;  %3904 = vst.msk [vmem:[%s6854_s8 + $0x50] sm:$0xff] %vm3893_vm3, %v3871_v34  ;;  %v3945_v39 = vsel %vm3893_vm3, %v3871_v34, 0.0  ;;  %v3780_v42 = vadd.f32 %v6844_v56, %v3741_v29 }
 0x1f4   : > { %3907 = vst.msk [vmem:[%s6854_s8 + $0x68] sm:$0xff] %vm3893_vm3, %v3874_v35  ;;  %v3946_v41 = vadd.f32 %v3945_v39, %v3944_v26  ;;  %v3740_v50 = vmul.f32 %v5422_v30, %v6839_v52  ;;  %v3947_v53 = vsel %vm3893_vm3, %v3872_v12, 0.0  ;;  %v3873_v54 = vsel %vm3809_vm0, %v3777_v27, %v3841_v40 }
 0x1f5   : > { %v3743_v51 = vmul.f32 %v5423_v36, %v6839_v52  ;;  %v5424_v58 = vadd.f32 %v3608_v49, %v2045_v38  ;;  %3906 = vst.msk [vmem:[%s6854_s8 + $0x60] sm:$0xff] %vm3893_vm3, %v3873_v54  ;;  %v3949_v62 = vsel %vm3893_vm3, %v3873_v54, 0.0  ;;  %vm3812_vm1 = vcmp.ge.f32.partialorder %v3780_v42, 0.0 }
 0x1f6   : > { %v5186_v43 = vpop.f32.mrb[18].mxu1  ;;  %v5386_v59 = vpop.f32.mrb[18].mxu0  ;;  %v3948_v60 = vadd.f32 %v3947_v53, %v3946_v41  ;;  %v3844_v63 = vmul.f32 0.2, %v3780_v42  ;;  %v3779_v4 = vadd.f32 %v6844_v56, %v3740_v50  ;;  %v3951_v55 = vsel %vm3893_vm3, %v3874_v35, 0.0 }
 0x1f7   : > { %v2055_v0 = vpop.f32.mrb[19].mxu1  ;;  %v3618_v2 = vpop.f32.mrb[19].mxu0  ;;  %v3782_v5 = vadd.f32 %v6844_v56, %v3743_v51  ;;  %v3742_v6 = vmul.f32 %v5424_v58, %v6839_v52  ;;  %v5425_v7 = vadd.f32 %v5386_v59, %v5186_v43 }
 0x1f8   : > { %v3950_v44 = vadd.f32 %v3949_v62, %v3948_v60  ;;  %v3876_v9 = vsel %vm3812_vm1, %v3780_v42, %v3844_v63  ;;  %v5426_v10 = vadd.f32 %v3618_v2, %v2055_v0  ;;  %vm3811_vm2 = vcmp.ge.f32.partialorder %v3779_v4, 0.0 }
 0x1f9   : > { %3909 = vst.msk [vmem:[%s6854_s8 + $0x78] sm:$0xff] %vm3893_vm3, %v3876_v9  ;;  %v3843_v57 = vmul.f32 0.2, %v3779_v4  ;;  %vm3814_vm4 = vcmp.ge.f32.partialorder %v3782_v5, 0.0  ;;  %v3846_v24 = vmul.f32 0.2, %v3782_v5  ;;  %v3781_v25 = vadd.f32 %v6844_v56, %v3742_v6 }
 0x1fa   : > { %v5189_v45 = vpop.f32.mrb[20].mxu1  ;;  %v3952_v28 = vadd.f32 %v3951_v55, %v3950_v44  ;;  %v3745_v8 = vmul.f32 %v5425_v7, %v6839_v52  ;;  %v5389_v11 = vpop.f32.mrb[20].mxu0  ;;  %v3744_v17 = vmul.f32 %v5426_v10, %v6839_v52  ;;  %v3955_v33 = vsel %vm3893_vm3, %v3876_v9, 0.0 }
 0x1fb   : > { %v2065_v13 = vpop.f32.mrb[21].mxu1  ;;  %v3875_v15 = vsel %vm3811_vm2, %v3779_v4, %v3843_v57  ;;  %v5427_v19 = vadd.f32 %v5389_v11, %v5189_v45  ;;  %v3628_v46 = vpop.f32.mrb[21].mxu0  ;;  %v3878_v22 = vsel %vm3814_vm4, %v3782_v5, %v3846_v24  ;;  %vm3813_vm5 = vcmp.ge.f32.partialorder %v3781_v25, 0.0 }
 0x1fc   : > { %3908 = vst.msk [vmem:[%s6854_s8 + $0x70] sm:$0xff] %vm3893_vm3, %v3875_v15  ;;  %v3953_v21 = vsel %vm3893_vm3, %v3875_v15, 0.0  ;;  %v3845_v37 = vmul.f32 0.2, %v3781_v25  ;;  %3911 = vst.msk [vmem:[%s6854_s8 + $0x88] sm:$0xff] %vm3893_vm3, %v3878_v22  ;;  %v3784_v12 = vadd.f32 %v6844_v56, %v3745_v8  ;;  %v3783_v16 = vadd.f32 %v6844_v56, %v3744_v17 }
 0x1fd   : > { %v3954_v47 = vadd.f32 %v3953_v21, %v3952_v28  ;;  %v3747_v61 = vmul.f32 %v5427_v19, %v6839_v52  ;;  %v5428_v14 = vadd.f32 %v3628_v46, %v2065_v13  ;;  %v3959_v40 = vsel %vm3893_vm3, %v3878_v22, 0.0 }
 0x1fe   : > { %v5192_v20 = vpop.f32.mrb[22].mxu1  ;;  %v5392_v1 = vpop.f32.mrb[22].mxu0  ;;  %v3877_v3 = vsel %vm3813_vm5, %v3781_v25, %v3845_v37  ;;  %vm3816_vm6 = vcmp.ge.f32.partialorder %v3784_v12, 0.0  ;;  %v3848_v29 = vmul.f32 0.2, %v3784_v12  ;;  %vm3815_vm7 = vcmp.ge.f32.partialorder %v3783_v16, 0.0 }
 0x1ff   : > { %v5429_v48 = vadd.f32 %v5392_v1, %v5192_v20  ;;  %v2075_v18 = vpop.f32.mrb[23].mxu1  ;;  %v3638_v23 = vpop.f32.mrb[23].mxu0  ;;  %3910 = vst.msk [vmem:[%s6854_s8 + $0x80] sm:$0xff] %vm3893_vm3, %v3877_v3  ;;  %v3956_v26 = vadd.f32 %v3955_v33, %v3954_v47  ;;  %v3957_v27 = vsel %vm3893_vm3, %v3877_v3, 0.0  ;;  %v3847_v30 = vmul.f32 0.2, %v3783_v16 }
 0x200   : > { %v3786_v31 = vadd.f32 %v6844_v56, %v3747_v61  ;;  %v3746_v32 = vmul.f32 %v5428_v14, %v6839_v52  ;;  %v3880_v35 = vsel %vm3816_vm6, %v3784_v12, %v3848_v29  ;;  %v5430_v38 = vadd.f32 %v3638_v23, %v2075_v18 }
 0x201   : > { %v3958_v34 = vadd.f32 %v3957_v27, %v3956_v26  ;;  %v3749_v36 = vmul.f32 %v5429_v48, %v6839_v52  ;;  %3913 = vst.msk [vmem:[%s6854_s8 + $0x98] sm:$0xff] %vm3893_vm3, %v3880_v35  ;;  %v3879_v41 = vsel %vm3815_vm7, %v3783_v16, %v3847_v30  ;;  %v3963_v0 = vsel %vm3893_vm3, %v3880_v35, 0.0 }
 0x202   : > { %v5195_v49 = vpop.f32.mrb[24].mxu1  ;;  %v5395_v39 = vpop.f32.mrb[24].mxu0  ;;  %vm3818_vm8 = vcmp.ge.f32.partialorder %v3786_v31, 0.0  ;;  %v3850_v42 = vmul.f32 0.2, %v3786_v31  ;;  %3912 = vst.msk [vmem:[%s6854_s8 + $0x90] sm:$0xff] %vm3893_vm3, %v3879_v41  ;;  %v3785_v58 = vadd.f32 %v6844_v56, %v3746_v32  ;;  %v3748_v60 = vmul.f32 %v5430_v38, %v6839_v52 }
 0x203   : > { %v2085_v50 = vpop.f32.mrb[25].mxu1  ;;  %v3648_v51 = vpop.f32.mrb[25].mxu0  ;;  %v3960_v53 = vadd.f32 %v3959_v40, %v3958_v34  ;;  %v3961_v54 = vsel %vm3893_vm3, %v3879_v41, 0.0  ;;  %v3788_v43 = vadd.f32 %v6844_v56, %v3749_v36  ;;  %v5431_v62 = vadd.f32 %v5395_v39, %v5195_v49 }
 0x204   : > { %v3882_v59 = vsel %vm3818_vm8, %v3786_v31, %v3850_v42  ;;  %v5432_v63 = vadd.f32 %v3648_v51, %v2085_v50  ;;  %vm3817_vm9 = vcmp.ge.f32.partialorder %v3785_v58, 0.0  ;;  %v3849_v4 = vmul.f32 0.2, %v3785_v58 }
 0x205   : > { %v3962_v2 = vadd.f32 %v3961_v54, %v3960_v53  ;;  %3915 = vst.msk [vmem:[%s6854_s8 + $0xa8] sm:$0xff] %vm3893_vm3, %v3882_v59  ;;  %vm3820_vm10 = vcmp.ge.f32.partialorder %v3788_v43, 0.0  ;;  %v3852_v7 = vmul.f32 0.2, %v3788_v43  ;;  %v3787_v44 = vadd.f32 %v6844_v56, %v3748_v60 }
 0x206   : > { %v5198_v5 = vpop.f32.mrb[26].mxu1  ;;  %v5398_v6 = vpop.f32.mrb[26].mxu0  ;;  %v3751_v9 = vmul.f32 %v5431_v62, %v6839_v52  ;;  %v3881_v57 = vsel %vm3817_vm9, %v3785_v58, %v3849_v4  ;;  %v3750_v28 = vmul.f32 %v5432_v63, %v6839_v52  ;;  %v3967_v13 = vsel %vm3893_vm3, %v3882_v59, 0.0 }
 0x207   : > { %v2095_v10 = vpop.f32.mrb[27].mxu1  ;;  %v3658_v55 = vpop.f32.mrb[27].mxu0  ;;  %v3964_v45 = vadd.f32 %v3963_v0, %v3962_v2  ;;  %v5433_v24 = vadd.f32 %v5398_v6, %v5198_v5  ;;  %3914 = vst.msk [vmem:[%s6854_s8 + $0xa0] sm:$0xff] %vm3893_vm3, %v3881_v57  ;;  %v3965_v25 = vsel %vm3893_vm3, %v3881_v57, 0.0  ;;  %v3884_v8 = vsel %vm3820_vm10, %v3788_v43, %v3852_v7 }
 0x208   : > { %vm3819_vm11 = vcmp.ge.f32.partialorder %v3787_v44, 0.0  ;;  %v3851_v11 = vmul.f32 0.2, %v3787_v44  ;;  %3917 = vst.msk [vmem:[%s6854_s8 + $0xb8] sm:$0xff] %vm3893_vm3, %v3884_v8  ;;  %v3790_v17 = vadd.f32 %v6844_v56, %v3751_v9  ;;  %v3789_v19 = vadd.f32 %v6844_v56, %v3750_v28 }
 0x209   : > { %v3966_v15 = vadd.f32 %v3965_v25, %v3964_v45  ;;  %v3753_v37 = vmul.f32 %v5433_v24, %v6839_v52  ;;  %v5434_v33 = vadd.f32 %v3658_v55, %v2095_v10  ;;  %v3971_v31 = vsel %vm3893_vm3, %v3884_v8, 0.0 }
 0x20a   : > { %v5201_v46 = vpop.f32.mrb[28].mxu1  ;;  %v5401_v21 = vpop.f32.mrb[28].mxu0  ;;  %v3883_v22 = vsel %vm3819_vm11, %v3787_v44, %v3851_v11  ;;  %vm3822_vm12 = vcmp.ge.f32.partialorder %v3790_v17, 0.0  ;;  %v3854_v3 = vmul.f32 0.2, %v3790_v17  ;;  %vm3821_vm13 = vcmp.ge.f32.partialorder %v3789_v19, 0.0 }
 0x20b   : > { %v5435_v47 = vadd.f32 %v5401_v21, %v5201_v46  ;;  %v2105_v12 = vpop.f32.mrb[29].mxu1  ;;  %v3668_v16 = vpop.f32.mrb[29].mxu0  ;;  %3916 = vst.msk [vmem:[%s6854_s8 + $0xb0] sm:$0xff] %vm3893_vm3, %v3883_v22  ;;  %v3968_v20 = vadd.f32 %v3967_v13, %v3966_v15  ;;  %v3969_v1 = vsel %vm3893_vm3, %v3883_v22, 0.0  ;;  %v3853_v61 = vmul.f32 0.2, %v3789_v19 }
 0x20c   : > { %v3792_v14 = vadd.f32 %v6844_v56, %v3753_v37  ;;  %v3752_v48 = vmul.f32 %v5434_v33, %v6839_v52  ;;  %v3886_v23 = vsel %vm3822_vm12, %v3790_v17, %v3854_v3  ;;  %v5436_v27 = vadd.f32 %v3668_v16, %v2105_v12 }
 0x20d   : > { %v3970_v18 = vadd.f32 %v3969_v1, %v3968_v20  ;;  %v3755_v26 = vmul.f32 %v5435_v47, %v6839_v52  ;;  %3919 = vst.msk [vmem:[%s6854_s8 + $0xc8] sm:$0xff] %vm3893_vm3, %v3886_v23  ;;  %v3885_v32 = vsel %vm3821_vm13, %v3789_v19, %v3853_v61  ;;  %v3975_v53 = vsel %vm3893_vm3, %v3886_v23, 0.0 }
 0x20e   : > { %v5204_v29 = vpop.f32.mrb[30].mxu1  ;;  %v5404_v30 = vpop.f32.mrb[30].mxu0  ;;  %vm3824_vm14 = vcmp.ge.f32.partialorder %v3792_v14, 0.0  ;;  %v3856_v34 = vmul.f32 0.2, %v3792_v14  ;;  %3918 = vst.msk [vmem:[%s6854_s8 + $0xc0] sm:$0xff] %vm3893_vm3, %v3885_v32  ;;  %v3791_v39 = vadd.f32 %v6844_v56, %v3752_v48  ;;  %v3754_v42 = vmul.f32 %v5436_v27, %v6839_v52 }
 0x20f   : > { %v2115_v35 = vpop.f32.mrb[31].mxu1  ;;  %v3678_v36 = vpop.f32.mrb[31].mxu0  ;;  %v3972_v38 = vadd.f32 %v3971_v31, %v3970_v18  ;;  %v3973_v49 = vsel %vm3893_vm3, %v3885_v32, 0.0  ;;  %v3794_v40 = vadd.f32 %v6844_v56, %v3755_v26  ;;  %v5437_v50 = vadd.f32 %v5404_v30, %v5204_v29 }
 0x210   : > { %v3888_v41 = vsel %vm3824_vm14, %v3792_v14, %v3856_v34  ;;  %v5438_v51 = vadd.f32 %v3678_v36, %v2115_v35  ;;  %vm3823_vm15 = vcmp.ge.f32.partialorder %v3791_v39, 0.0  ;;  %v3855_v58 = vmul.f32 0.2, %v3791_v39 }
 0x211   : > { %v3974_v54 = vadd.f32 %v3973_v49, %v3972_v38  ;;  %3921 = vst.msk [vmem:[%s6854_s8 + $0xd8] sm:$0xff] %vm3893_vm3, %v3888_v41  ;;  %vm3826_vm0 = vcmp.ge.f32.partialorder %v3794_v40, 0.0  ;;  %v3858_v43 = vmul.f32 0.2, %v3794_v40  ;;  %v3793_v59 = vadd.f32 %v6844_v56, %v3754_v42 }
 0x212   : > { %v3757_v60 = vmul.f32 %v5437_v50, %v6839_v52  ;;  %v3887_v62 = vsel %vm3823_vm15, %v3791_v39, %v3855_v58  ;;  %v3756_v0 = vmul.f32 %v5438_v51, %v6839_v52  ;;  %v3979_v9 = vsel %vm3893_vm3, %v3888_v41, 0.0 }
 0x213   : > { %v3976_v63 = vadd.f32 %v3975_v53, %v3974_v54  ;;  %3920 = vst.msk [vmem:[%s6854_s8 + $0xd0] sm:$0xff] %vm3893_vm3, %v3887_v62  ;;  %v3977_v2 = vsel %vm3893_vm3, %v3887_v62, 0.0  ;;  %v3890_v4 = vsel %vm3826_vm0, %v3794_v40, %v3858_v43  ;;  %vm3825_vm1 = vcmp.ge.f32.partialorder %v3793_v59, 0.0 }
 0x214   : > { %v3857_v5 = vmul.f32 0.2, %v3793_v59  ;;  %3923 = vst.msk [vmem:[%s6854_s8 + $0xe8] sm:$0xff] %vm3893_vm3, %v3890_v4  ;;  %v3796_v7 = vadd.f32 %v6844_v56, %v3757_v60  ;;  %v3795_v44 = vadd.f32 %v6844_v56, %v3756_v0  ;;  %v3983_v25 = vsel %vm3893_vm3, %v3890_v4, 0.0 }
 0x215   : > { %v3978_v6 = vadd.f32 %v3977_v2, %v3976_v63 }
 0x216   : > { %v3889_v10 = vsel %vm3825_vm1, %v3793_v59, %v3857_v5  ;;  %vm3828_vm2 = vcmp.ge.f32.partialorder %v3796_v7, 0.0  ;;  %v3860_v57 = vmul.f32 0.2, %v3796_v7  ;;  %vm3827_vm4 = vcmp.ge.f32.partialorder %v3795_v44, 0.0 }
 0x217   : > { %3922 = vst.msk [vmem:[%s6854_s8 + $0xe0] sm:$0xff] %vm3893_vm3, %v3889_v10  ;;  %v3980_v52 = vadd.f32 %v3979_v9, %v3978_v6  ;;  %v3981_v55 = vsel %vm3893_vm3, %v3889_v10, 0.0  ;;  %v3859_v45 = vmul.f32 0.2, %v3795_v44 }
 0x218   : > { %v3892_v24 = vsel %vm3828_vm2, %v3796_v7, %v3860_v57 }
 0x219   : > { %v3982_v28 = vadd.f32 %v3981_v55, %v3980_v52  ;;  %3925 = vst.msk [vmem:[%s6854_s8 + $0xf8] sm:$0xff] %vm3893_vm3, %v3892_v24  ;;  %v3891_v56 = vsel %vm3827_vm4, %v3795_v44, %v3859_v45  ;;  %v3987_v15 = vsel %vm3893_vm3, %v3892_v24, 0.0 }
 0x21a   : > { %3924 = vst.msk [vmem:[%s6854_s8 + $0xf0] sm:$0xff] %vm3893_vm3, %v3891_v56  ;;  %v3985_v11 = vsel %vm3893_vm3, %v3891_v56, 0.0 }
 0x21b   : > { %v3984_v8 = vadd.f32 %v3983_v25, %v3982_v28 }
 0x21d   : > { %v3986_v13 = vadd.f32 %v3985_v11, %v3984_v8 }
 0x21f   : > { %v3988_v17 = vadd.f32 %v3987_v15, %v3986_v13 }
 0x221   : > { %v3989_v19 = vrot.slane %v3988_v17, 4 }
 0x223   : > { %v3990_v46 = vadd.f32 %v3989_v19, %v3988_v17 }
 0x225   : > { %v3991_v21 = vrot.slane %v3990_v46, 2 }
 0x227   : > { %v3992_v22 = vadd.f32 %v3991_v21, %v3990_v46 }
 0x229   : > { %v3993_v37 = vrot.slane %v3992_v22, 1 }
 0x22b   : > { %v3994_v33 = vadd.f32 %v3993_v37, %v3992_v22 }
 0x22d   : > { %3995 = vst.msk [vmem:[%s246_s11] sm:$0xff] %vm3893_vm3, %v3994_v33 }
 0x22e   : > { %5732 = shalt.err (!%p5729_p5)
}
 0x22f   : > { %s5733_s29 = scalar_lea.hbm %s7025_s16, 128  ;;  %s5737_s15 = scalar_lea.hbm %s7078_s5, 256 }
 0x230   : > { %p5734_p6 = scmp.ne.s32.totalorder %s7025_s16, %s5733_s29  ;;  %p5738_p10 = scmp.lt.u32.totalorder %s7025_s16, %s7078_s5 }
 0x231   : > { %p5739_p11 = scmp.lt.u32.totalorder %s5737_s15, %s5733_s29  ;;  %p5741_p13 = scmp.lt.u32.totalorder %s5733_s29, %s7025_s16 }
 0x232   : > { %p5735_p7 = pnand %p5734_p6, %p5870_p4 }
 0x233   : > { %p5740_p12 = por %p5739_p11, %p5738_p10 }
 0x234   : > { %p5736_p9 = pneg %p5735_p7 }
 0x235   : > { %p5742_p0 = por %p5741_p13, %p5740_p12 }
 0x237   : > { %p5743_p1 = pnand %p5742_p0, %p5736_p9 }
 0x239   : > { %5746 = shalt.err (!%p5743_p1)
}
 0x23a   : > { %5664 = dma.vmem_to_hbm [thread:$0]  (%p5870_p4), %s7027_s12, 128, %s7025_s16, %s4007_s17  }
 0x23b PF: > { %p5670_p2 = scmp.ge.s32.totalorder %s5797_s23, 2  ;;  %s4050_s11 = sand.u32 1, %s5777_s18  }
 0x23c   : > { %s4051_s13 = scalar_lea.sflag [#allocation3], %s4050_s11 }
 0x23d   : > { %p5667_p3 = pnand %p5670_p2, %p5877_p8 }
 0x23f   : > { %5772 = dma.done.wait (!%p5667_p3), %s4051_s13, 128  }
 0x240   : > { %5774 = vsyncadd (!%p5667_p3), %s4051_s13, 4294967168  ;;  %s19_s23 = sadd.s32 1, %s5797_s23   ;;  %s7190_s18 = smov %s5781_s19 }
 0x241   : > { %p16_p5 = scmp.ge.s32.totalorder %s19_s23, 4   ;;  %s7191_s19 = smov %s5785_s20 }
 0x242   : > { %s7192_s20 = smov %s5883_s6  ;;  %s7193_s21 = smov %s5793_s22 }
 0x243   : > { %s7194_s22 = smov %s7196_s26  ;;  %18 = sbr.rel (!%p16_p5) target bundleno = 4 (0x4), region = 94 }
 0x24a   :  { %4056 = vsyncpa [#allocation3], 1 }
 0x24b   :  { %4058 = vsyncpa [#allocation3 + $0x1], 1 }

// kernel: discriminator_forward.7
= control target key start
LH: loop header
LB: loop body
LE: loop exit
PB: predicated region body
PF: predicated region fallthrough
CT: control target
= control target key end

     0   :  { %s5652_s15 = smov 0   ;;  %s5654_s16 = smov 0   ;;  %s6759_s0 = inlined_call_operand.vmem [shape: f32[2,1,18,18,8], index: 0, kind: input, shape index: {}]   ;;  %s6760_s1 = inlined_call_operand.vmem [shape: f32[9,8,16], index: 1, kind: input, shape index: {}]   ;;  %s6761_s2 = inlined_call_operand.vmem [shape: f32[2,16,16,16], index: 2, kind: output, shape index: {0}]   ;;  %s6762_s3 = inlined_call_operand.vmem [shape: f32[2,1,8,16], index: 3, kind: output, shape index: {1}]   ;;  %s6763_s4 = inlined_call_operand.vmem [shape: f32[2,1,8,16], index: 4, kind: output, shape index: {2}]  }
   0x1   :  { %s5656_s17 = smov 0  }
   0x2 LB: > { %s27_s18 = sadd.s32 1, %s5621_s16  ;;  %p4076_p0 = scmp.ge.s32.totalorder %s5625_s17, 1  ;;  %s5625_s17 = sphi %s5656_s17, %s15_s17   ;;  %s5621_s16 = sphi %s5654_s16, %s6874_s16   ;;  %s5617_s15 = sphi %s5652_s15, %s6873_s15  }
   0x3   : > { %p29_p1 = scmp.ge.s32.totalorder %s27_s18, 2  ;;  %p185_p2 = scmp.lt.s32.totalorder %s5625_s17, 3 }
   0x5   : > { %s6876_s18 = smov (%p29_p1, %s27_s18), 0  ;;  %p186_p3 = pnand %p4076_p0, %p185_p2 }
   0x7   : > { %189 = sbr.rel (%p186_p3) target bundleno = 541 (0x21d), region = 28 }
   0xe   : > { %v4082_v0 = vld [vmem:[%s6760_s1 + $0x8] sm:$0xff]  ;;  %v5676_v1 = vld [vmem:[%s6760_s1 + $0x20] sm:$0xff]  ;;  %p230_p4 = scmp.lt.s32.totalorder %s5617_s15, 1  ;;  %vm330_vm0 = vcmask 64512   ;;  %v4407_v9 = vld [vmem:[%s6760_s1 + $0x30] sm:$0xff]  ;;  %vm3688_vm1 = vcmask 130048  }
   0xf   : > { %v295_v2 = vld [vmem:[%s6760_s1] sm:$0xff]  ;;  %4870 = vmatprep.subr.mxu1 %v4082_v0  ;;  %5070 = vmatprep.subr.mxu0 %v5676_v1  ;;  %v4342_v3 = vld [vmem:[%s6760_s1 + $0x28] sm:$0xff]  ;;  %v5711_v10 = vld [vmem:[%s6760_s1 + $0x10] sm:$0xff] }
  0x10   : > { %4871 = vmatpush3.msra.mxu1 %v4082_v0  ;;  %5071 = vmatpush3.msra.mxu0 %v5676_v1  ;;  %s6878_s15 = smov (!%p230_p4, %s5617_s15), 1  ;;  %v5826_v28 = vld [vmem:[%s6760_s1 + $0x38] sm:$0xff] }
  0x11   : > { %4920 = vmatprep.subr.mxu1 %v295_v2  ;;  %5120 = vmatprep.subr.mxu0 %v4342_v3  ;;  %s5578_s27 = smul.u32 432, %s6878_s15  ;;  %v5987_v61 = vld [vmem:[%s6760_s1 + $0x18] sm:$0xff]  ;;  %s4572_s19 = sshll.u32 %s6878_s15, 8 }
  0x12   : > { %s6603_s22 = scalar_lea.vmem %s6761_s2, %s4572_s19  ;;  %s4080_s23 = sshll.u32 %s6878_s15, 3 }
  0x13   : > { %s5692_s30 = scalar_lea.vmem %s6759_s0, %s5578_s27  ;;  %s252_s26 = scalar_lea.vmem %s6762_s3, %s4080_s23 }
  0x14   : > { %v296_v4 = vld [vmem:[%s5692_s30 + $0x1] sm:$0xff]  ;;  %v4245_v5 = vld [vmem:[%s5692_s30 + $0x19] sm:$0xff]  ;;  %v297_v6 = vld [vmem:[%s5692_s30 + $0x9] sm:$0xff]  ;;  %s259_s29 = scalar_lea.vmem %s6763_s4, %s4080_s23 }
  0x15   : > { %4872 = vmatprep.mubr.msk.f32.mxu1 %vm330_vm0, %v296_v4  ;;  %5072 = vmatprep.mubr.msk.f32.mxu0 %vm330_vm0, %v4245_v5  ;;  %v4246_v7 = vld [vmem:[%s5692_s30 + $0x21] sm:$0xff]  ;;  %v5701_v8 = vld [vmem:[%s5692_s30 + $0x31] sm:$0xff]  ;;  %v5714_v11 = vld [vmem:[%s5692_s30 + $0x39] sm:$0xff] }
  0x16   : > { %4873 = vmatmul.mubr.msk.f32.vlgmr.msra.gmra.mrb[0].mxu1 %vm330_vm0, %v297_v6  ;;  %5073 = vmatmul.mubr.msk.f32.vlgmr.msra.gmra.mrb[0].mxu0 %vm330_vm0, %v4246_v7  ;;  %v5720_v12 = vld [vmem:[%s5692_s30 + $0x49] sm:$0xff]  ;;  %v5731_v13 = vld [vmem:[%s5692_s30 + $0x51] sm:$0xff]  ;;  %v5734_v14 = vld [vmem:[%s5692_s30 + $0x61] sm:$0xff] }
  0x17   : > { %4921 = vmatpush3.msra.mxu1 %v295_v2  ;;  %5121 = vmatpush3.msra.mxu0 %v4342_v3  ;;  %v5745_v15 = vld [vmem:[%s5692_s30 + $0x69] sm:$0xff]  ;;  %v5748_v16 = vld [vmem:[%s5692_s30 + $0x79] sm:$0xff]  ;;  %v5759_v17 = vld [vmem:[%s5692_s30 + $0x81] sm:$0xff] }
  0x18   : > { %4875 = vmatprep.mubr.msk.f32.mxu1 %vm330_vm0, %v4245_v5  ;;  %5075 = vmatprep.mubr.msk.f32.mxu0 %vm330_vm0, %v5701_v8  ;;  %v5762_v18 = vld [vmem:[%s5692_s30 + $0x91] sm:$0xff]  ;;  %v5773_v19 = vld [vmem:[%s5692_s30 + $0x99] sm:$0xff]  ;;  %v5776_v20 = vld [vmem:[%s5692_s30 + $0xa9] sm:$0xff] }
  0x19   : > { %5170 = vmatprep.subr.mxu0 %v4407_v9  ;;  %4970 = vmatprep.subr.mxu1 %v5711_v10  ;;  %v5787_v21 = vld [vmem:[%s5692_s30 + $0xb1] sm:$0xff]  ;;  %v5790_v22 = vld [vmem:[%s5692_s30 + $0xc1] sm:$0xff]  ;;  %v5801_v23 = vld [vmem:[%s5692_s30 + $0xc9] sm:$0xff] }
  0x1a   : > { %4876 = vmatmul.mubr.msk.f32.gmra.mrb[2].mxu1 %vm330_vm0, %v4246_v7  ;;  %5076 = vmatmul.mubr.msk.f32.gmra.mrb[2].mxu0 %vm330_vm0, %v5714_v11  ;;  %v5804_v24 = vld [vmem:[%s5692_s30 + $0x1a] sm:$0xff]  ;;  %v5815_v25 = vld [vmem:[%s5692_s30 + $0x22] sm:$0xff]  ;;  %v5821_v27 = vld [vmem:[%s5692_s30 + $0x32] sm:$0xff] }
  0x1b   : > { %4878 = vmatprep.mubr.msk.f32.mxu1 %vm330_vm0, %v5701_v8  ;;  %5078 = vmatprep.mubr.msk.f32.mxu0 %vm330_vm0, %v5720_v12  ;;  %v5818_v26 = vld [vmem:[%s5692_s30 + $0xd9] sm:$0xff]  ;;  %v5835_v29 = vld [vmem:[%s5692_s30 + $0xe1] sm:$0xff]  ;;  %v5843_v31 = vld [vmem:[%s5692_s30 + $0xf1] sm:$0xff] }
  0x1c   : > { %6809 = vst [vmem:[#allocation2_spill] sm:$0xff] %v5835_v29  ;;  %v5838_v30 = vld [vmem:[%s5692_s30 + $0x3a] sm:$0xff]  ;;  %6810 = vst [vmem:[#allocation3_spill] sm:$0xff] %v5843_v31  ;;  %v5846_v32 = vld [vmem:[%s5692_s30 + $0x4a] sm:$0xff] }
  0x1d   : > { %v5858_v33 = vld [vmem:[%s5692_s30 + $0xf9] sm:$0xff]  ;;  %v5864_v35 = vld [vmem:[%s5692_s30 + $0x109] sm:$0xff]  ;;  %v5878_v37 = vld [vmem:[%s5692_s30 + $0x111] sm:$0xff] }
  0x1e   : > { %4879 = vmatmul.mubr.msk.f32.gmra.mrb[4].mxu1 %vm330_vm0, %v5714_v11  ;;  %5079 = vmatmul.mubr.msk.f32.gmra.mrb[4].mxu0 %vm330_vm0, %v5731_v13  ;;  %6811 = vst [vmem:[#allocation4_spill] sm:$0xff] %v5858_v33  ;;  %v5861_v34 = vld [vmem:[%s5692_s30 + $0x52] sm:$0xff]  ;;  %6812 = vst [vmem:[#allocation5_spill] sm:$0xff] %v5864_v35  ;;  %v5867_v36 = vld [vmem:[%s5692_s30 + $0x62] sm:$0xff] }
  0x1f   : > { %4881 = vmatprep.mubr.msk.f32.mxu1 %vm330_vm0, %v5720_v12  ;;  %5081 = vmatprep.mubr.msk.f32.mxu0 %vm330_vm0, %v5734_v14  ;;  %6813 = vst [vmem:[#allocation6_spill] sm:$0xff] %v5878_v37  ;;  %v5881_v38 = vld [vmem:[%s5692_s30 + $0x6a] sm:$0xff]  ;;  %v5884_v39 = vld [vmem:[%s5692_s30 + $0x121] sm:$0xff]  ;;  %v5904_v43 = vld [vmem:[%s5692_s30 + $0x139] sm:$0xff] }
  0x20   : > { %6814 = vst [vmem:[#allocation7_spill] sm:$0xff] %v5884_v39  ;;  %v5887_v40 = vld [vmem:[%s5692_s30 + $0x7a] sm:$0xff]  ;;  %v5898_v41 = vld [vmem:[%s5692_s30 + $0x129] sm:$0xff]  ;;  %6816 = vst [vmem:[#allocation9_spill] sm:$0xff] %v5904_v43 }
  0x21   : > { %6815 = vst [vmem:[#allocation8_spill] sm:$0xff] %v5898_v41  ;;  %v5901_v42 = vld [vmem:[%s5692_s30 + $0x82] sm:$0xff]  ;;  %v5907_v44 = vld [vmem:[%s5692_s30 + $0x92] sm:$0xff]  ;;  %v5921_v46 = vld [vmem:[%s5692_s30 + $0x9a] sm:$0xff] }
  0x22   : > { %4882 = vmatmul.mubr.msk.f32.gmra.mrb[6].mxu1 %vm330_vm0, %v5731_v13  ;;  %5082 = vmatmul.mubr.msk.f32.gmra.mrb[6].mxu0 %vm330_vm0, %v5745_v15  ;;  %v5918_v45 = vld [vmem:[%s5692_s30 + $0x141] sm:$0xff]  ;;  %v5924_v47 = vld [vmem:[%s5692_s30 + $0x151] sm:$0xff]  ;;  %v5938_v49 = vld [vmem:[%s5692_s30 + $0x159] sm:$0xff] }
  0x23   : > { %4884 = vmatprep.mubr.msk.f32.mxu1 %vm330_vm0, %v5734_v14  ;;  %5084 = vmatprep.mubr.msk.f32.mxu0 %vm330_vm0, %v5748_v16  ;;  %6817 = vst [vmem:[#allocation10_spill] sm:$0xff] %v5918_v45  ;;  %6818 = vst [vmem:[#allocation11_spill] sm:$0xff] %v5924_v47  ;;  %v5927_v48 = vld [vmem:[%s5692_s30 + $0xaa] sm:$0xff]  ;;  %v5941_v50 = vld [vmem:[%s5692_s30 + $0xb2] sm:$0xff] }
  0x24   : > { %6819 = vst [vmem:[#allocation12_spill] sm:$0xff] %v5938_v49  ;;  %v5944_v51 = vld [vmem:[%s5692_s30 + $0x169] sm:$0xff]  ;;  %v5958_v53 = vld [vmem:[%s5692_s30 + $0x171] sm:$0xff]  ;;  %v263_v55 = vld [vmem:[%s5692_s30] sm:$0xff] }
  0x25   : > { %6820 = vst [vmem:[#allocation13_spill] sm:$0xff] %v5944_v51  ;;  %v5947_v52 = vld [vmem:[%s5692_s30 + $0xc2] sm:$0xff]  ;;  %6821 = vst [vmem:[#allocation14_spill] sm:$0xff] %v5958_v53  ;;  %v5961_v54 = vld [vmem:[%s5692_s30 + $0xca] sm:$0xff] }
  0x26   : > { %4885 = vmatmul.mubr.msk.f32.gmra.mrb[8].mxu1 %vm330_vm0, %v5745_v15  ;;  %5085 = vmatmul.mubr.msk.f32.gmra.mrb[8].mxu0 %vm330_vm0, %v5759_v17  ;;  %v5965_v56 = vld [vmem:[%s5692_s30 + $0xda] sm:$0xff]  ;;  %v264_v57 = vld [vmem:[%s5692_s30 + $0x8] sm:$0xff]  ;;  %v5982_v60 = vld [vmem:[%s5692_s30 + $0xf2] sm:$0xff] }
  0x27   : > { %4887 = vmatprep.mubr.msk.f32.mxu1 %vm330_vm0, %v5748_v16  ;;  %5087 = vmatprep.mubr.msk.f32.mxu0 %vm330_vm0, %v5762_v18  ;;  %v5976_v58 = vld [vmem:[%s5692_s30 + $0xe2] sm:$0xff]  ;;  %v5979_v59 = vld [vmem:[%s5692_s30 + $0x18] sm:$0xff]  ;;  %v6004_v0 = vld [vmem:[%s5692_s30 + $0x30] sm:$0xff] }
  0x28   : > { %6822 = vst [vmem:[#allocation15_spill] sm:$0xff] %v5979_v59  ;;  %v5996_v62 = vld [vmem:[%s5692_s30 + $0x20] sm:$0xff]  ;;  %6824 = vst [vmem:[#allocation17_spill] sm:$0xff] %v6004_v0  ;;  %v6007_v2 = vld [vmem:[%s5692_s30 + $0x10a] sm:$0xff] }
  0x29   : > { %6823 = vst [vmem:[#allocation16_spill] sm:$0xff] %v5996_v62  ;;  %v5999_v63 = vld [vmem:[%s5692_s30 + $0xfa] sm:$0xff]  ;;  %v6022_v4 = vld [vmem:[%s5692_s30 + $0x112] sm:$0xff]  ;;  %v6025_v5 = vld [vmem:[%s5692_s30 + $0x48] sm:$0xff] }
  0x2a   : > { %4888 = vmatmul.mubr.msk.f32.gmra.mrb[10].mxu1 %vm330_vm0, %v5759_v17  ;;  %5088 = vmatmul.mubr.msk.f32.gmra.mrb[10].mxu0 %vm330_vm0, %v5773_v19  ;;  %v6019_v3 = vld [vmem:[%s5692_s30 + $0x38] sm:$0xff]  ;;  %6826 = vst [vmem:[#allocation19_spill] sm:$0xff] %v6025_v5  ;;  %v6028_v6 = vld [vmem:[%s5692_s30 + $0x122] sm:$0xff]  ;;  %v6039_v7 = vld [vmem:[%s5692_s30 + $0x50] sm:$0xff] }
  0x2b   : > { %4890 = vmatprep.mubr.msk.f32.mxu1 %vm330_vm0, %v5762_v18  ;;  %5090 = vmatprep.mubr.msk.f32.mxu0 %vm330_vm0, %v5776_v20  ;;  %6825 = vst [vmem:[#allocation18_spill] sm:$0xff] %v6019_v3  ;;  %6827 = vst [vmem:[#allocation20_spill] sm:$0xff] %v6039_v7 }
  0x2e   : > { %4891 = vmatmul.mubr.msk.f32.gmra.mrb[12].mxu1 %vm330_vm0, %v5773_v19  ;;  %5091 = vmatmul.mubr.msk.f32.gmra.mrb[12].mxu0 %vm330_vm0, %v5787_v21 }
  0x2f   : > { %4893 = vmatprep.mubr.msk.f32.mxu1 %vm330_vm0, %v5776_v20  ;;  %5093 = vmatprep.mubr.msk.f32.mxu0 %vm330_vm0, %v5790_v22 }
  0x32   : > { %4894 = vmatmul.mubr.msk.f32.gmra.mrb[14].mxu1 %vm330_vm0, %v5787_v21  ;;  %5094 = vmatmul.mubr.msk.f32.gmra.mrb[14].mxu0 %vm330_vm0, %v5801_v23 }
  0x33   : > { %4896 = vmatprep.mubr.msk.f32.mxu1 %vm330_vm0, %v5790_v22  ;;  %5122 = vmatprep.mubr.msk.f32.mxu0 %vm330_vm0, %v5804_v24 }
  0x36   : > { %4897 = vmatmul.mubr.msk.f32.gmra.mrb[16].mxu1 %vm330_vm0, %v5801_v23  ;;  %5123 = vmatmul.mubr.msk.f32.vlgmr.msra.gmra.mrb[0].mxu0 %vm330_vm0, %v5815_v25 }
  0x37   : > { %5171 = vmatpush3.msra.mxu0 %v4407_v9  ;;  %4899 = vmatprep.mubr.msk.f32.mxu1 %vm330_vm0, %v5818_v26  ;;  %v6042_v9 = vld [vmem:[%s5692_s30 + $0x12a] sm:$0xff] }
  0x38   : > { %5125 = vmatprep.mubr.msk.f32.mxu0 %vm330_vm0, %v5821_v27  ;;  %5220 = vmatprep.subr.mxu0 %v5826_v28 }
  0x3a   : > { %4900 = vmatmul.mubr.msk.f32.gmra.mrb[18].mxu1 %vm330_vm0, %v5835_v29  ;;  %5126 = vmatmul.mubr.msk.f32.gmra.mrb[2].mxu0 %vm330_vm0, %v5838_v30  ;;  %v6139_v29 = vld [vmem:[%s5692_s30 + $0xd8] sm:$0xff] }
  0x3b   : > { %4902 = vmatprep.mubr.msk.f32.mxu1 %vm330_vm0, %v5843_v31  ;;  %5128 = vmatprep.mubr.msk.f32.mxu0 %vm330_vm0, %v5846_v32  ;;  %v6122_v31 = vld [vmem:[%s5692_s30 + $0x18a] sm:$0xff] }
  0x3c   : > { %6838 = vst [vmem:[#allocation31_spill] sm:$0xff] %v6122_v31 }
  0x3e   : > { %4903 = vmatmul.mubr.msk.f32.gmra.mrb[20].mxu1 %vm330_vm0, %v5858_v33  ;;  %5129 = vmatmul.mubr.msk.f32.gmra.mrb[4].mxu0 %vm330_vm0, %v5861_v34  ;;  %v6108_v33 = vld [vmem:[%s5692_s30 + $0x182] sm:$0xff] }
  0x3f   : > { %4905 = vmatprep.mubr.msk.f32.mxu1 %vm330_vm0, %v5864_v35  ;;  %5131 = vmatprep.mubr.msk.f32.mxu0 %vm330_vm0, %v5867_v36  ;;  %v6105_v35 = vld [vmem:[%s5692_s30 + $0xa8] sm:$0xff]  ;;  %6836 = vst [vmem:[#allocation29_spill] sm:$0xff] %v6108_v33 }
  0x40   : > { %6835 = vst [vmem:[#allocation28_spill] sm:$0xff] %v6105_v35 }
  0x42   : > { %4906 = vmatmul.mubr.msk.f32.gmra.mrb[22].mxu1 %vm330_vm0, %v5878_v37  ;;  %5132 = vmatmul.mubr.msk.f32.gmra.mrb[6].mxu0 %vm330_vm0, %v5881_v38  ;;  %v6102_v37 = vld [vmem:[%s5692_s30 + $0x172] sm:$0xff] }
  0x43   : > { %4908 = vmatprep.mubr.msk.f32.mxu1 %vm330_vm0, %v5884_v39  ;;  %5134 = vmatprep.mubr.msk.f32.mxu0 %vm330_vm0, %v5887_v40  ;;  %v6099_v39 = vld [vmem:[%s5692_s30 + $0x98] sm:$0xff]  ;;  %6834 = vst [vmem:[#allocation27_spill] sm:$0xff] %v6102_v37 }
  0x44   : > { %6833 = vst [vmem:[#allocation26_spill] sm:$0xff] %v6099_v39 }
  0x46   : > { %4909 = vmatmul.mubr.msk.f32.gmra.mrb[24].mxu1 %vm330_vm0, %v5898_v41  ;;  %5135 = vmatmul.mubr.msk.f32.gmra.mrb[8].mxu0 %vm330_vm0, %v5901_v42  ;;  %v6088_v41 = vld [vmem:[%s5692_s30 + $0x16a] sm:$0xff] }
  0x47   : > { %4911 = vmatprep.mubr.msk.f32.mxu1 %vm330_vm0, %v5904_v43  ;;  %5137 = vmatprep.mubr.msk.f32.mxu0 %vm330_vm0, %v5907_v44  ;;  %v6085_v43 = vld [vmem:[%s5692_s30 + $0x90] sm:$0xff] }
  0x48   : > { %6832 = vst [vmem:[#allocation25_spill] sm:$0xff] %v6085_v43 }
  0x4a   : > { %4912 = vmatmul.mubr.msk.f32.gmra.mrb[26].mxu1 %vm330_vm0, %v5918_v45  ;;  %5138 = vmatmul.mubr.msk.f32.gmra.mrb[10].mxu0 %vm330_vm0, %v5921_v46  ;;  %v6082_v45 = vld [vmem:[%s5692_s30 + $0x15a] sm:$0xff] }
  0x4b   : > { %4914 = vmatprep.mubr.msk.f32.mxu1 %vm330_vm0, %v5924_v47  ;;  %5140 = vmatprep.mubr.msk.f32.mxu0 %vm330_vm0, %v5927_v48  ;;  %v6079_v47 = vld [vmem:[%s5692_s30 + $0x80] sm:$0xff] }
  0x4c   : > { %6831 = vst [vmem:[#allocation24_spill] sm:$0xff] %v6079_v47 }
  0x4e   : > { %4915 = vmatmul.mubr.msk.f32.gmra.mrb[28].mxu1 %vm330_vm0, %v5938_v49  ;;  %5141 = vmatmul.mubr.msk.f32.gmra.mrb[12].mxu0 %vm330_vm0, %v5941_v50  ;;  %v6068_v49 = vld [vmem:[%s5692_s30 + $0x152] sm:$0xff] }
  0x4f   : > { %4917 = vmatprep.mubr.msk.f32.mxu1 %vm330_vm0, %v5944_v51  ;;  %5143 = vmatprep.mubr.msk.f32.mxu0 %vm330_vm0, %v5947_v52  ;;  %v6065_v51 = vld [vmem:[%s5692_s30 + $0x78] sm:$0xff] }
  0x50   : > { %6830 = vst [vmem:[#allocation23_spill] sm:$0xff] %v6065_v51 }
  0x52   : > { %4918 = vmatmul.mubr.msk.f32.gmra.mrb[30].mxu1 %vm330_vm0, %v5958_v53  ;;  %5144 = vmatmul.mubr.msk.f32.gmra.mrb[14].mxu0 %vm330_vm0, %v5961_v54  ;;  %v6062_v53 = vld [vmem:[%s5692_s30 + $0x142] sm:$0xff] }
  0x53   : > { %4922 = vmatprep.mubr.msk.f32.mxu1 %vm330_vm0, %v263_v55  ;;  %5146 = vmatprep.mubr.msk.f32.mxu0 %vm330_vm0, %v5965_v56  ;;  %v6048_v55 = vld [vmem:[%s5692_s30 + $0x13a] sm:$0xff] }
  0x56   : > { %4923 = vmatmul.mubr.msk.f32.vlgmr.msra.gmra.mrb[0].mxu1 %vm330_vm0, %v264_v57  ;;  %5147 = vmatmul.mubr.msk.f32.gmra.mrb[16].mxu0 %vm330_vm0, %v5976_v58  ;;  %v6059_v57 = vld [vmem:[%s5692_s30 + $0x68] sm:$0xff] }
  0x57   : > { %4971 = vmatpush3.msra.mxu1 %v5711_v10  ;;  %4925 = vmatprep.mubr.msk.f32.mxu1 %vm330_vm0, %v5979_v59  ;;  %v6045_v10 = vld [vmem:[%s5692_s30 + $0x60] sm:$0xff]  ;;  %6829 = vst [vmem:[#allocation22_spill] sm:$0xff] %v6059_v57 }
  0x58   : > { %5149 = vmatprep.mubr.msk.f32.mxu0 %vm330_vm0, %v5982_v60  ;;  %5020 = vmatprep.subr.mxu1 %v5987_v61  ;;  %6828 = vst [vmem:[#allocation21_spill] sm:$0xff] %v6045_v10  ;;  %v6125_v59 = vld [vmem:[%s5692_s30 + $0xc0] sm:$0xff] }
  0x5a   : > { %4926 = vmatmul.mubr.msk.f32.gmra.mrb[2].mxu1 %vm330_vm0, %v5996_v62  ;;  %5150 = vmatmul.mubr.msk.f32.gmra.mrb[18].mxu0 %vm330_vm0, %v5999_v63  ;;  %v6119_v62 = vld [vmem:[%s5692_s30 + $0xb0] sm:$0xff] }
  0x5b   : > { %4928 = vmatprep.mubr.msk.f32.mxu1 %vm330_vm0, %v6004_v0  ;;  %5152 = vmatprep.mubr.msk.f32.mxu0 %vm330_vm0, %v6007_v2  ;;  %6837 = vst [vmem:[#allocation30_spill] sm:$0xff] %v6119_v62 }
  0x5e   : > { %4929 = vmatmul.mubr.msk.f32.gmra.mrb[4].mxu1 %vm330_vm0, %v6019_v3  ;;  %5153 = vmatmul.mubr.msk.f32.gmra.mrb[20].mxu0 %vm330_vm0, %v6022_v4 }
  0x5f   : > { %4931 = vmatprep.mubr.msk.f32.mxu1 %vm330_vm0, %v6025_v5  ;;  %5155 = vmatprep.mubr.msk.f32.mxu0 %vm330_vm0, %v6028_v6 }
  0x62   : > { %4932 = vmatmul.mubr.msk.f32.gmra.mrb[6].mxu1 %vm330_vm0, %v6039_v7  ;;  %5156 = vmatmul.mubr.msk.f32.gmra.mrb[22].mxu0 %vm330_vm0, %v6042_v9 }
  0x63   : > { %4934 = vmatprep.mubr.msk.f32.mxu1 %vm330_vm0, %v6045_v10  ;;  %5158 = vmatprep.mubr.msk.f32.mxu0 %vm330_vm0, %v6048_v55 }
  0x66   : > { %4935 = vmatmul.mubr.msk.f32.gmra.mrb[8].mxu1 %vm330_vm0, %v6059_v57  ;;  %5159 = vmatmul.mubr.msk.f32.gmra.mrb[24].mxu0 %vm330_vm0, %v6062_v53 }
  0x67   : > { %4937 = vmatprep.mubr.msk.f32.mxu1 %vm330_vm0, %v6065_v51  ;;  %5161 = vmatprep.mubr.msk.f32.mxu0 %vm330_vm0, %v6068_v49 }
  0x6a   : > { %4938 = vmatmul.mubr.msk.f32.gmra.mrb[10].mxu1 %vm330_vm0, %v6079_v47  ;;  %5162 = vmatmul.mubr.msk.f32.gmra.mrb[26].mxu0 %vm330_vm0, %v6082_v45 }
  0x6b   : > { %4940 = vmatprep.mubr.msk.f32.mxu1 %vm330_vm0, %v6085_v43  ;;  %5164 = vmatprep.mubr.msk.f32.mxu0 %vm330_vm0, %v6088_v41 }
  0x6e   : > { %4941 = vmatmul.mubr.msk.f32.gmra.mrb[12].mxu1 %vm330_vm0, %v6099_v39  ;;  %5165 = vmatmul.mubr.msk.f32.gmra.mrb[28].mxu0 %vm330_vm0, %v6102_v37  ;;  %v6144_v37 = vld [vmem:[%s6760_s1 + $0x40] sm:$0xff] }
  0x6f   : > { %4943 = vmatprep.mubr.msk.f32.mxu1 %vm330_vm0, %v6105_v35  ;;  %5167 = vmatprep.mubr.msk.f32.mxu0 %vm330_vm0, %v6108_v33  ;;  %v6136_v33 = vld [vmem:[%s5692_s30 + $0xc8] sm:$0xff] }
  0x70   : > { %6839 = vst [vmem:[#allocation32_spill] sm:$0xff] %v6136_v33 }
  0x72   : > { %4944 = vmatmul.mubr.msk.f32.gmra.mrb[14].mxu1 %vm330_vm0, %v6119_v62  ;;  %5168 = vmatmul.mubr.msk.f32.gmra.mrb[30].mxu0 %vm330_vm0, %v6122_v31  ;;  %v6154_v31 = vld [vmem:[%s5692_s30 + $0xe0] sm:$0xff] }
  0x73   : > { %4946 = vmatprep.mubr.msk.f32.mxu1 %vm330_vm0, %v6125_v59  ;;  %5172 = vmatprep.mubr.msk.f32.mxu0 %vm330_vm0, %v6004_v0  ;;  %v6159_v0 = vld [vmem:[%s5692_s30 + $0xf0] sm:$0xff] }
  0x76   : > { %4947 = vmatmul.mubr.msk.f32.gmra.mrb[16].mxu1 %vm330_vm0, %v6136_v33  ;;  %5173 = vmatmul.mubr.msk.f32.vlgmr.msra.gmra.mrb[0].mxu0 %vm330_vm0, %v6019_v3  ;;  %v973_v3 = vld [vmem:[%s5692_s30 + $0x2] sm:$0xff] }
  0x77   : > { %5221 = vmatpush3.msra.mxu0 %v5826_v28  ;;  %4949 = vmatprep.mubr.msk.f32.mxu1 %vm330_vm0, %v6139_v29  ;;  %v6171_v28 = vld [vmem:[%s5692_s30 + $0xf8] sm:$0xff] }
  0x78   : > { %5175 = vmatprep.mubr.msk.f32.mxu0 %vm330_vm0, %v6025_v5  ;;  %5270 = vmatprep.subr.mxu0 %v6144_v37  ;;  %v6174_v5 = vld [vmem:[%s5692_s30 + $0x108] sm:$0xff] }
  0x7a   : > { %4950 = vmatmul.mubr.msk.f32.gmra.mrb[18].mxu1 %vm330_vm0, %v6154_v31  ;;  %5176 = vmatmul.mubr.msk.f32.gmra.mrb[2].mxu0 %vm330_vm0, %v6039_v7  ;;  %v6185_v7 = vld [vmem:[%s5692_s30 + $0x110] sm:$0xff] }
  0x7b   : > { %4952 = vmatprep.mubr.msk.f32.mxu1 %vm330_vm0, %v6159_v0  ;;  %5178 = vmatprep.mubr.msk.f32.mxu0 %vm330_vm0, %v6045_v10  ;;  %v6188_v10 = vld [vmem:[%s5692_s30 + $0x120] sm:$0xff] }
  0x7e   : > { %4953 = vmatmul.mubr.msk.f32.gmra.mrb[20].mxu1 %vm330_vm0, %v6171_v28  ;;  %5179 = vmatmul.mubr.msk.f32.gmra.mrb[4].mxu0 %vm330_vm0, %v6059_v57  ;;  %v6199_v57 = vld [vmem:[%s5692_s30 + $0x128] sm:$0xff] }
  0x7f   : > { %4955 = vmatprep.mubr.msk.f32.mxu1 %vm330_vm0, %v6174_v5  ;;  %5181 = vmatprep.mubr.msk.f32.mxu0 %vm330_vm0, %v6065_v51  ;;  %v6202_v51 = vld [vmem:[%s5692_s30 + $0x138] sm:$0xff] }
  0x82   : > { %4956 = vmatmul.mubr.msk.f32.gmra.mrb[22].mxu1 %vm330_vm0, %v6185_v7  ;;  %5182 = vmatmul.mubr.msk.f32.gmra.mrb[6].mxu0 %vm330_vm0, %v6079_v47  ;;  %v6213_v47 = vld [vmem:[%s5692_s30 + $0x140] sm:$0xff] }
  0x83   : > { %4958 = vmatprep.mubr.msk.f32.mxu1 %vm330_vm0, %v6188_v10  ;;  %5184 = vmatprep.mubr.msk.f32.mxu0 %vm330_vm0, %v6085_v43  ;;  %v6216_v43 = vld [vmem:[%s5692_s30 + $0x150] sm:$0xff] }
  0x86   : > { %4959 = vmatmul.mubr.msk.f32.gmra.mrb[24].mxu1 %vm330_vm0, %v6199_v57  ;;  %5185 = vmatmul.mubr.msk.f32.gmra.mrb[8].mxu0 %vm330_vm0, %v6099_v39  ;;  %v6227_v39 = vld [vmem:[%s5692_s30 + $0x158] sm:$0xff] }
  0x87   : > { %4961 = vmatprep.mubr.msk.f32.mxu1 %vm330_vm0, %v6202_v51  ;;  %5187 = vmatprep.mubr.msk.f32.mxu0 %vm330_vm0, %v6105_v35  ;;  %v6230_v35 = vld [vmem:[%s5692_s30 + $0x168] sm:$0xff] }
  0x8a   : > { %4962 = vmatmul.mubr.msk.f32.gmra.mrb[26].mxu1 %vm330_vm0, %v6213_v47  ;;  %5188 = vmatmul.mubr.msk.f32.gmra.mrb[10].mxu0 %vm330_vm0, %v6119_v62  ;;  %v6241_v62 = vld [vmem:[%s5692_s30 + $0x170] sm:$0xff] }
  0x8b   : > { %4964 = vmatprep.mubr.msk.f32.mxu1 %vm330_vm0, %v6216_v43  ;;  %5190 = vmatprep.mubr.msk.f32.mxu0 %vm330_vm0, %v6125_v59 }
  0x8e   : > { %4965 = vmatmul.mubr.msk.f32.gmra.mrb[28].mxu1 %vm330_vm0, %v6227_v39  ;;  %5191 = vmatmul.mubr.msk.f32.gmra.mrb[12].mxu0 %vm330_vm0, %v6136_v33  ;;  %v974_v33 = vld [vmem:[%s5692_s30 + $0xa] sm:$0xff] }
  0x8f   : > { %4967 = vmatprep.mubr.msk.f32.mxu1 %vm330_vm0, %v6230_v35  ;;  %5193 = vmatprep.mubr.msk.f32.mxu0 %vm330_vm0, %v6139_v29 }
  0x92   : > { %4968 = vmatmul.mubr.msk.f32.gmra.mrb[30].mxu1 %vm330_vm0, %v6241_v62  ;;  %5194 = vmatmul.mubr.msk.f32.gmra.mrb[14].mxu0 %vm330_vm0, %v6154_v31 }
  0x93   : > { %4972 = vmatprep.mubr.msk.f32.mxu1 %vm330_vm0, %v973_v3  ;;  %5196 = vmatprep.mubr.msk.f32.mxu0 %vm330_vm0, %v6159_v0  ;;  %v6856_v3 = vld [vmem:[#allocation22_spill] sm:$0xff] }
  0x96   : > { %4973 = vmatmul.mubr.msk.f32.vlgmr.msra.gmra.mrb[0].mxu1 %vm330_vm0, %v974_v33  ;;  %5197 = vmatmul.mubr.msk.f32.gmra.mrb[16].mxu0 %vm330_vm0, %v6171_v28  ;;  %v4405_v33 = vld [vmem:[%s5692_s30 + $0x198] sm:$0xff] }
  0x97   : > { %5021 = vmatpush3.msra.mxu1 %v5987_v61  ;;  %4975 = vmatprep.mubr.msk.f32.mxu1 %vm330_vm0, %v5804_v24  ;;  %v6294_v24 = vld [vmem:[%s5692_s30 + $0x180] sm:$0xff] }
  0x98   : > { %5199 = vmatprep.mubr.msk.f32.mxu0 %vm330_vm0, %v6174_v5  ;;  %5320 = vmatprep.subr.mxu1 %v5676_v1  ;;  %v4406_v61 = vld [vmem:[%s5692_s30 + $0x1a0] sm:$0xff] }
  0x9a   : > { %4976 = vmatmul.mubr.msk.f32.gmra.mrb[2].mxu1 %vm330_vm0, %v5815_v25  ;;  %5200 = vmatmul.mubr.msk.f32.gmra.mrb[18].mxu0 %vm330_vm0, %v6185_v7  ;;  %v6305_v25 = vld [vmem:[%s5692_s30 + $0x188] sm:$0xff] }
  0x9b   : > { %4978 = vmatprep.mubr.msk.f32.mxu1 %vm330_vm0, %v5821_v27  ;;  %5202 = vmatprep.mubr.msk.f32.mxu0 %vm330_vm0, %v6188_v10 }
  0x9e   : > { %4979 = vmatmul.mubr.msk.f32.gmra.mrb[4].mxu1 %vm330_vm0, %v5838_v30  ;;  %5203 = vmatmul.mubr.msk.f32.gmra.mrb[20].mxu0 %vm330_vm0, %v6199_v57 }
  0x9f   : > { %4981 = vmatprep.mubr.msk.f32.mxu1 %vm330_vm0, %v5846_v32  ;;  %5205 = vmatprep.mubr.msk.f32.mxu0 %vm330_vm0, %v6202_v51 }
  0xa2   : > { %4982 = vmatmul.mubr.msk.f32.gmra.mrb[6].mxu1 %vm330_vm0, %v5861_v34  ;;  %5206 = vmatmul.mubr.msk.f32.gmra.mrb[22].mxu0 %vm330_vm0, %v6213_v47 }
  0xa3   : > { %4984 = vmatprep.mubr.msk.f32.mxu1 %vm330_vm0, %v5867_v36  ;;  %5208 = vmatprep.mubr.msk.f32.mxu0 %vm330_vm0, %v6216_v43 }
  0xa6   : > { %4985 = vmatmul.mubr.msk.f32.gmra.mrb[8].mxu1 %vm330_vm0, %v5881_v38  ;;  %5209 = vmatmul.mubr.msk.f32.gmra.mrb[24].mxu0 %vm330_vm0, %v6227_v39 }
  0xa7   : > { %4987 = vmatprep.mubr.msk.f32.mxu1 %vm330_vm0, %v5887_v40  ;;  %5211 = vmatprep.mubr.msk.f32.mxu0 %vm330_vm0, %v6230_v35 }
  0xaa   : > { %4988 = vmatmul.mubr.msk.f32.gmra.mrb[10].mxu1 %vm330_vm0, %v5901_v42  ;;  %5212 = vmatmul.mubr.msk.f32.gmra.mrb[26].mxu0 %vm330_vm0, %v6241_v62 }
  0xab   : > { %4990 = vmatprep.mubr.msk.f32.mxu1 %vm330_vm0, %v5907_v44  ;;  %5214 = vmatprep.mubr.msk.f32.mxu0 %vm330_vm0, %v6294_v24 }
  0xae   : > { %4991 = vmatmul.mubr.msk.f32.gmra.mrb[12].mxu1 %vm330_vm0, %v5921_v46  ;;  %5215 = vmatmul.mubr.msk.f32.gmra.mrb[28].mxu0 %vm330_vm0, %v6305_v25 }
  0xaf   : > { %4993 = vmatprep.mubr.msk.f32.mxu1 %vm330_vm0, %v5927_v48  ;;  %5217 = vmatprep.mubr.msk.f32.mxu0 %vm330_vm0, %v4405_v33  ;;  %v6857_v33 = vld [vmem:[#allocation10_spill] sm:$0xff] }
  0xb2   : > { %4994 = vmatmul.mubr.msk.f32.gmra.mrb[14].mxu1 %vm330_vm0, %v5941_v50  ;;  %5218 = vmatmul.mubr.msk.f32.gmra.mrb[30].mxu0 %vm330_vm0, %v4406_v61  ;;  %v6858_v61 = vld [vmem:[#allocation23_spill] sm:$0xff] }
  0xb3   : > { %4996 = vmatprep.mubr.msk.f32.mxu1 %vm330_vm0, %v5947_v52  ;;  %5222 = vmatprep.mubr.msk.f32.mxu0 %vm330_vm0, %v5701_v8  ;;  %v6840_v8 = vld [vmem:[#allocation27_spill] sm:$0xff] }
  0xb6   : > { %4997 = vmatmul.mubr.msk.f32.gmra.mrb[16].mxu1 %vm330_vm0, %v5961_v54  ;;  %5223 = vmatmul.mubr.msk.f32.vlgmr.msra.gmra.mrb[0].mxu0 %vm330_vm0, %v5714_v11  ;;  %v6841_v11 = vld [vmem:[#allocation2_spill] sm:$0xff] }
  0xb7   : > { %5271 = vmatpush3.msra.mxu0 %v6144_v37  ;;  %4999 = vmatprep.mubr.msk.f32.mxu1 %vm330_vm0, %v5965_v56  ;;  %v6855_v37 = vld [vmem:[#allocation9_spill] sm:$0xff] }
  0xb8   : > { %5225 = vmatprep.mubr.msk.f32.mxu0 %vm330_vm0, %v5720_v12  ;;  %v6842_v12 = vld [vmem:[#allocation15_spill] sm:$0xff] }
  0xba   : > { %5000 = vmatmul.mubr.msk.f32.gmra.mrb[18].mxu1 %vm330_vm0, %v5976_v58  ;;  %5226 = vmatmul.mubr.msk.f32.gmra.mrb[2].mxu0 %vm330_vm0, %v5731_v13  ;;  %v6843_v13 = vld [vmem:[#allocation3_spill] sm:$0xff] }
  0xbb   : > { %5002 = vmatprep.mubr.msk.f32.mxu1 %vm330_vm0, %v5982_v60  ;;  %5228 = vmatprep.mubr.msk.f32.mxu0 %vm330_vm0, %v5734_v14  ;;  %v6844_v14 = vld [vmem:[#allocation16_spill] sm:$0xff] }
  0xbe   : > { %5003 = vmatmul.mubr.msk.f32.gmra.mrb[20].mxu1 %vm330_vm0, %v5999_v63  ;;  %5229 = vmatmul.mubr.msk.f32.gmra.mrb[4].mxu0 %vm330_vm0, %v5745_v15  ;;  %v6845_v15 = vld [vmem:[#allocation4_spill] sm:$0xff] }
  0xbf   : > { %5005 = vmatprep.mubr.msk.f32.mxu1 %vm330_vm0, %v6007_v2  ;;  %5231 = vmatprep.mubr.msk.f32.mxu0 %vm330_vm0, %v5748_v16  ;;  %v6846_v16 = vld [vmem:[#allocation17_spill] sm:$0xff] }
  0xc2   : > { %5006 = vmatmul.mubr.msk.f32.gmra.mrb[22].mxu1 %vm330_vm0, %v6022_v4  ;;  %5232 = vmatmul.mubr.msk.f32.gmra.mrb[6].mxu0 %vm330_vm0, %v5759_v17  ;;  %v6847_v17 = vld [vmem:[#allocation5_spill] sm:$0xff] }
  0xc3   : > { %5008 = vmatprep.mubr.msk.f32.mxu1 %vm330_vm0, %v6028_v6  ;;  %5234 = vmatprep.mubr.msk.f32.mxu0 %vm330_vm0, %v5762_v18  ;;  %v6848_v18 = vld [vmem:[#allocation18_spill] sm:$0xff] }
  0xc6   : > { %5009 = vmatmul.mubr.msk.f32.gmra.mrb[24].mxu1 %vm330_vm0, %v6042_v9  ;;  %5235 = vmatmul.mubr.msk.f32.gmra.mrb[8].mxu0 %vm330_vm0, %v5773_v19  ;;  %v6849_v19 = vld [vmem:[#allocation6_spill] sm:$0xff] }
  0xc7   : > { %5011 = vmatprep.mubr.msk.f32.mxu1 %vm330_vm0, %v6048_v55  ;;  %5237 = vmatprep.mubr.msk.f32.mxu0 %vm330_vm0, %v5776_v20  ;;  %v6850_v20 = vld [vmem:[#allocation19_spill] sm:$0xff] }
  0xca   : > { %5012 = vmatmul.mubr.msk.f32.gmra.mrb[26].mxu1 %vm330_vm0, %v6062_v53  ;;  %5238 = vmatmul.mubr.msk.f32.gmra.mrb[10].mxu0 %vm330_vm0, %v5787_v21  ;;  %v6851_v21 = vld [vmem:[#allocation7_spill] sm:$0xff] }
  0xcb   : > { %5014 = vmatprep.mubr.msk.f32.mxu1 %vm330_vm0, %v6068_v49  ;;  %5240 = vmatprep.mubr.msk.f32.mxu0 %vm330_vm0, %v5790_v22  ;;  %v6853_v22 = vld [vmem:[#allocation8_spill] sm:$0xff] }
  0xce   : > { %5015 = vmatmul.mubr.msk.f32.gmra.mrb[28].mxu1 %vm330_vm0, %v6082_v45  ;;  %5241 = vmatmul.mubr.msk.f32.gmra.mrb[12].mxu0 %vm330_vm0, %v5801_v23  ;;  %v6854_v23 = vld [vmem:[#allocation21_spill] sm:$0xff] }
  0xcf   : > { %5017 = vmatprep.mubr.msk.f32.mxu1 %vm330_vm0, %v6088_v41  ;;  %5243 = vmatprep.mubr.msk.f32.mxu0 %vm330_vm0, %v5818_v26 }
  0xd2   : > { %5018 = vmatmul.mubr.msk.f32.gmra.mrb[30].mxu1 %vm330_vm0, %v6840_v8  ;;  %5244 = vmatmul.mubr.msk.f32.gmra.mrb[14].mxu0 %vm330_vm0, %v6841_v11  ;;  %v6867_v8 = vld [vmem:[#allocation30_spill] sm:$0xff] }
  0xd3   : > { %5022 = vmatprep.mubr.msk.f32.mxu1 %vm330_vm0, %v6842_v12  ;;  %5246 = vmatprep.mubr.msk.f32.mxu0 %vm330_vm0, %v6843_v13  ;;  %v6859_v12 = vld [vmem:[#allocation11_spill] sm:$0xff] }
  0xd6   : > { %5023 = vmatmul.mubr.msk.f32.vlgmr.msra.gmra.mrb[0].mxu1 %vm330_vm0, %v6844_v14  ;;  %5247 = vmatmul.mubr.msk.f32.gmra.mrb[16].mxu0 %vm330_vm0, %v6845_v15  ;;  %v6860_v14 = vld [vmem:[#allocation24_spill] sm:$0xff] }
  0xd7   : > { %5321 = vmatpush3.msra.mxu1 %v5676_v1  ;;  %5025 = vmatprep.mubr.msk.f32.mxu1 %vm330_vm0, %v6846_v16  ;;  %v6852_v1 = vld [vmem:[#allocation20_spill] sm:$0xff] }
  0xd8   : > { %5249 = vmatprep.mubr.msk.f32.mxu0 %vm330_vm0, %v6847_v17  ;;  %v6861_v16 = vld [vmem:[#allocation12_spill] sm:$0xff] }
  0xda   : > { %5026 = vmatmul.mubr.msk.f32.gmra.mrb[2].mxu1 %vm330_vm0, %v6848_v18  ;;  %5250 = vmatmul.mubr.msk.f32.gmra.mrb[18].mxu0 %vm330_vm0, %v6849_v19  ;;  %v6862_v18 = vld [vmem:[#allocation25_spill] sm:$0xff] }
  0xdb   : > { %5028 = vmatprep.mubr.msk.f32.mxu1 %vm330_vm0, %v6850_v20  ;;  %5252 = vmatprep.mubr.msk.f32.mxu0 %vm330_vm0, %v6851_v21  ;;  %v6863_v20 = vld [vmem:[#allocation13_spill] sm:$0xff] }
  0xde   : > { %5029 = vmatmul.mubr.msk.f32.gmra.mrb[4].mxu1 %vm330_vm0, %v6852_v1  ;;  %5253 = vmatmul.mubr.msk.f32.gmra.mrb[20].mxu0 %vm330_vm0, %v6853_v22  ;;  %v6430_v1 = vld [vmem:[%s5692_s30 + $0x181] sm:$0xff] }
  0xdf   : > { %5031 = vmatprep.mubr.msk.f32.mxu1 %vm330_vm0, %v6854_v23  ;;  %5255 = vmatprep.mubr.msk.f32.mxu0 %vm330_vm0, %v6855_v37  ;;  %v6864_v23 = vld [vmem:[#allocation26_spill] sm:$0xff] }
  0xe2   : > { %5032 = vmatmul.mubr.msk.f32.gmra.mrb[6].mxu1 %vm330_vm0, %v6856_v3  ;;  %5256 = vmatmul.mubr.msk.f32.gmra.mrb[22].mxu0 %vm330_vm0, %v6857_v33  ;;  %v6865_v3 = vld [vmem:[#allocation14_spill] sm:$0xff] }
  0xe3   : > { %5034 = vmatprep.mubr.msk.f32.mxu1 %vm330_vm0, %v6858_v61  ;;  %5258 = vmatprep.mubr.msk.f32.mxu0 %vm330_vm0, %v6859_v12  ;;  %v6866_v61 = vld [vmem:[#allocation28_spill] sm:$0xff] }
  0xe6   : > { %5035 = vmatmul.mubr.msk.f32.gmra.mrb[8].mxu1 %vm330_vm0, %v6860_v14  ;;  %5259 = vmatmul.mubr.msk.f32.gmra.mrb[24].mxu0 %vm330_vm0, %v6861_v16  ;;  %v6441_v14 = vld [vmem:[%s5692_s30 + $0x189] sm:$0xff] }
  0xe7   : > { %5037 = vmatprep.mubr.msk.f32.mxu1 %vm330_vm0, %v6862_v18  ;;  %5261 = vmatprep.mubr.msk.f32.mxu0 %vm330_vm0, %v6863_v20  ;;  %v4470_v18 = vld [vmem:[%s5692_s30 + $0x199] sm:$0xff] }
  0xea   : > { %5038 = vmatmul.mubr.msk.f32.gmra.mrb[10].mxu1 %vm330_vm0, %v6864_v23  ;;  %5262 = vmatmul.mubr.msk.f32.gmra.mrb[26].mxu0 %vm330_vm0, %v6865_v3  ;;  %v4471_v23 = vld [vmem:[%s5692_s30 + $0x1a1] sm:$0xff]  ;;  %v6868_v3 = vld [vmem:[#allocation32_spill] sm:$0xff] }
  0xeb   : > { %5040 = vmatprep.mubr.msk.f32.mxu1 %vm330_vm0, %v6866_v61  ;;  %5264 = vmatprep.mubr.msk.f32.mxu0 %vm330_vm0, %v6430_v1 }
  0xee   : > { %5041 = vmatmul.mubr.msk.f32.gmra.mrb[12].mxu1 %vm330_vm0, %v6867_v8  ;;  %5265 = vmatmul.mubr.msk.f32.gmra.mrb[28].mxu0 %vm330_vm0, %v6441_v14 }
  0xef   : > { %5043 = vmatprep.mubr.msk.f32.mxu1 %vm330_vm0, %v6125_v59  ;;  %5267 = vmatprep.mubr.msk.f32.mxu0 %vm330_vm0, %v4470_v18 }
  0xf2   : > { %5044 = vmatmul.mubr.msk.f32.gmra.mrb[14].mxu1 %vm330_vm0, %v6868_v3  ;;  %5268 = vmatmul.mubr.msk.f32.gmra.mrb[30].mxu0 %vm330_vm0, %v4471_v23 }
  0xf3   : > { %5046 = vmatprep.mubr.msk.f32.mxu1 %vm330_vm0, %v6139_v29  ;;  %5272 = vmatprep.mubr.msk.f32.mxu0 %vm330_vm0, %v5821_v27  ;;  %v6870_v27 = vld [vmem:[#allocation29_spill] sm:$0xff] }
  0xf4   : > { %v4535_v29 = vld [vmem:[%s5692_s30 + $0x19a] sm:$0xff] }
  0xf6   : > { %5047 = vmatmul.mubr.msk.f32.gmra.mrb[16].mxu1 %vm330_vm0, %v6154_v31  ;;  %5273 = vmatmul.mubr.msk.f32.vlgmr.msra.gmra.mrb[0].mxu0 %vm330_vm0, %v5838_v30  ;;  %v6871_v30 = vld [vmem:[#allocation14_spill] sm:$0xff]  ;;  %v6872_v31 = vld [vmem:[#allocation31_spill] sm:$0xff] }
  0xf7   : > { %5049 = vmatprep.mubr.msk.f32.mxu1 %vm330_vm0, %v6159_v0  ;;  %5275 = vmatprep.mubr.msk.f32.mxu0 %vm330_vm0, %v5846_v32  ;;  %v4536_v32 = vld [vmem:[%s5692_s30 + $0x1a2] sm:$0xff] }
  0xfa   : > { %5050 = vmatmul.mubr.msk.f32.gmra.mrb[18].mxu1 %vm330_vm0, %v6171_v28  ;;  %5276 = vmatmul.mubr.msk.f32.gmra.mrb[2].mxu0 %vm330_vm0, %v5861_v34 }
  0xfb   : > { %5052 = vmatprep.mubr.msk.f32.mxu1 %vm330_vm0, %v6174_v5  ;;  %5278 = vmatprep.mubr.msk.f32.mxu0 %vm330_vm0, %v5867_v36 }
  0xfe   : > { %5053 = vmatmul.mubr.msk.f32.gmra.mrb[20].mxu1 %vm330_vm0, %v6185_v7  ;;  %5279 = vmatmul.mubr.msk.f32.gmra.mrb[4].mxu0 %vm330_vm0, %v5881_v38 }
  0xff   : > { %5055 = vmatprep.mubr.msk.f32.mxu1 %vm330_vm0, %v6188_v10  ;;  %5281 = vmatprep.mubr.msk.f32.mxu0 %vm330_vm0, %v5887_v40 }
 0x102   : > { %5056 = vmatmul.mubr.msk.f32.gmra.mrb[22].mxu1 %vm330_vm0, %v6199_v57  ;;  %5282 = vmatmul.mubr.msk.f32.gmra.mrb[6].mxu0 %vm330_vm0, %v5901_v42 }
 0x103   : > { %5058 = vmatprep.mubr.msk.f32.mxu1 %vm330_vm0, %v6202_v51  ;;  %5284 = vmatprep.mubr.msk.f32.mxu0 %vm330_vm0, %v5907_v44 }
 0x106   : > { %5059 = vmatmul.mubr.msk.f32.gmra.mrb[24].mxu1 %vm330_vm0, %v6213_v47  ;;  %5285 = vmatmul.mubr.msk.f32.gmra.mrb[8].mxu0 %vm330_vm0, %v5921_v46 }
 0x107   : > { %5061 = vmatprep.mubr.msk.f32.mxu1 %vm330_vm0, %v6216_v43  ;;  %5287 = vmatprep.mubr.msk.f32.mxu0 %vm330_vm0, %v5927_v48 }
 0x10a   : > { %5062 = vmatmul.mubr.msk.f32.gmra.mrb[26].mxu1 %vm330_vm0, %v6227_v39  ;;  %5288 = vmatmul.mubr.msk.f32.gmra.mrb[10].mxu0 %vm330_vm0, %v5941_v50 }
 0x10b   : > { %5064 = vmatprep.mubr.msk.f32.mxu1 %vm330_vm0, %v6230_v35  ;;  %5290 = vmatprep.mubr.msk.f32.mxu0 %vm330_vm0, %v5947_v52 }
 0x10e   : > { %5065 = vmatmul.mubr.msk.f32.gmra.mrb[28].mxu1 %vm330_vm0, %v6241_v62  ;;  %5291 = vmatmul.mubr.msk.f32.gmra.mrb[12].mxu0 %vm330_vm0, %v5961_v54 }
 0x10f   : > { %5067 = vmatprep.mubr.msk.f32.mxu1 %vm330_vm0, %v6294_v24  ;;  %5293 = vmatprep.mubr.msk.f32.mxu0 %vm330_vm0, %v5965_v56 }
 0x112   : > { %5068 = vmatmul.mubr.msk.f32.gmra.mrb[30].mxu1 %vm330_vm0, %v6305_v25  ;;  %5294 = vmatmul.mubr.msk.f32.gmra.mrb[14].mxu0 %vm330_vm0, %v5976_v58 }
 0x113   : > { %5096 = vmatprep.mubr.msk.f32.mxu1 %vm330_vm0, %v5818_v26  ;;  %5296 = vmatprep.mubr.msk.f32.mxu0 %vm330_vm0, %v5982_v60  ;;  %v6869_v26 = vld [vmem:[#allocation27_spill] sm:$0xff] }
 0x116   : > { %5097 = vmatmul.mubr.msk.f32.vlgmr.msra.gmra.mrb[16].mxu1 %vm330_vm0, %v6841_v11  ;;  %5297 = vmatmul.mubr.msk.f32.gmra.mrb[16].mxu0 %vm330_vm0, %v5999_v63 }
 0x117   : > { %5099 = vmatprep.mubr.msk.f32.mxu1 %vm330_vm0, %v6843_v13  ;;  %5299 = vmatprep.mubr.msk.f32.mxu0 %vm330_vm0, %v6007_v2 }
 0x11a   : > { %5100 = vmatmul.mubr.msk.f32.gmra.mrb[18].mxu1 %vm330_vm0, %v6845_v15  ;;  %5300 = vmatmul.mubr.msk.f32.gmra.mrb[18].mxu0 %vm330_vm0, %v6022_v4 }
 0x11b   : > { %5102 = vmatprep.mubr.msk.f32.mxu1 %vm330_vm0, %v6847_v17  ;;  %5302 = vmatprep.mubr.msk.f32.mxu0 %vm330_vm0, %v6028_v6 }
 0x11e   : > { %5103 = vmatmul.mubr.msk.f32.gmra.mrb[20].mxu1 %vm330_vm0, %v6849_v19  ;;  %5303 = vmatmul.mubr.msk.f32.gmra.mrb[20].mxu0 %vm330_vm0, %v6042_v9 }
 0x11f   : > { %5105 = vmatprep.mubr.msk.f32.mxu1 %vm330_vm0, %v6851_v21  ;;  %5305 = vmatprep.mubr.msk.f32.mxu0 %vm330_vm0, %v6048_v55 }
 0x122   : > { %5106 = vmatmul.mubr.msk.f32.gmra.mrb[22].mxu1 %vm330_vm0, %v6853_v22  ;;  %5306 = vmatmul.mubr.msk.f32.gmra.mrb[22].mxu0 %vm330_vm0, %v6062_v53 }
 0x123   : > { %5108 = vmatprep.mubr.msk.f32.mxu1 %vm330_vm0, %v6855_v37  ;;  %5308 = vmatprep.mubr.msk.f32.mxu0 %vm330_vm0, %v6068_v49 }
 0x126   : > { %5109 = vmatmul.mubr.msk.f32.gmra.mrb[24].mxu1 %vm330_vm0, %v6857_v33  ;;  %5309 = vmatmul.mubr.msk.f32.gmra.mrb[24].mxu0 %vm330_vm0, %v6082_v45 }
 0x127   : > { %5111 = vmatprep.mubr.msk.f32.mxu1 %vm330_vm0, %v6859_v12  ;;  %5311 = vmatprep.mubr.msk.f32.mxu0 %vm330_vm0, %v6088_v41 }
 0x12a   : > { %5112 = vmatmul.mubr.msk.f32.gmra.mrb[26].mxu1 %vm330_vm0, %v6861_v16  ;;  %5312 = vmatmul.mubr.msk.f32.gmra.mrb[26].mxu0 %vm330_vm0, %v6869_v26 }
 0x12b   : > { %5114 = vmatprep.mubr.msk.f32.mxu1 %vm330_vm0, %v6863_v20  ;;  %5314 = vmatprep.mubr.msk.f32.mxu0 %vm330_vm0, %v6870_v27 }
 0x12e   : > { %5115 = vmatmul.mubr.msk.f32.gmra.mrb[28].mxu1 %vm330_vm0, %v6871_v30  ;;  %5315 = vmatmul.mubr.msk.f32.gmra.mrb[28].mxu0 %vm330_vm0, %v6872_v31 }
 0x12f   : > { %5117 = vmatprep.mubr.msk.f32.mxu1 %vm330_vm0, %v6430_v1  ;;  %5317 = vmatprep.mubr.msk.f32.mxu0 %vm330_vm0, %v4535_v29 }
 0x132   : > { %5118 = vmatmul.mubr.msk.f32.gmra.mrb[30].mxu1 %vm330_vm0, %v6441_v14  ;;  %5318 = vmatmul.mubr.msk.f32.gmra.mrb[30].mxu0 %vm330_vm0, %v4536_v32 }
 0x1a9   : > { %v5024_v34 = vpop.f32.mrb[0].mxu1 }
 0x1aa   : > { %v1559_v35 = vpop.f32.mrb[1].mxu1 }
 0x1ad   : > { %v5027_v36 = vpop.f32.mrb[2].mxu1 }
 0x1ae   : > { %v1569_v38 = vpop.f32.mrb[3].mxu1 }
 0x1b1   : > { %v5030_v39 = vpop.f32.mrb[4].mxu1 }
 0x1b2   : > { %v1579_v40 = vpop.f32.mrb[5].mxu1 }
 0x1b5   : > { %v5033_v41 = vpop.f32.mrb[6].mxu1 }
 0x1b6   : > { %v1589_v42 = vpop.f32.mrb[7].mxu1 }
 0x1b9   : > { %v6583_v43 = vpop.f32.mrb[8].mxu1 }
 0x1ba   : > { %v6585_v44 = vpop.f32.mrb[9].mxu1 }
 0x1bd   : > { %v6587_v45 = vpop.f32.mrb[10].mxu1 }
 0x1be   : > { %v6589_v46 = vpop.f32.mrb[11].mxu1 }
 0x1c1   : > { %v6591_v47 = vpop.f32.mrb[12].mxu1 }
 0x1c2   : > { %v6593_v48 = vpop.f32.mrb[13].mxu1 }
 0x1c5   : > { %v6595_v49 = vpop.f32.mrb[14].mxu1 }
 0x1c6   : > { %v6597_v50 = vpop.f32.mrb[15].mxu1 }
 0x1c9   : > { %v5274_v51 = vpop.f32.mrb[0].mxu0 }
 0x1ca   : > { %v5322_v52 = vadd.f32 %v5274_v51, %v5024_v34  ;;  %v3497_v53 = vpop.f32.mrb[1].mxu0 }
 0x1cb   : > { %v5323_v54 = vadd.f32 %v3497_v53, %v1559_v35 }
 0x1cc   : > { %3690 = vst.msk [vmem:[%s6603_s22 + $0x8] sm:$0xff] %vm3688_vm1, %v5322_v52  ;;  %v3722_v56 = vsel %vm3688_vm1, %v5322_v52, 0.0  ;;  %v3791_v58 = vmul.f32 %v5322_v52, %v5322_v52 }
 0x1cd   : > { %3689 = vst.msk [vmem:[%s6603_s22] sm:$0xff] %vm3688_vm1, %v5323_v54  ;;  %v3721_v59 = vsel %vm3688_vm1, %v5323_v54, 0.0  ;;  %v3790_v60 = vmul.f32 %v5323_v54, %v5323_v54  ;;  %v5277_v62 = vpop.f32.mrb[2].mxu0 }
 0x1ce   : > { %v3823_v63 = vsel %vm3688_vm1, %v3791_v58, 0.0  ;;  %v3723_v0 = vadd.f32 %v3722_v56, %v3721_v59  ;;  %v5324_v2 = vadd.f32 %v5277_v62, %v5027_v36  ;;  %v3507_v4 = vpop.f32.mrb[3].mxu0 }
 0x1cf   : > { %v3822_v5 = vsel %vm3688_vm1, %v3790_v60, 0.0  ;;  %v5325_v6 = vadd.f32 %v3507_v4, %v1569_v38 }
 0x1d0   : > { %v3824_v7 = vadd.f32 %v3823_v63, %v3822_v5  ;;  %3692 = vst.msk [vmem:[%s6603_s22 + $0x18] sm:$0xff] %vm3688_vm1, %v5324_v2  ;;  %v3793_v9 = vmul.f32 %v5324_v2, %v5324_v2  ;;  %v3726_v8 = vsel %vm3688_vm1, %v5324_v2, 0.0 }
 0x1d1   : > { %3691 = vst.msk [vmem:[%s6603_s22 + $0x10] sm:$0xff] %vm3688_vm1, %v5325_v6  ;;  %v3724_v10 = vsel %vm3688_vm1, %v5325_v6, 0.0  ;;  %v3792_v55 = vmul.f32 %v5325_v6, %v5325_v6  ;;  %v5280_v57 = vpop.f32.mrb[4].mxu0 }
 0x1d2   : > { %v3725_v28 = vadd.f32 %v3724_v10, %v3723_v0  ;;  %v5326_v24 = vadd.f32 %v5280_v57, %v5030_v39  ;;  %v3517_v25 = vpop.f32.mrb[5].mxu0  ;;  %v3827_v19 = vsel %vm3688_vm1, %v3793_v9, 0.0 }
 0x1d3   : > { %v3825_v11 = vsel %vm3688_vm1, %v3792_v55, 0.0  ;;  %v5327_v13 = vadd.f32 %v3517_v25, %v1579_v40 }
 0x1d4   : > { %v3826_v15 = vadd.f32 %v3825_v11, %v3824_v7  ;;  %3694 = vst.msk [vmem:[%s6603_s22 + $0x28] sm:$0xff] %vm3688_vm1, %v5326_v24  ;;  %v3727_v17 = vadd.f32 %v3726_v8, %v3725_v28  ;;  %v3795_v21 = vmul.f32 %v5326_v24, %v5326_v24  ;;  %v3730_v3 = vsel %vm3688_vm1, %v5326_v24, 0.0 }
 0x1d5   : > { %3693 = vst.msk [vmem:[%s6603_s22 + $0x20] sm:$0xff] %vm3688_vm1, %v5327_v13  ;;  %v3728_v22 = vsel %vm3688_vm1, %v5327_v13, 0.0  ;;  %v3794_v37 = vmul.f32 %v5327_v13, %v5327_v13  ;;  %v5283_v33 = vpop.f32.mrb[6].mxu0 }
 0x1d6   : > { %v3729_v12 = vadd.f32 %v3728_v22, %v3727_v17  ;;  %v3828_v16 = vadd.f32 %v3827_v19, %v3826_v15  ;;  %v5328_v20 = vadd.f32 %v5283_v33, %v5033_v41  ;;  %v3527_v1 = vpop.f32.mrb[7].mxu0  ;;  %v3831_v26 = vsel %vm3688_vm1, %v3795_v21, 0.0 }
 0x1d7   : > { %v3829_v61 = vsel %vm3688_vm1, %v3794_v37, 0.0  ;;  %v5329_v14 = vadd.f32 %v3527_v1, %v1589_v42 }
 0x1d8   : > { %v3830_v18 = vadd.f32 %v3829_v61, %v3828_v16  ;;  %3696 = vst.msk [vmem:[%s6603_s22 + $0x38] sm:$0xff] %vm3688_vm1, %v5328_v20  ;;  %v3731_v23 = vadd.f32 %v3730_v3, %v3729_v12  ;;  %v3797_v27 = vmul.f32 %v5328_v20, %v5328_v20  ;;  %v3734_v38 = vsel %vm3688_vm1, %v5328_v20, 0.0 }
 0x1d9   : > { %3695 = vst.msk [vmem:[%s6603_s22 + $0x30] sm:$0xff] %vm3688_vm1, %v5329_v14  ;;  %v3732_v29 = vsel %vm3688_vm1, %v5329_v14, 0.0  ;;  %v3796_v30 = vmul.f32 %v5329_v14, %v5329_v14  ;;  %v5286_v31 = vpop.f32.mrb[8].mxu0 }
 0x1da   : > { %v3733_v32 = vadd.f32 %v3732_v29, %v3731_v23  ;;  %v3832_v34 = vadd.f32 %v3831_v26, %v3830_v18  ;;  %v5330_v35 = vadd.f32 %v5286_v31, %v6583_v43  ;;  %v3537_v36 = vpop.f32.mrb[9].mxu0  ;;  %v3835_v51 = vsel %vm3688_vm1, %v3797_v27, 0.0 }
 0x1db   : > { %v3833_v39 = vsel %vm3688_vm1, %v3796_v30, 0.0  ;;  %v5331_v40 = vadd.f32 %v3537_v36, %v6585_v44 }
 0x1dc   : > { %v3834_v41 = vadd.f32 %v3833_v39, %v3832_v34  ;;  %3698 = vst.msk [vmem:[%s6603_s22 + $0x48] sm:$0xff] %vm3688_vm1, %v5330_v35  ;;  %v3735_v42 = vadd.f32 %v3734_v38, %v3733_v32  ;;  %v3799_v52 = vmul.f32 %v5330_v35, %v5330_v35  ;;  %v3738_v60 = vsel %vm3688_vm1, %v5330_v35, 0.0 }
 0x1dd   : > { %3697 = vst.msk [vmem:[%s6603_s22 + $0x40] sm:$0xff] %vm3688_vm1, %v5331_v40  ;;  %v3736_v43 = vsel %vm3688_vm1, %v5331_v40, 0.0  ;;  %v3798_v53 = vmul.f32 %v5331_v40, %v5331_v40  ;;  %v5289_v54 = vpop.f32.mrb[10].mxu0 }
 0x1de   : > { %v3737_v56 = vadd.f32 %v3736_v43, %v3735_v42  ;;  %v3836_v58 = vadd.f32 %v3835_v51, %v3834_v41  ;;  %v5332_v59 = vadd.f32 %v5289_v54, %v6587_v45  ;;  %v3547_v44 = vpop.f32.mrb[11].mxu0  ;;  %v3839_v4 = vsel %vm3688_vm1, %v3799_v52, 0.0 }
 0x1df   : > { %v3837_v62 = vsel %vm3688_vm1, %v3798_v53, 0.0  ;;  %v5333_v63 = vadd.f32 %v3547_v44, %v6589_v46 }
 0x1e0   : > { %v3838_v0 = vadd.f32 %v3837_v62, %v3836_v58  ;;  %3700 = vst.msk [vmem:[%s6603_s22 + $0x58] sm:$0xff] %vm3688_vm1, %v5332_v59  ;;  %v3739_v2 = vadd.f32 %v3738_v60, %v3737_v56  ;;  %v3801_v5 = vmul.f32 %v5332_v59, %v5332_v59  ;;  %v3742_v57 = vsel %vm3688_vm1, %v5332_v59, 0.0 }
 0x1e1   : > { %3699 = vst.msk [vmem:[%s6603_s22 + $0x50] sm:$0xff] %vm3688_vm1, %v5333_v63  ;;  %v3740_v45 = vsel %vm3688_vm1, %v5333_v63, 0.0  ;;  %v3800_v6 = vmul.f32 %v5333_v63, %v5333_v63  ;;  %v5292_v7 = vpop.f32.mrb[12].mxu0 }
 0x1e2   : > { %v3741_v9 = vadd.f32 %v3740_v45, %v3739_v2  ;;  %v3840_v10 = vadd.f32 %v3839_v4, %v3838_v0  ;;  %v5334_v55 = vadd.f32 %v5292_v7, %v6591_v47  ;;  %v3557_v46 = vpop.f32.mrb[13].mxu0  ;;  %v3843_v11 = vsel %vm3688_vm1, %v3801_v5, 0.0 }
 0x1e3   : > { %v3841_v28 = vsel %vm3688_vm1, %v3800_v6, 0.0  ;;  %v5335_v24 = vadd.f32 %v3557_v46, %v6593_v48 }
 0x1e4   : > { %v3842_v25 = vadd.f32 %v3841_v28, %v3840_v10  ;;  %3702 = vst.msk [vmem:[%s6603_s22 + $0x68] sm:$0xff] %vm3688_vm1, %v5334_v55  ;;  %v3743_v8 = vadd.f32 %v3742_v57, %v3741_v9  ;;  %v3803_v13 = vmul.f32 %v5334_v55, %v5334_v55  ;;  %v3746_v37 = vsel %vm3688_vm1, %v5334_v55, 0.0 }
 0x1e5   : > { %3701 = vst.msk [vmem:[%s6603_s22 + $0x60] sm:$0xff] %vm3688_vm1, %v5335_v24  ;;  %v3744_v47 = vsel %vm3688_vm1, %v5335_v24, 0.0  ;;  %v3802_v15 = vmul.f32 %v5335_v24, %v5335_v24  ;;  %v5295_v17 = vpop.f32.mrb[14].mxu0 }
 0x1e6   : > { %v3745_v19 = vadd.f32 %v3744_v47, %v3743_v8  ;;  %v3844_v21 = vadd.f32 %v3843_v11, %v3842_v25  ;;  %v5336_v22 = vadd.f32 %v5295_v17, %v6595_v49  ;;  %v3567_v48 = vpop.f32.mrb[15].mxu0  ;;  %v3847_v1 = vsel %vm3688_vm1, %v3803_v13, 0.0 }
 0x1e7   : > { %v3845_v33 = vsel %vm3688_vm1, %v3802_v15, 0.0  ;;  %v5337_v12 = vadd.f32 %v3567_v48, %v6597_v50 }
 0x1e8   : > { %v3846_v16 = vadd.f32 %v3845_v33, %v3844_v21  ;;  %3704 = vst.msk [vmem:[%s6603_s22 + $0x78] sm:$0xff] %vm3688_vm1, %v5336_v22  ;;  %v3747_v20 = vadd.f32 %v3746_v37, %v3745_v19  ;;  %v3805_v3 = vmul.f32 %v5336_v22, %v5336_v22  ;;  %v3750_v30 = vsel %vm3688_vm1, %v5336_v22, 0.0 }
 0x1e9   : > { %3703 = vst.msk [vmem:[%s6603_s22 + $0x70] sm:$0xff] %vm3688_vm1, %v5337_v12  ;;  %v3748_v61 = vsel %vm3688_vm1, %v5337_v12, 0.0  ;;  %v3804_v49 = vmul.f32 %v5337_v12, %v5337_v12  ;;  %v5098_v14 = vpop.f32.mrb[16].mxu1  ;;  %v5298_v18 = vpop.f32.mrb[16].mxu0 }
 0x1ea   : > { %v3749_v23 = vadd.f32 %v3748_v61, %v3747_v20  ;;  %v3848_v26 = vadd.f32 %v3847_v1, %v3846_v16  ;;  %v5338_v27 = vadd.f32 %v5298_v18, %v5098_v14  ;;  %v2026_v50 = vpop.f32.mrb[17].mxu1  ;;  %v3577_v29 = vpop.f32.mrb[17].mxu0  ;;  %v3851_v36 = vsel %vm3688_vm1, %v3805_v3, 0.0 }
 0x1eb   : > { %v3849_v31 = vsel %vm3688_vm1, %v3804_v49, 0.0  ;;  %v5339_v32 = vadd.f32 %v3577_v29, %v2026_v50 }
 0x1ec   : > { %v3850_v34 = vadd.f32 %v3849_v31, %v3848_v26  ;;  %3706 = vst.msk [vmem:[%s6603_s22 + $0x88] sm:$0xff] %vm3688_vm1, %v5338_v27  ;;  %v3751_v35 = vadd.f32 %v3750_v30, %v3749_v23  ;;  %v3807_v38 = vmul.f32 %v5338_v27, %v5338_v27  ;;  %v3754_v56 = vsel %vm3688_vm1, %v5338_v27, 0.0 }
 0x1ed   : > { %3705 = vst.msk [vmem:[%s6603_s22 + $0x80] sm:$0xff] %vm3688_vm1, %v5339_v32  ;;  %v3752_v39 = vsel %vm3688_vm1, %v5339_v32, 0.0  ;;  %v3806_v40 = vmul.f32 %v5339_v32, %v5339_v32  ;;  %v5101_v41 = vpop.f32.mrb[18].mxu1  ;;  %v5301_v42 = vpop.f32.mrb[18].mxu0 }
 0x1ee   : > { %v3753_v51 = vadd.f32 %v3752_v39, %v3751_v35  ;;  %v3852_v52 = vadd.f32 %v3851_v36, %v3850_v34  ;;  %v5340_v43 = vadd.f32 %v5301_v42, %v5101_v41  ;;  %v2036_v53 = vpop.f32.mrb[19].mxu1  ;;  %v3587_v54 = vpop.f32.mrb[19].mxu0  ;;  %v3855_v62 = vsel %vm3688_vm1, %v3807_v38, 0.0 }
 0x1ef   : > { %v3853_v58 = vsel %vm3688_vm1, %v3806_v40, 0.0  ;;  %v5341_v59 = vadd.f32 %v3587_v54, %v2036_v53 }
 0x1f0   : > { %v3854_v44 = vadd.f32 %v3853_v58, %v3852_v52  ;;  %3708 = vst.msk [vmem:[%s6603_s22 + $0x98] sm:$0xff] %vm3688_vm1, %v5340_v43  ;;  %v3755_v60 = vadd.f32 %v3754_v56, %v3753_v51  ;;  %v3809_v63 = vmul.f32 %v5340_v43, %v5340_v43  ;;  %v3758_v55 = vsel %vm3688_vm1, %v5340_v43, 0.0 }
 0x1f1   : > { %3707 = vst.msk [vmem:[%s6603_s22 + $0x90] sm:$0xff] %vm3688_vm1, %v5341_v59  ;;  %v3756_v0 = vsel %vm3688_vm1, %v5341_v59, 0.0  ;;  %v3808_v2 = vmul.f32 %v5341_v59, %v5341_v59  ;;  %v5104_v4 = vpop.f32.mrb[20].mxu1  ;;  %v5304_v5 = vpop.f32.mrb[20].mxu0 }
 0x1f2   : > { %v3757_v45 = vadd.f32 %v3756_v0, %v3755_v60  ;;  %v3856_v6 = vadd.f32 %v3855_v62, %v3854_v44  ;;  %v5342_v7 = vadd.f32 %v5304_v5, %v5104_v4  ;;  %v2046_v9 = vpop.f32.mrb[21].mxu1  ;;  %v3597_v10 = vpop.f32.mrb[21].mxu0  ;;  %v3859_v25 = vsel %vm3688_vm1, %v3809_v63, 0.0 }
 0x1f3   : > { %v3857_v46 = vsel %vm3688_vm1, %v3808_v2, 0.0  ;;  %v5343_v57 = vadd.f32 %v3597_v10, %v2046_v9 }
 0x1f4   : > { %v3858_v28 = vadd.f32 %v3857_v46, %v3856_v6  ;;  %3710 = vst.msk [vmem:[%s6603_s22 + $0xa8] sm:$0xff] %vm3688_vm1, %v5342_v7  ;;  %v3759_v24 = vadd.f32 %v3758_v55, %v3757_v45  ;;  %v3811_v8 = vmul.f32 %v5342_v7, %v5342_v7  ;;  %v3762_v37 = vsel %vm3688_vm1, %v5342_v7, 0.0 }
 0x1f5   : > { %3709 = vst.msk [vmem:[%s6603_s22 + $0xa0] sm:$0xff] %vm3688_vm1, %v5343_v57  ;;  %v3760_v11 = vsel %vm3688_vm1, %v5343_v57, 0.0  ;;  %v3810_v13 = vmul.f32 %v5343_v57, %v5343_v57  ;;  %v5107_v47 = vpop.f32.mrb[22].mxu1  ;;  %v5307_v15 = vpop.f32.mrb[22].mxu0 }
 0x1f6   : > { %v3761_v17 = vadd.f32 %v3760_v11, %v3759_v24  ;;  %v3860_v19 = vadd.f32 %v3859_v25, %v3858_v28  ;;  %v5344_v21 = vadd.f32 %v5307_v15, %v5107_v47  ;;  %v2056_v22 = vpop.f32.mrb[23].mxu1  ;;  %v3607_v48 = vpop.f32.mrb[23].mxu0  ;;  %v3863_v1 = vsel %vm3688_vm1, %v3811_v8, 0.0 }
 0x1f7   : > { %v3861_v33 = vsel %vm3688_vm1, %v3810_v13, 0.0  ;;  %v5345_v12 = vadd.f32 %v3607_v48, %v2056_v22 }
 0x1f8   : > { %v3862_v16 = vadd.f32 %v3861_v33, %v3860_v19  ;;  %3712 = vst.msk [vmem:[%s6603_s22 + $0xb8] sm:$0xff] %vm3688_vm1, %v5344_v21  ;;  %v3763_v20 = vadd.f32 %v3762_v37, %v3761_v17  ;;  %v3813_v3 = vmul.f32 %v5344_v21, %v5344_v21  ;;  %v3766_v30 = vsel %vm3688_vm1, %v5344_v21, 0.0 }
 0x1f9   : > { %3711 = vst.msk [vmem:[%s6603_s22 + $0xb0] sm:$0xff] %vm3688_vm1, %v5345_v12  ;;  %v3764_v61 = vsel %vm3688_vm1, %v5345_v12, 0.0  ;;  %v3812_v49 = vmul.f32 %v5345_v12, %v5345_v12  ;;  %v5110_v14 = vpop.f32.mrb[24].mxu1  ;;  %v5310_v18 = vpop.f32.mrb[24].mxu0 }
 0x1fa   : > { %v3765_v23 = vadd.f32 %v3764_v61, %v3763_v20  ;;  %v3864_v26 = vadd.f32 %v3863_v1, %v3862_v16  ;;  %v5346_v27 = vadd.f32 %v5310_v18, %v5110_v14  ;;  %v2066_v50 = vpop.f32.mrb[25].mxu1  ;;  %v3617_v29 = vpop.f32.mrb[25].mxu0  ;;  %v3867_v36 = vsel %vm3688_vm1, %v3813_v3, 0.0 }
 0x1fb   : > { %v3865_v31 = vsel %vm3688_vm1, %v3812_v49, 0.0  ;;  %v5347_v32 = vadd.f32 %v3617_v29, %v2066_v50 }
 0x1fc   : > { %v3866_v34 = vadd.f32 %v3865_v31, %v3864_v26  ;;  %3714 = vst.msk [vmem:[%s6603_s22 + $0xc8] sm:$0xff] %vm3688_vm1, %v5346_v27  ;;  %v3767_v35 = vadd.f32 %v3766_v30, %v3765_v23  ;;  %v3815_v38 = vmul.f32 %v5346_v27, %v5346_v27  ;;  %v3770_v56 = vsel %vm3688_vm1, %v5346_v27, 0.0 }
 0x1fd   : > { %3713 = vst.msk [vmem:[%s6603_s22 + $0xc0] sm:$0xff] %vm3688_vm1, %v5347_v32  ;;  %v3768_v39 = vsel %vm3688_vm1, %v5347_v32, 0.0  ;;  %v3814_v40 = vmul.f32 %v5347_v32, %v5347_v32  ;;  %v5113_v41 = vpop.f32.mrb[26].mxu1  ;;  %v5313_v42 = vpop.f32.mrb[26].mxu0 }
 0x1fe   : > { %v3769_v51 = vadd.f32 %v3768_v39, %v3767_v35  ;;  %v3868_v52 = vadd.f32 %v3867_v36, %v3866_v34  ;;  %v5348_v43 = vadd.f32 %v5313_v42, %v5113_v41  ;;  %v2076_v53 = vpop.f32.mrb[27].mxu1  ;;  %v3627_v54 = vpop.f32.mrb[27].mxu0  ;;  %v3871_v62 = vsel %vm3688_vm1, %v3815_v38, 0.0 }
 0x1ff   : > { %v3869_v58 = vsel %vm3688_vm1, %v3814_v40, 0.0  ;;  %v5349_v59 = vadd.f32 %v3627_v54, %v2076_v53 }
 0x200   : > { %v3870_v44 = vadd.f32 %v3869_v58, %v3868_v52  ;;  %3716 = vst.msk [vmem:[%s6603_s22 + $0xd8] sm:$0xff] %vm3688_vm1, %v5348_v43  ;;  %v3771_v60 = vadd.f32 %v3770_v56, %v3769_v51  ;;  %v3817_v63 = vmul.f32 %v5348_v43, %v5348_v43  ;;  %v3774_v55 = vsel %vm3688_vm1, %v5348_v43, 0.0 }
 0x201   : > { %3715 = vst.msk [vmem:[%s6603_s22 + $0xd0] sm:$0xff] %vm3688_vm1, %v5349_v59  ;;  %v3772_v0 = vsel %vm3688_vm1, %v5349_v59, 0.0  ;;  %v3816_v2 = vmul.f32 %v5349_v59, %v5349_v59  ;;  %v5116_v4 = vpop.f32.mrb[28].mxu1  ;;  %v5316_v5 = vpop.f32.mrb[28].mxu0 }
 0x202   : > { %v3773_v45 = vadd.f32 %v3772_v0, %v3771_v60  ;;  %v3872_v6 = vadd.f32 %v3871_v62, %v3870_v44  ;;  %v5350_v7 = vadd.f32 %v5316_v5, %v5116_v4  ;;  %v2086_v9 = vpop.f32.mrb[29].mxu1  ;;  %v3637_v10 = vpop.f32.mrb[29].mxu0  ;;  %v3875_v25 = vsel %vm3688_vm1, %v3817_v63, 0.0 }
 0x203   : > { %v3873_v46 = vsel %vm3688_vm1, %v3816_v2, 0.0  ;;  %v5351_v57 = vadd.f32 %v3637_v10, %v2086_v9 }
 0x204   : > { %v3874_v28 = vadd.f32 %v3873_v46, %v3872_v6  ;;  %3718 = vst.msk [vmem:[%s6603_s22 + $0xe8] sm:$0xff] %vm3688_vm1, %v5350_v7  ;;  %v3775_v24 = vadd.f32 %v3774_v55, %v3773_v45  ;;  %v3819_v8 = vmul.f32 %v5350_v7, %v5350_v7  ;;  %v3778_v37 = vsel %vm3688_vm1, %v5350_v7, 0.0 }
 0x205   : > { %3717 = vst.msk [vmem:[%s6603_s22 + $0xe0] sm:$0xff] %vm3688_vm1, %v5351_v57  ;;  %v3776_v11 = vsel %vm3688_vm1, %v5351_v57, 0.0  ;;  %v3818_v13 = vmul.f32 %v5351_v57, %v5351_v57  ;;  %v5119_v47 = vpop.f32.mrb[30].mxu1  ;;  %v5319_v15 = vpop.f32.mrb[30].mxu0 }
 0x206   : > { %v3777_v17 = vadd.f32 %v3776_v11, %v3775_v24  ;;  %v3876_v19 = vadd.f32 %v3875_v25, %v3874_v28  ;;  %v5352_v21 = vadd.f32 %v5319_v15, %v5119_v47  ;;  %v2096_v22 = vpop.f32.mrb[31].mxu1  ;;  %v3647_v48 = vpop.f32.mrb[31].mxu0  ;;  %v3879_v1 = vsel %vm3688_vm1, %v3819_v8, 0.0 }
 0x207   : > { %v3877_v33 = vsel %vm3688_vm1, %v3818_v13, 0.0  ;;  %v5353_v12 = vadd.f32 %v3647_v48, %v2096_v22 }
 0x208   : > { %v3878_v16 = vadd.f32 %v3877_v33, %v3876_v19  ;;  %3720 = vst.msk [vmem:[%s6603_s22 + $0xf8] sm:$0xff] %vm3688_vm1, %v5352_v21  ;;  %v3779_v20 = vadd.f32 %v3778_v37, %v3777_v17  ;;  %v3821_v3 = vmul.f32 %v5352_v21, %v5352_v21  ;;  %v3782_v23 = vsel %vm3688_vm1, %v5352_v21, 0.0 }
 0x209   : > { %3719 = vst.msk [vmem:[%s6603_s22 + $0xf0] sm:$0xff] %vm3688_vm1, %v5353_v12  ;;  %v3780_v61 = vsel %vm3688_vm1, %v5353_v12, 0.0  ;;  %v3820_v49 = vmul.f32 %v5353_v12, %v5353_v12 }
 0x20a   : > { %v3781_v14 = vadd.f32 %v3780_v61, %v3779_v20  ;;  %v3880_v18 = vadd.f32 %v3879_v1, %v3878_v16  ;;  %v3883_v29 = vsel %vm3688_vm1, %v3821_v3, 0.0 }
 0x20b   : > { %v3881_v26 = vsel %vm3688_vm1, %v3820_v49, 0.0 }
 0x20c   : > { %v3783_v27 = vadd.f32 %v3782_v23, %v3781_v14  ;;  %v3882_v50 = vadd.f32 %v3881_v26, %v3880_v18 }
 0x20e   : > { %v3784_v30 = vrot.slane %v3783_v27, 4  ;;  %v3884_v31 = vadd.f32 %v3883_v29, %v3882_v50 }
 0x210   : > { %v3785_v32 = vadd.f32 %v3784_v30, %v3783_v27  ;;  %v3885_v34 = vrot.slane %v3884_v31, 4 }
 0x212   : > { %v3786_v35 = vrot.slane %v3785_v32, 2  ;;  %v3886_v36 = vadd.f32 %v3885_v34, %v3884_v31 }
 0x214   : > { %v3787_v38 = vadd.f32 %v3786_v35, %v3785_v32  ;;  %v3887_v39 = vrot.slane %v3886_v36, 2 }
 0x216   : > { %v3788_v40 = vrot.slane %v3787_v38, 1  ;;  %v3888_v41 = vadd.f32 %v3887_v39, %v3886_v36 }
 0x218   : > { %v3789_v42 = vadd.f32 %v3788_v40, %v3787_v38  ;;  %v3889_v51 = vrot.slane %v3888_v41, 1 }
 0x21a   : > { %v3890_v52 = vadd.f32 %v3889_v51, %v3888_v41  ;;  %3891 = vst.msk [vmem:[%s252_s26] sm:$0xff] %vm3688_vm1, %v3789_v42 }
 0x21c   : > { %3892 = vst.msk [vmem:[%s259_s29] sm:$0xff] %vm3688_vm1, %v3890_v52 }
 0x21d PF: > { %s15_s17 = sadd.s32 1, %s5625_s17   ;;  %s6873_s15 = smov %s5621_s16 }
 0x21e   : > { %p12_p5 = scmp.ge.s32.totalorder %s15_s17, 4   ;;  %s6874_s16 = smov %s6876_s18 }
 0x220   :  { %14 = sbr.rel (!%p12_p5) target bundleno = 2 (0x2), region = 93 }

// kernel: discriminator_forward.9
= control target key start
LH: loop header
LB: loop body
LE: loop exit
PB: predicated region body
PF: predicated region fallthrough
CT: control target
= control target key end

     0   :  { %s2397_s15 = smov 0   ;;  %s2399_s16 = smov 0   ;;  %s2690_s0 = inlined_call_operand.vmem [shape: f32[2,4,9,9,16], index: 0, kind: input, shape index: {}]   ;;  %s2691_s1 = inlined_call_operand.vmem [shape: f32[9,16,16], index: 1, kind: input, shape index: {}]   ;;  %s2692_s2 = inlined_call_operand.vmem [shape: f32[2,8,8,16], index: 2, kind: output, shape index: {0}]   ;;  %s2693_s3 = inlined_call_operand.vmem [shape: f32[2,1,8,16], index: 3, kind: output, shape index: {1}]   ;;  %s2694_s4 = inlined_call_operand.vmem [shape: f32[2,1,8,16], index: 4, kind: output, shape index: {2}]  }
   0x1   :  { %s2401_s17 = smov 0  }
   0x2 LB: > { %s27_s18 = sadd.s32 1, %s2366_s16  ;;  %p1834_p0 = scmp.ge.s32.totalorder %s2370_s17, 1  ;;  %s2370_s17 = sphi %s2401_s17, %s15_s17   ;;  %s2366_s16 = sphi %s2399_s16, %s2696_s16   ;;  %s2362_s15 = sphi %s2397_s15, %s2695_s15  }
   0x3   : > { %p29_p1 = scmp.ge.s32.totalorder %s27_s18, 2  ;;  %p185_p2 = scmp.lt.s32.totalorder %s2370_s17, 3 }
   0x5   : > { %s2698_s18 = smov (%p29_p1, %s27_s18), 0  ;;  %p186_p3 = pnand %p1834_p0, %p185_p2 }
   0x6   : > { %v1848_v0 = vld [vmem:[%s2691_s1 + $0x10] sm:$0xff] (!%p186_p3)  ;;  %v1849_v1 = vld [vmem:[%s2691_s1 + $0x18] sm:$0xff] (!%p186_p3)  ;;  %v1902_v2 = vld [vmem:[%s2691_s1 + $0x40] sm:$0xff] (!%p186_p3)  ;;  %p229_p4 = scmp.lt.s32.totalorder (!%p186_p3), %s2362_s15, 1  ;;  %vm284_vm0 = vcmask (!%p186_p3), 130048  }
   0x7   : > { %189 = sbr.rel (%p186_p3) target bundleno = 324 (0x144), region = 28  ;;  %v2221_v3 = vpack.c.bf16 (!%p186_p3), %v1849_v1, %v1848_v0  ;;  %v1903_v4 = vld [vmem:[%s2691_s1 + $0x48] sm:$0xff] (!%p186_p3)  ;;  %v269_v5 = vld [vmem:[%s2691_s1] sm:$0xff] (!%p186_p3)  ;;  %v1920_v9 = vld [vmem:[%s2691_s1 + $0x50] sm:$0xff] (!%p186_p3) }
   0x8   : > { %v270_v6 = vld [vmem:[%s2691_s1 + $0x8] sm:$0xff] (!%p186_p3)  ;;  %v2433_v7 = vpack.c.bf16 (!%p186_p3), %v1903_v4, %v1902_v2  ;;  %v1921_v10 = vld [vmem:[%s2691_s1 + $0x58] sm:$0xff] (!%p186_p3)  ;;  %v1938_v12 = vld [vmem:[%s2691_s1 + $0x60] sm:$0xff] (!%p186_p3) }
   0x9   : > { %v2225_v8 = vpack.c.bf16 (!%p186_p3), %v270_v6, %v269_v5  ;;  %2222 = vmatprep.subr.bf16.mxu1 (!%p186_p3), %v2221_v3  ;;  %v2241_v11 = vpack.c.bf16 (!%p186_p3), %v1921_v10, %v1920_v9  ;;  %v1939_v13 = vld [vmem:[%s2691_s1 + $0x68] sm:$0xff] (!%p186_p3)  ;;  %v1866_v14 = vld [vmem:[%s2691_s1 + $0x20] sm:$0xff] (!%p186_p3)  ;;  %v1956_v28 = vld [vmem:[%s2691_s1 + $0x70] sm:$0xff] (!%p186_p3) }
   0xa   : > { %2238 = vmatprep.subr.bf16.mxu0 (!%p186_p3), %v2433_v7  ;;  %2224 = vmatpush3.bf16.msra.mxu1 (!%p186_p3), %v2221_v3  ;;  %v1867_v15 = vld [vmem:[%s2691_s1 + $0x28] sm:$0xff] (!%p186_p3)  ;;  %v2245_v22 = vpack.c.bf16 (!%p186_p3), %v1939_v13, %v1938_v12  ;;  %v1957_v29 = vld [vmem:[%s2691_s1 + $0x78] sm:$0xff] (!%p186_p3)  ;;  %v1884_v39 = vld [vmem:[%s2691_s1 + $0x30] sm:$0xff] (!%p186_p3) }
   0xb   : > { %2240 = vmatpush3.bf16.msra.mxu0 (!%p186_p3), %v2433_v7  ;;  %2226 = vmatprep.subr.bf16.mxu1 (!%p186_p3), %v2225_v8  ;;  %v2229_v23 = vpack.c.bf16 (!%p186_p3), %v1867_v15, %v1866_v14  ;;  %v2249_v33 = vpack.c.bf16 (!%p186_p3), %v1957_v29, %v1956_v28  ;;  %v1885_v40 = vld [vmem:[%s2691_s1 + $0x38] sm:$0xff] (!%p186_p3)  ;;  %v1974_v49 = vld [vmem:[%s2691_s1 + $0x80] sm:$0xff] (!%p186_p3)  ;;  %v1975_v50 = vld [vmem:[%s2691_s1 + $0x88] sm:$0xff] (!%p186_p3) }
   0xc   : > { %2242 = vmatprep.subr.bf16.mxu0 (!%p186_p3), %v2241_v11  ;;  %v2233_v44 = vpack.c.bf16 (!%p186_p3), %v1885_v40, %v1884_v39  ;;  %v2253_v53 = vpack.c.bf16 (!%p186_p3), %v1975_v50, %v1974_v49 }
   0xe   : > { %s2700_s15 = smov (!%p229_p4, %s2362_s15), 1 }
   0xf   : > { %s2323_s9 = smul.u32 576, %s2700_s15  ;;  %s1986_s11 = sshll.u32 %s2700_s15, 6 }
  0x10   : > { %s2638_s14 = scalar_lea.vmem %s2692_s2, %s1986_s11  ;;  %s1838_s19 = sshll.u32 %s2700_s15, 3 }
  0x11   : > { %s2461_s24 = scalar_lea.vmem %s2690_s0, %s2323_s9  ;;  %s250_s22 = scalar_lea.vmem %s2693_s3, %s1838_s19 }
  0x12   : > { %v1840_v16 = vld [vmem:[%s2461_s24 + $0x90] sm:$0xff]  ;;  %v2466_v18 = vld [vmem:[%s2461_s24 + $0xa0] sm:$0xff]  ;;  %s257_s25 = scalar_lea.vmem %s2694_s4, %s1838_s19 }
  0x13   : > { %v1894_v17 = vld [vmem:[%s2461_s24 + $0x1b0] sm:$0xff]  ;;  %2081 = vmatprep.mubr.msk.f32.mxu1 %vm284_vm0, %v1840_v16  ;;  %v1895_v19 = vld [vmem:[%s2461_s24 + $0x1c0] sm:$0xff] }
  0x14   : > { %2145 = vmatprep.mubr.msk.f32.mxu0 %vm284_vm0, %v1894_v17  ;;  %v2472_v20 = vld [vmem:[%s2461_s24 + $0xb0] sm:$0xff]  ;;  %2082 = vmatmul.mubr.msk.f32.vlgmr.msra.gmra.mrb[0].mxu1 %vm284_vm0, %v2466_v18  ;;  %v2479_v24 = vld [vmem:[%s2461_s24 + $0xc0] sm:$0xff] }
  0x15   : > { %v1896_v21 = vld [vmem:[%s2461_s24 + $0x1d0] sm:$0xff]  ;;  %2146 = vmatmul.mubr.msk.f32.vlgmr.msra.gmra.mrb[0].mxu0 %vm284_vm0, %v1895_v19  ;;  %2228 = vmatpush3.bf16.msra.mxu1 %v2225_v8  ;;  %v1897_v25 = vld [vmem:[%s2461_s24 + $0x1e0] sm:$0xff] }
  0x16   : > { %2244 = vmatpush3.bf16.msra.mxu0 %v2241_v11  ;;  %2084 = vmatprep.mubr.msk.f32.mxu1 %vm284_vm0, %v2472_v20  ;;  %v2486_v26 = vld [vmem:[%s2461_s24 + $0xd0] sm:$0xff]  ;;  %v1912_v27 = vld [vmem:[%s2461_s24 + $0x121] sm:$0xff] }
  0x17   : > { %2148 = vmatprep.mubr.msk.f32.mxu0 %vm284_vm0, %v1896_v21  ;;  %2246 = vmatprep.subr.bf16.mxu0 %v2245_v22  ;;  %v2502_v30 = vld [vmem:[%s2461_s24 + $0xe0] sm:$0xff]  ;;  %v1913_v31 = vld [vmem:[%s2461_s24 + $0x131] sm:$0xff] }
  0x18   : > { %2230 = vmatprep.subr.bf16.mxu1 %v2229_v23  ;;  %2085 = vmatmul.mubr.msk.f32.gmra.mrb[2].mxu1 %vm284_vm0, %v2479_v24  ;;  %v2506_v32 = vld [vmem:[%s2461_s24 + $0xf0] sm:$0xff]  ;;  %v1914_v34 = vld [vmem:[%s2461_s24 + $0x141] sm:$0xff] }
  0x19   : > { %2149 = vmatmul.mubr.msk.f32.gmra.mrb[2].mxu0 %vm284_vm0, %v1897_v25  ;;  %2087 = vmatprep.mubr.msk.f32.mxu1 %vm284_vm0, %v2486_v26  ;;  %v2515_v35 = vld [vmem:[%s2461_s24 + $0x100] sm:$0xff]  ;;  %v1915_v36 = vld [vmem:[%s2461_s24 + $0x151] sm:$0xff] }
  0x1a   : > { %2161 = vmatprep.mubr.msk.f32.mxu0 %vm284_vm0, %v1912_v27  ;;  %v261_v37 = vld [vmem:[%s2461_s24] sm:$0xff]  ;;  %v262_v41 = vld [vmem:[%s2461_s24 + $0x10] sm:$0xff] }
  0x1b   : > { %v1916_v38 = vld [vmem:[%s2461_s24 + $0x161] sm:$0xff]  ;;  %v1917_v42 = vld [vmem:[%s2461_s24 + $0x171] sm:$0xff] }
  0x1c   : > { %2088 = vmatmul.mubr.msk.f32.gmra.mrb[4].mxu1 %vm284_vm0, %v2502_v30  ;;  %v263_v43 = vld [vmem:[%s2461_s24 + $0x20] sm:$0xff]  ;;  %v264_v46 = vld [vmem:[%s2461_s24 + $0x30] sm:$0xff] }
  0x1d   : > { %2162 = vmatmul.mubr.msk.f32.vlgmr.msra.gmra.mrb[0].mxu0 %vm284_vm0, %v1913_v31  ;;  %2090 = vmatprep.mubr.msk.f32.mxu1 %vm284_vm0, %v2506_v32  ;;  %v1918_v45 = vld [vmem:[%s2461_s24 + $0x181] sm:$0xff]  ;;  %v1919_v47 = vld [vmem:[%s2461_s24 + $0x191] sm:$0xff] }
  0x1e   : > { %2248 = vmatpush3.bf16.msra.mxu0 %v2245_v22  ;;  %2164 = vmatprep.mubr.msk.f32.mxu0 %vm284_vm0, %v1914_v34  ;;  %v265_v48 = vld [vmem:[%s2461_s24 + $0x40] sm:$0xff]  ;;  %v266_v51 = vld [vmem:[%s2461_s24 + $0x50] sm:$0xff] }
  0x1f   : > { %2250 = vmatprep.subr.bf16.mxu0 %v2249_v33  ;;  %v267_v52 = vld [vmem:[%s2461_s24 + $0x60] sm:$0xff]  ;;  %v268_v54 = vld [vmem:[%s2461_s24 + $0x70] sm:$0xff] }
  0x20   : > { %2091 = vmatmul.mubr.msk.f32.gmra.mrb[6].mxu1 %vm284_vm0, %v2515_v35  ;;  %v543_v55 = vld [vmem:[%s2461_s24 + $0x1] sm:$0xff]  ;;  %v544_v56 = vld [vmem:[%s2461_s24 + $0x11] sm:$0xff] }
  0x21   : > { %2165 = vmatmul.mubr.msk.f32.gmra.mrb[2].mxu0 %vm284_vm0, %v1915_v36  ;;  %2097 = vmatprep.mubr.msk.f32.mxu1 %vm284_vm0, %v261_v37  ;;  %v545_v57 = vld [vmem:[%s2461_s24 + $0x21] sm:$0xff]  ;;  %v546_v58 = vld [vmem:[%s2461_s24 + $0x31] sm:$0xff] }
  0x22   : > { %2167 = vmatprep.mubr.msk.f32.mxu0 %vm284_vm0, %v1916_v38  ;;  %v1937_v59 = vld [vmem:[%s2461_s24 + $0x80] sm:$0xff]  ;;  %v548_v61 = vld [vmem:[%s2461_s24 + $0x51] sm:$0xff] }
  0x23   : > { %v547_v60 = vld [vmem:[%s2461_s24 + $0x41] sm:$0xff]  ;;  %v550_v63 = vld [vmem:[%s2461_s24 + $0x71] sm:$0xff] }
  0x24   : > { %2098 = vmatmul.mubr.msk.f32.vlgmr.msra.gmra.mrb[0].mxu1 %vm284_vm0, %v262_v41  ;;  %v549_v62 = vld [vmem:[%s2461_s24 + $0x61] sm:$0xff]  ;;  %v1877_v1 = vld [vmem:[%s2461_s24 + $0x130] sm:$0xff] }
  0x25   : > { %2168 = vmatmul.mubr.msk.f32.gmra.mrb[4].mxu0 %vm284_vm0, %v1917_v42  ;;  %2232 = vmatpush3.bf16.msra.mxu1 %v2229_v23  ;;  %v1876_v0 = vld [vmem:[%s2461_s24 + $0x120] sm:$0xff]  ;;  %v1879_v3 = vld [vmem:[%s2461_s24 + $0x150] sm:$0xff] }
  0x26   : > { %2100 = vmatprep.mubr.msk.f32.mxu1 %vm284_vm0, %v263_v43  ;;  %2170 = vmatprep.mubr.msk.f32.mxu0 %vm284_vm0, %v1918_v45  ;;  %v1878_v2 = vld [vmem:[%s2461_s24 + $0x140] sm:$0xff]  ;;  %v1955_v4 = vld [vmem:[%s2461_s24 + $0x110] sm:$0xff] }
  0x27   : > { %2234 = vmatprep.subr.bf16.mxu1 %v2233_v44  ;;  %v1880_v5 = vld [vmem:[%s2461_s24 + $0x160] sm:$0xff]  ;;  %v1881_v6 = vld [vmem:[%s2461_s24 + $0x170] sm:$0xff] }
  0x28   : > { %2101 = vmatmul.mubr.msk.f32.gmra.mrb[2].mxu1 %vm284_vm0, %v264_v46  ;;  %v1883_v8 = vld [vmem:[%s2461_s24 + $0x190] sm:$0xff]  ;;  %v1899_v10 = vld [vmem:[%s2461_s24 + $0x200] sm:$0xff] }
  0x29   : > { %2171 = vmatmul.mubr.msk.f32.gmra.mrb[6].mxu0 %vm284_vm0, %v1919_v47  ;;  %2103 = vmatprep.mubr.msk.f32.mxu1 %vm284_vm0, %v265_v48  ;;  %v1898_v9 = vld [vmem:[%s2461_s24 + $0x1f0] sm:$0xff]  ;;  %v1901_v12 = vld [vmem:[%s2461_s24 + $0x220] sm:$0xff] }
  0x2a   : > { %2177 = vmatprep.mubr.msk.f32.mxu0 %vm284_vm0, %v262_v41  ;;  %v1900_v11 = vld [vmem:[%s2461_s24 + $0x210] sm:$0xff]  ;;  %v1973_v13 = vld [vmem:[%s2461_s24 + $0x81] sm:$0xff] }
  0x2c   : > { %2104 = vmatmul.mubr.msk.f32.gmra.mrb[4].mxu1 %vm284_vm0, %v266_v51 }
  0x2d   : > { %2178 = vmatmul.mubr.msk.f32.vlgmr.msra.gmra.mrb[0].mxu0 %vm284_vm0, %v263_v43  ;;  %2106 = vmatprep.mubr.msk.f32.mxu1 %vm284_vm0, %v267_v52 }
  0x2e   : > { %2252 = vmatpush3.bf16.msra.mxu0 %v2249_v33  ;;  %2180 = vmatprep.mubr.msk.f32.mxu0 %vm284_vm0, %v264_v46 }
  0x2f   : > { %2254 = vmatprep.subr.bf16.mxu0 %v2253_v53 }
  0x30   : > { %2107 = vmatmul.mubr.msk.f32.gmra.mrb[6].mxu1 %vm284_vm0, %v268_v54 }
  0x31   : > { %2181 = vmatmul.mubr.msk.f32.gmra.mrb[2].mxu0 %vm284_vm0, %v265_v48  ;;  %2113 = vmatprep.mubr.msk.f32.mxu1 %vm284_vm0, %v543_v55 }
  0x32   : > { %2183 = vmatprep.mubr.msk.f32.mxu0 %vm284_vm0, %v266_v51 }
  0x34   : > { %2114 = vmatmul.mubr.msk.f32.vlgmr.msra.gmra.mrb[0].mxu1 %vm284_vm0, %v544_v56 }
  0x35   : > { %2184 = vmatmul.mubr.msk.f32.gmra.mrb[4].mxu0 %vm284_vm0, %v267_v52  ;;  %2236 = vmatpush3.bf16.msra.mxu1 %v2233_v44 }
  0x36   : > { %2116 = vmatprep.mubr.msk.f32.mxu1 %vm284_vm0, %v545_v57  ;;  %2186 = vmatprep.mubr.msk.f32.mxu0 %vm284_vm0, %v268_v54 }
  0x37   : > { %2257 = vmatprep.subr.bf16.mxu1 %v2433_v7 }
  0x38   : > { %2117 = vmatmul.mubr.msk.f32.gmra.mrb[2].mxu1 %vm284_vm0, %v546_v58 }
  0x39   : > { %2187 = vmatmul.mubr.msk.f32.gmra.mrb[6].mxu0 %vm284_vm0, %v1937_v59  ;;  %2119 = vmatprep.mubr.msk.f32.mxu1 %vm284_vm0, %v547_v60 }
  0x3a   : > { %2193 = vmatprep.mubr.msk.f32.mxu0 %vm284_vm0, %v2466_v18 }
  0x3c   : > { %2120 = vmatmul.mubr.msk.f32.gmra.mrb[4].mxu1 %vm284_vm0, %v548_v61 }
  0x3d   : > { %2194 = vmatmul.mubr.msk.f32.vlgmr.msra.gmra.mrb[0].mxu0 %vm284_vm0, %v2472_v20  ;;  %2122 = vmatprep.mubr.msk.f32.mxu1 %vm284_vm0, %v549_v62 }
  0x3e   : > { %2256 = vmatpush3.bf16.msra.mxu0 %v2253_v53  ;;  %2196 = vmatprep.mubr.msk.f32.mxu0 %vm284_vm0, %v2479_v24 }
  0x40   : > { %2123 = vmatmul.mubr.msk.f32.gmra.mrb[6].mxu1 %vm284_vm0, %v550_v63 }
  0x41   : > { %2197 = vmatmul.mubr.msk.f32.gmra.mrb[2].mxu0 %vm284_vm0, %v2486_v26  ;;  %2129 = vmatprep.mubr.msk.f32.mxu1 %vm284_vm0, %v1876_v0 }
  0x42   : > { %2199 = vmatprep.mubr.msk.f32.mxu0 %vm284_vm0, %v2502_v30 }
  0x44   : > { %2130 = vmatmul.mubr.msk.f32.vlgmr.msra.gmra.mrb[0].mxu1 %vm284_vm0, %v1877_v1 }
  0x45   : > { %2200 = vmatmul.mubr.msk.f32.gmra.mrb[4].mxu0 %vm284_vm0, %v2506_v32  ;;  %2258 = vmatpush3.bf16.msra.mxu1 %v2433_v7  ;;  %v1882_v7 = vld [vmem:[%s2461_s24 + $0x180] sm:$0xff] }
  0x46   : > { %2132 = vmatprep.mubr.msk.f32.mxu1 %vm284_vm0, %v1878_v2  ;;  %2202 = vmatprep.mubr.msk.f32.mxu0 %vm284_vm0, %v2515_v35 }
  0x48   : > { %2133 = vmatmul.mubr.msk.f32.gmra.mrb[2].mxu1 %vm284_vm0, %v1879_v3 }
  0x49   : > { %2203 = vmatmul.mubr.msk.f32.gmra.mrb[6].mxu0 %vm284_vm0, %v1955_v4  ;;  %2135 = vmatprep.mubr.msk.f32.mxu1 %vm284_vm0, %v1880_v5 }
  0x4a   : > { %2209 = vmatprep.mubr.msk.f32.mxu0 %vm284_vm0, %v544_v56 }
  0x4c   : > { %2136 = vmatmul.mubr.msk.f32.gmra.mrb[4].mxu1 %vm284_vm0, %v1881_v6 }
  0x4d   : > { %2210 = vmatmul.mubr.msk.f32.vlgmr.msra.gmra.mrb[0].mxu0 %vm284_vm0, %v545_v57  ;;  %2138 = vmatprep.mubr.msk.f32.mxu1 %vm284_vm0, %v1882_v7 }
  0x4e   : > { %2212 = vmatprep.mubr.msk.f32.mxu0 %vm284_vm0, %v546_v58 }
  0x50   : > { %2139 = vmatmul.mubr.msk.f32.gmra.mrb[6].mxu1 %vm284_vm0, %v1883_v8 }
  0x51   : > { %2213 = vmatmul.mubr.msk.f32.gmra.mrb[2].mxu0 %vm284_vm0, %v547_v60  ;;  %2151 = vmatprep.mubr.msk.f32.mxu1 %vm284_vm0, %v1898_v9 }
  0x52   : > { %2215 = vmatprep.mubr.msk.f32.mxu0 %vm284_vm0, %v548_v61 }
  0x54   : > { %2152 = vmatmul.mubr.msk.f32.vlgmr.msra.gmra.mrb[4].mxu1 %vm284_vm0, %v1899_v10 }
  0x55   : > { %2216 = vmatmul.mubr.msk.f32.gmra.mrb[4].mxu0 %vm284_vm0, %v549_v62  ;;  %2154 = vmatprep.mubr.msk.f32.mxu1 %vm284_vm0, %v1900_v11 }
  0x56   : > { %2218 = vmatprep.mubr.msk.f32.mxu0 %vm284_vm0, %v550_v63 }
  0x58   : > { %2155 = vmatmul.mubr.msk.f32.gmra.mrb[6].mxu1 %vm284_vm0, %v1901_v12 }
  0x59   : > { %2219 = vmatmul.mubr.msk.f32.gmra.mrb[6].mxu0 %vm284_vm0, %v1973_v13 }
 0x117   : > { %v2131_v14 = vpop.f32.mrb[0].mxu1 }
 0x118   : > { %v794_v15 = vpop.f32.mrb[1].mxu1 }
 0x11b   : > { %v2134_v16 = vpop.f32.mrb[2].mxu1 }
 0x11c   : > { %v804_v17 = vpop.f32.mrb[3].mxu1 }
 0x120   : > { %v2211_v18 = vpop.f32.mrb[0].mxu0 }
 0x121   : > { %v2259_v19 = vadd.f32 %v2211_v18, %v2131_v14  ;;  %v1541_v20 = vpop.f32.mrb[1].mxu0 }
 0x122   : > { %v2260_v21 = vadd.f32 %v1541_v20, %v794_v15 }
 0x123   : > { %1589 = vst.msk [vmem:[%s2638_s14 + $0x8] sm:$0xff] %vm284_vm0, %v2259_v19  ;;  %v1597_v22 = vsel %vm284_vm0, %v2259_v19, 0.0  ;;  %v1618_v23 = vmul.f32 %v2259_v19, %v2259_v19 }
 0x124   : > { %1588 = vst.msk [vmem:[%s2638_s14] sm:$0xff] %vm284_vm0, %v2260_v21  ;;  %v1596_v24 = vsel %vm284_vm0, %v2260_v21, 0.0  ;;  %v1617_v25 = vmul.f32 %v2260_v21, %v2260_v21  ;;  %v2214_v26 = vpop.f32.mrb[2].mxu0 }
 0x125   : > { %v1626_v27 = vsel %vm284_vm0, %v1618_v23, 0.0  ;;  %v1598_v28 = vadd.f32 %v1597_v22, %v1596_v24  ;;  %v2261_v29 = vadd.f32 %v2214_v26, %v2134_v16  ;;  %v1551_v30 = vpop.f32.mrb[3].mxu0 }
 0x126   : > { %v1625_v31 = vsel %vm284_vm0, %v1617_v25, 0.0  ;;  %v2262_v32 = vadd.f32 %v1551_v30, %v804_v17 }
 0x127   : > { %v1627_v33 = vadd.f32 %v1626_v27, %v1625_v31  ;;  %1591 = vst.msk [vmem:[%s2638_s14 + $0x18] sm:$0xff] %vm284_vm0, %v2261_v29  ;;  %v1620_v34 = vmul.f32 %v2261_v29, %v2261_v29  ;;  %v2153_v37 = vpop.f32.mrb[4].mxu1  ;;  %v1601_v43 = vsel %vm284_vm0, %v2261_v29, 0.0 }
 0x128   : > { %1590 = vst.msk [vmem:[%s2638_s14 + $0x10] sm:$0xff] %vm284_vm0, %v2262_v32  ;;  %v1599_v35 = vsel %vm284_vm0, %v2262_v32, 0.0  ;;  %v1619_v36 = vmul.f32 %v2262_v32, %v2262_v32  ;;  %v2217_v38 = vpop.f32.mrb[4].mxu0  ;;  %v964_v41 = vpop.f32.mrb[5].mxu1 }
 0x129   : > { %v1600_v39 = vadd.f32 %v1599_v35, %v1598_v28  ;;  %v2263_v40 = vadd.f32 %v2217_v38, %v2153_v37  ;;  %v1561_v42 = vpop.f32.mrb[5].mxu0  ;;  %v1630_v48 = vsel %vm284_vm0, %v1620_v34, 0.0 }
 0x12a   : > { %v1628_v44 = vsel %vm284_vm0, %v1619_v36, 0.0  ;;  %v2264_v45 = vadd.f32 %v1561_v42, %v964_v41 }
 0x12b   : > { %v1629_v46 = vadd.f32 %v1628_v44, %v1627_v33  ;;  %1593 = vst.msk [vmem:[%s2638_s14 + $0x28] sm:$0xff] %vm284_vm0, %v2263_v40  ;;  %v1602_v47 = vadd.f32 %v1601_v43, %v1600_v39  ;;  %v1622_v49 = vmul.f32 %v2263_v40, %v2263_v40  ;;  %v2156_v52 = vpop.f32.mrb[6].mxu1  ;;  %v1605_v59 = vsel %vm284_vm0, %v2263_v40, 0.0 }
 0x12c   : > { %1592 = vst.msk [vmem:[%s2638_s14 + $0x20] sm:$0xff] %vm284_vm0, %v2264_v45  ;;  %v1603_v50 = vsel %vm284_vm0, %v2264_v45, 0.0  ;;  %v1621_v51 = vmul.f32 %v2264_v45, %v2264_v45  ;;  %v2220_v53 = vpop.f32.mrb[6].mxu0  ;;  %v974_v57 = vpop.f32.mrb[7].mxu1 }
 0x12d   : > { %v1604_v54 = vadd.f32 %v1603_v50, %v1602_v47  ;;  %v1631_v55 = vadd.f32 %v1630_v48, %v1629_v46  ;;  %v2265_v56 = vadd.f32 %v2220_v53, %v2156_v52  ;;  %v1571_v58 = vpop.f32.mrb[7].mxu0  ;;  %v1634_v0 = vsel %vm284_vm0, %v1622_v49, 0.0 }
 0x12e   : > { %v1632_v60 = vsel %vm284_vm0, %v1621_v51, 0.0  ;;  %v2266_v61 = vadd.f32 %v1571_v58, %v974_v57 }
 0x12f   : > { %v1633_v62 = vadd.f32 %v1632_v60, %v1631_v55  ;;  %1595 = vst.msk [vmem:[%s2638_s14 + $0x38] sm:$0xff] %vm284_vm0, %v2265_v56  ;;  %v1606_v63 = vadd.f32 %v1605_v59, %v1604_v54  ;;  %v1624_v1 = vmul.f32 %v2265_v56, %v2265_v56  ;;  %v1609_v6 = vsel %vm284_vm0, %v2265_v56, 0.0 }
 0x130   : > { %1594 = vst.msk [vmem:[%s2638_s14 + $0x30] sm:$0xff] %vm284_vm0, %v2266_v61  ;;  %v1607_v2 = vsel %vm284_vm0, %v2266_v61, 0.0  ;;  %v1623_v3 = vmul.f32 %v2266_v61, %v2266_v61 }
 0x131   : > { %v1608_v4 = vadd.f32 %v1607_v2, %v1606_v63  ;;  %v1635_v5 = vadd.f32 %v1634_v0, %v1633_v62  ;;  %v1638_v10 = vsel %vm284_vm0, %v1624_v1, 0.0 }
 0x132   : > { %v1636_v7 = vsel %vm284_vm0, %v1623_v3, 0.0 }
 0x133   : > { %v1610_v8 = vadd.f32 %v1609_v6, %v1608_v4  ;;  %v1637_v9 = vadd.f32 %v1636_v7, %v1635_v5 }
 0x135   : > { %v1611_v11 = vrot.slane %v1610_v8, 4  ;;  %v1639_v12 = vadd.f32 %v1638_v10, %v1637_v9 }
 0x137   : > { %v1612_v13 = vadd.f32 %v1611_v11, %v1610_v8  ;;  %v1640_v14 = vrot.slane %v1639_v12, 4 }
 0x139   : > { %v1613_v15 = vrot.slane %v1612_v13, 2  ;;  %v1641_v16 = vadd.f32 %v1640_v14, %v1639_v12 }
 0x13b   : > { %v1614_v17 = vadd.f32 %v1613_v15, %v1612_v13  ;;  %v1642_v18 = vrot.slane %v1641_v16, 2 }
 0x13d   : > { %v1615_v19 = vrot.slane %v1614_v17, 1  ;;  %v1643_v20 = vadd.f32 %v1642_v18, %v1641_v16 }
 0x13f   : > { %v1616_v21 = vadd.f32 %v1615_v19, %v1614_v17  ;;  %v1644_v22 = vrot.slane %v1643_v20, 1 }
 0x141   : > { %v1645_v23 = vadd.f32 %v1644_v22, %v1643_v20  ;;  %1646 = vst.msk [vmem:[%s250_s22] sm:$0xff] %vm284_vm0, %v1616_v21 }
 0x143   : > { %1647 = vst.msk [vmem:[%s257_s25] sm:$0xff] %vm284_vm0, %v1645_v23 }
 0x144 PF: > { %s15_s17 = sadd.s32 1, %s2370_s17   ;;  %s2695_s15 = smov %s2366_s16 }
 0x145   : > { %p12_p5 = scmp.ge.s32.totalorder %s15_s17, 4   ;;  %s2696_s16 = smov %s2698_s18 }
 0x147   :  { %14 = sbr.rel (!%p12_p5) target bundleno = 2 (0x2), region = 96 }

// kernel: discriminator_forward.11
= control target key start
LH: loop header
LB: loop body
LE: loop exit
PB: predicated region body
PF: predicated region fallthrough
CT: control target
= control target key end

     0   :  { %v253_v0 = vmov 0.0|0.0   ;;  %vm254_vm0 = vmmov 0   ;;  %v255_v3 = vmov 0.0   ;;  %vm32_vm1 = vcmask 130048   ;;  %s316_s1 = inlined_call_operand.vmem [shape: f32[16,32], index: 1, kind: input, shape index: {}]   ;;  %s317_s3 = inlined_call_operand.vmem [shape: f32[32,1], index: 3, kind: input, shape index: {}]   ;;  %s318_s0 = inlined_call_operand.vmem [shape: f32[2,16], index: 0, kind: input, shape index: {}]   ;;  %s319_s4 = inlined_call_operand.<no memory space> [shape: f32[1,1], index: 4, kind: input, shape index: {}]   ;;  %s320_s2 = inlined_call_operand.vmem [shape: f32[1,32], index: 2, kind: input, shape index: {}]   ;;  %s321_s5 = inlined_call_operand.vmem [shape: f32[2,1], index: 5, kind: output, shape index: {}]  }
   0x1   :  { %237 = vmatprep.subr.bf16.mxu0 %v253_v0  ;;  %v23_v1 = vld [vmem:[%s316_s1] sm:$0xff]  ;;  %v24_v2 = vld [vmem:[%s316_s1 + $0x8] sm:$0xff]  ;;  %223 = vmatprep.mubr.msk.f32.mxu0 %vm254_vm0, %v255_v3  ;;  %v111_v9 = vld [vmem:[%s317_s3 + $0x10] sm:$0xff]  ;;  %v10_v12 = vstv %s319_s4  ;;  %vm120_vm3 = vcmask 261120   ;;  %vm200_vm4 = vcmask 1024  }
   0x2   :  { %v238_v4 = vpack.c.bf16 %v24_v2, %v23_v1  ;;  %240 = vmatprep.subr.bf16.mxu1 %v253_v0  ;;  %v109_v5 = vld [vmem:[%s317_s3] sm:$0xff]  ;;  %v110_v6 = vld [vmem:[%s317_s3 + $0x8] sm:$0xff]  ;;  %234 = vmatprep.mubr.msk.f32.mxu1 %vm254_vm0, %v255_v3  ;;  %v112_v10 = vld [vmem:[%s317_s3 + $0x18] sm:$0xff]  ;;  %11 = vst [vmem:[#allocation2] sm:$0x1] %v10_v12 }
   0x3   :  { %v241_v7 = vpack.c.bf16 %v110_v6, %v109_v5  ;;  %v22_v8 = vld [vmem:[%s318_s0] sm:$0x3]  ;;  %v244_v11 = vpack.c.bf16 %v112_v10, %v111_v9 }
   0x4   :  { %239 = vmatpush3.bf16.msra.mxu0 %v238_v4  ;;  %v206_v13 = vld [vmem:[%s320_s2] ss:$0 sm:$0xff] }
   0x5   :  { %242 = vmatpush3.bf16.msra.mxu1 %v241_v7 }
   0x6   :  { %243 = vmatprep.subr.bf16.mxu1 %v253_v0 }
   0x7   :  { %224 = vmatmul.mubr.msk.f32.vlgmr.msra.gmra.mrb[0].mxu0 %vm32_vm1, %v22_v8 }
   0x9   :  { %245 = vmatpush3.bf16.msra.mxu1 %v244_v11  ;;  %v208_v19 = vld [vmem:[#allocation2] ss:$0 sm:$0xff] }
  0xda   :  { %v102_v14 = vpop.f32.mrb[0].mxu0 }
  0xdb   :  { %v103_v15 = vadd.f32 %v206_v13, %v102_v14  ;;  %v225_v16 = vpop.f32.mrb[1].mxu0 }
  0xdd   :  { %vm106_vm2 = vcmp.ge.f32.partialorder %v103_v15, 0.0  ;;  %v107_v17 = vmul.f32 0.2, %v103_v15 }
  0xdf   :  { %v108_v18 = vsel %vm106_vm2, %v103_v15, %v107_v17 }
  0xe0   :  { %235 = vmatmul.mubr.msk.f32.vlgmr.msra.gmra.mrb[0].mxu1 %vm120_vm3, %v108_v18 }
 0x1b3   :  { %v190_v20 = vpop.f32.mrb[0].mxu1 }
 0x1b4   :  { %v191_v21 = vadd.f32 %v208_v19, %v190_v20  ;;  %v236_v22 = vpop.f32.mrb[1].mxu1 }
 0x1b6   :  { %v210_v23 = vmul.f32 -1.442695, %v191_v21 }
 0x1b8   :  { %249 = vpow2.f32 %v210_v23 }
 0x1c2   :  { %v250_v24 = vpop.eup %249 }
 0x1c3   :  { %v197_v25 = vadd.f32 1.0, %v250_v24 }
 0x1c5   :  { %251 = vrcp.f32 %v197_v25 }
 0x1cf   :  { %v252_v26 = vpop.eup %251 }
 0x1d0   :  { %201 = vst.msk [vmem:[%s321_s5] sm:$0x3] %vm200_vm4, %v252_v26 }

</bundles_post_ra>
